<compile_context>
chip_gen: v7x
topology: tpu7x:2x2x1
jax: 0.10.0
libtpu: 0.0.40
codegen_flags: <defaults>
</compile_context>

<pallas_src>
import functools

import jax
import jax.numpy as jnp
from jax.experimental import pallas as pl
from jax.experimental.pallas import tpu as pltpu

LANE = 128                      # MXU lane width for the conv weight matrices
_VMEM_LIMIT = 48 * 1024 * 1024  # < v7x 64 MiB physical, > default scoped limit


def _pick_tile(n, max_tile):
    """Largest tile <= max_tile dividing n (full n if it already fits).

    Tiles smaller than the full dim are kept multiples of 8 (sublane rule).
    """
    if n <= max_tile:
        return n
    start = max_tile - (max_tile % 8)
    for t in range(start, 7, -8):
        if n % t == 0:
            return t
    return n  # fallback: no tiling (rare, odd sizes)


# ----------------------------- Pallas kernels ------------------------------

def _compose_losses_kernel(mask_ref, in_ref, pred_ref, gt_ref, hmask_ref,
                           comp_ref, sums_ref, acc, *, w):
    """Fused compose + hole/valid/tv partial sums.

    Image refs are lane-dense (ROW_TILE, H*W) f32 blocks; hmask is (1, H*W-1)
    marking valid horizontal-neighbour pairs.  acc is SMEM scratch (4,):
    [sum|out-gt|, sum m*|out-gt|, sum tv_h, sum tv_v]; sums_ref is the SMEM
    output written at the last grid step (normalized outside).
    """
    i = pl.program_id(0)

    @pl.when(i == 0)
    def _():
        acc[0] = 0.0
        acc[1] = 0.0
        acc[2] = 0.0
        acc[3] = 0.0

    m = mask_ref[...]
    x_pred = pred_ref[...]
    comp = m * in_ref[...] + (1.0 - m) * x_pred
    comp_ref[...] = comp

    ad = jnp.abs(x_pred - gt_ref[...])
    mad = m * ad                                    # valid numerator; hole = ad - mad

    # total variation on comp in the flattened (rows, H*W) layout
    dcol = jnp.abs(comp[:, :-1] - comp[:, 1:])      # horizontal (needs hmask)
    drow = jnp.abs(comp[:, :-w] - comp[:, w:])      # vertical (all valid)

    acc[0] += jnp.sum(ad)
    acc[1] += jnp.sum(mad)
    acc[2] += jnp.sum(hmask_ref[...] * dcol)
    acc[3] += jnp.sum(drow)

    @pl.when(i == pl.num_programs(0) - 1)
    def _():
        sums_ref[0] = acc[0]
        sums_ref[1] = acc[1]
        sums_ref[2] = acc[2]
        sums_ref[3] = acc[3]


def _matmul_bias_relu_kernel(a_ref, w_ref, b_ref, o_ref, *, cout):
    # a: (TM, Kp) bf16, w: (Kp, 128) bf16 (zero-padded beyond cout),
    # b: (1, 128) f32.  f32 accumulate + bias + ReLU, compact bf16 store.
    acc = jnp.dot(a_ref[...], w_ref[...], preferred_element_type=jnp.float32)
    y = jnp.maximum(acc + b_ref[...], 0.0)
    o_ref[...] = y[:, :cout].astype(o_ref.dtype)


def _feat_style_kernel(f_ref, o_ref, prc_acc, gram_acc, *, b, c, hw):
    """Streaming perceptual + style contribution for one feature level.

    f_ref: (3b, HW_TILE, c) bf16 block of features [comp, out, gt]; grid runs
    over the hw axis.  gram_acc: VMEM (3b, c, c) f32; prc_acc: SMEM (1,) f32.
    o_ref: SMEM (2,) [prc_i, style_i], written at the last step.
    """
    k = pl.program_id(0)

    @pl.when(k == 0)
    def _():
        prc_acc[0] = 0.0
        gram_acc[...] = jnp.zeros_like(gram_acc)

    f = f_ref[...]
    f32 = f.astype(jnp.float32)
    prc_acc[0] += (jnp.sum(jnp.abs(f32[b:2 * b] - f32[2 * b:])) +
                   jnp.sum(jnp.abs(f32[:b] - f32[2 * b:])))

    # gram[b, c, d] += sum_i f[b, i, c] * f[b, i, d]   (bf16 MXU, f32 acc)
    gram_acc[...] += jnp.einsum('bic,bid->bcd', f, f,
                                preferred_element_type=jnp.float32)

    @pl.when(k == pl.num_programs(0) - 1)
    def _():
        o_ref[0] = prc_acc[0] * (1.0 / float(b * hw * c))
        g = gram_acc[...] * (1.0 / float(c * hw))
        g_comp = g[:b]
        g_out = g[b:2 * b]
        g_gt = g[2 * b:]
        o_ref[1] = (jnp.sum(jnp.abs(g_out - g_gt)) +
                    jnp.sum(jnp.abs(g_comp - g_gt))) * (1.0 / float(b * c * c))


# ----------------------------- kernel wrappers ------------------------------

def pallas_compose_losses(mask2d, in2d, pred2d, gt2d, hmask, *, tr, w):
    rows, hw = pred2d.shape
    grid = (rows // tr,)
    img_spec = pl.BlockSpec((tr, hw), lambda i: (i, 0))
    comp, sums = pl.pallas_call(
        functools.partial(_compose_losses_kernel, w=w),
        out_shape=(jax.ShapeDtypeStruct((rows, hw), jnp.float32),
                   jax.ShapeDtypeStruct((4,), jnp.float32)),
        grid=grid,
        in_specs=[img_spec, img_spec, img_spec, img_spec,
                  pl.BlockSpec((1, hw - 1), lambda i: (0, 0))],
        out_specs=(pl.BlockSpec((tr, hw), lambda i: (i, 0)),
                   pl.BlockSpec(memory_space=pltpu.MemorySpace.SMEM)),
        scratch_shapes=[pltpu.SMEM((4,), jnp.float32)],
        compiler_params=pltpu.CompilerParams(
            dimension_semantics=("arbitrary",),      # scalar accumulation axis
            vmem_limit_bytes=_VMEM_LIMIT),
    )(mask2d, in2d, pred2d, gt2d, hmask)
    return comp, sums


def pallas_matmul_bias_relu(a, w, b, *, cout, tm):
    m, kp = a.shape
    grid = (m // tm,)
    return pl.pallas_call(
        functools.partial(_matmul_bias_relu_kernel, cout=cout),
        out_shape=jax.ShapeDtypeStruct((m, cout), jnp.bfloat16),
        grid=grid,
        in_specs=[pl.BlockSpec((tm, kp), lambda i: (i, 0)),
                  pl.BlockSpec((kp, LANE), lambda i: (0, 0)),
                  pl.BlockSpec((1, LANE), lambda i: (0, 0))],
        out_specs=pl.BlockSpec((tm, cout), lambda i: (i, 0)),
        compiler_params=pltpu.CompilerParams(
            dimension_semantics=("parallel",),       # M tiles: megacore on v7x
            vmem_limit_bytes=_VMEM_LIMIT),
    )(a, w, b)


def pallas_feat_style_loss(f, *, b, hw_tile):
    bb, hw, c = f.shape       # bb = 3*b  (comp, out, gt stacked on batch)
    grid = (hw // hw_tile,)
    return pl.pallas_call(
        functools.partial(_feat_style_kernel, b=b, c=c, hw=hw),
        out_shape=jax.ShapeDtypeStruct((2,), jnp.float32),
        grid=grid,
        in_specs=[pl.BlockSpec((bb, hw_tile, c), lambda k: (0, k, 0))],
        out_specs=pl.BlockSpec(memory_space=pltpu.MemorySpace.SMEM),
        scratch_shapes=[pltpu.SMEM((1,), jnp.float32),
                        pltpu.VMEM((bb, c, c), jnp.float32)],
        compiler_params=pltpu.CompilerParams(
            dimension_semantics=("arbitrary",),      # hw is a reduction axis
            vmem_limit_bytes=_VMEM_LIMIT),
    )(f)


# --------------------- synthetic feature extractor (glue) -------------------

def _im2col_nhwc(x, k, stride, pad):
    # x: (N, H, W, C) -> patches (N*Ho*Wo, k*k*C), K-order (kh, kw, C)
    x = jnp.pad(x, ((0, 0), (pad, pad), (pad, pad), (0, 0)))
    n, hp, wp, c = x.shape
    ho = (hp - k) // stride + 1
    wo = (wp - k) // stride + 1
    cols = [x[:, di:di + stride * ho:stride, dj:dj + stride * wo:stride, :]
            for di in range(k) for dj in range(k)]
    p = jnp.concatenate(cols, axis=-1)               # (N, Ho, Wo, k*k*C)
    return p.reshape(n * ho * wo, k * k * c), ho, wo


def init_extractor_params(key):
    # 3 conv stages: 3->8, 8->16, 16->32 channels; 3x3, stride 2, pad 1, ReLU
    chans = [(3, 8), (8, 16), (16, 32)]
    params = []
    for i, (cin, cout) in enumerate(chans):
        kw, kb = jax.random.split(jax.random.fold_in(key, i))
        w = jax.random.normal(kw, (cout, cin, 3, 3), jnp.float32) * 0.1
        b = jax.random.normal(kb, (1, cout), jnp.float32) * 0.01
        params.append((w, b))
    return params


def extractor_compact_features(x_nhwc, params):
    """Single batched pass over [comp; output; gt] (bf16 end-to-end).

    Returns per stage: (features (N, Ho*Wo, Cout) bf16, Cout, Ho*Wo).
    """
    feats = []
    h = x_nhwc                                        # bf16 NHWC
    for (w, b) in params:
        cout, cin, k, _ = w.shape
        patches, ho, wo = _im2col_nhwc(h, k=k, stride=2, pad=1)   # bf16
        kk = patches.shape[1]
        kpad = (-kk) % 8                               # sublane-align K
        if kpad:
            patches = jnp.pad(patches, ((0, 0), (0, kpad)))
        wmat = w.transpose(2, 3, 1, 0).reshape(kk, cout)          # (kh,kw,C)
        wmat = jnp.pad(wmat, ((0, kpad), (0, LANE - cout))).astype(jnp.bfloat16)
        bias = jnp.pad(b, ((0, 0), (0, LANE - cout)))             # f32 epilogue
        m = patches.shape[0]
        tm = _pick_tile(m, 512)
        y = pallas_matmul_bias_relu(patches, wmat, bias, cout=cout, tm=tm)
        n = h.shape[0]
        feats.append((y.reshape(n, ho * wo, cout), cout, ho * wo))
        h = y.reshape(n, ho, wo, cout)                 # next-stage input, bf16
    return feats


# ------------------------------ InpaintingLoss ------------------------------

def inpainting_loss(inp, mask, output, gt, params):
    B, C, H, W = output.shape
    rows, hw = B * C, H * W
    flat = lambda t: t.reshape(rows, hw)               # lane-dense 2D views

    # precomputed horizontal-pair validity mask (drops in-kernel iota/modulo)
    colm = jnp.arange(hw - 1, dtype=jnp.int32)
    hmask = ((colm % W) != (W - 1)).astype(jnp.float32)[None, :]

    tr = _pick_tile(rows, 256)
    comp_flat, sums = pallas_compose_losses(
        flat(mask), flat(inp), flat(output), flat(gt), hmask, tr=tr, w=W)

    n_total = float(rows * hw)
    loss = {
        'hole': (sums[0] - sums[1]) / n_total,
        'valid': sums[1] / n_total,
        'tv': (sums[2] / float(rows * H * (W - 1)) +
               sums[3] / float(rows * (H - 1) * W)),
    }
    output_comp = comp_flat.reshape(B, C, H, W)

    if C == 3:
        imgs = jnp.concatenate([output_comp, output, gt], axis=0)
    elif C == 1:
        to3 = lambda t: jnp.concatenate([t] * 3, axis=1)
        imgs = jnp.concatenate([to3(output_comp), to3(output), to3(gt)], axis=0)
    else:
        raise ValueError('only gray an')

    # Batched extractor pass over [comp; output; gt] in bf16 NHWC.
    imgs_nhwc = imgs.transpose(0, 2, 3, 1).astype(jnp.bfloat16)
    feats = extractor_compact_features(imgs_nhwc, params)

    prc = jnp.float32(0.0)
    style = jnp.float32(0.0)
    for (f, _cout, hw_i) in feats:
        thw = _pick_tile(hw_i, 512)
        ps = pallas_feat_style_loss(f, b=B, hw_tile=thw)
        prc = prc + ps[0]
        style = style + ps[1]
    loss['prc'] = prc
    loss['style'] = style
    return loss


# ---------------------------------- main -------------------------------------

if __name__ == "__main__":
    key = jax.random.PRNGKey(0)
    k1, k2, k3, k4, k5 = jax.random.split(key, 5)

    B, C, H, W = 2, 3, 16, 16
    inp = jax.random.normal(k1, (B, C, H, W), jnp.float32)
    gt = jax.random.normal(k2, (B, C, H, W), jnp.float32)
    output = jax.random.normal(k3, (B, C, H, W), jnp.float32)
    mask = (jax.random.uniform(k4, (B, C, H, W)) > 0.5).astype(jnp.float32)
    params = init_extractor_params(k5)

    loss_fn = jax.jit(inpainting_loss)
    losses = loss_fn(inp, mask, output, gt, params)
    jax.block_until_ready(losses)

    print("KERNEL_OK")
</pallas_src>

<mosaic_0001>
module attributes {stable_mosaic.version = 11 : i64} {
  func.func @_compose_losses_kernel(%arg0: i32, %arg1: memref<6x256xf32, #tpu.memory_space<vmem>>, %arg2: memref<6x256xf32, #tpu.memory_space<vmem>>, %arg3: memref<6x256xf32, #tpu.memory_space<vmem>>, %arg4: memref<6x256xf32, #tpu.memory_space<vmem>>, %arg5: memref<1x255xf32, #tpu.memory_space<vmem>>, %arg6: memref<6x256xf32, #tpu.memory_space<vmem>>, %arg7: memref<4xf32, #tpu.memory_space<smem>>, %arg8: memref<4xf32, #tpu.memory_space<smem>>) attributes {dimension_semantics = [#tpu.dimension_semantics<arbitrary>], iteration_bounds = array<i64: 1>, scalar_prefetch = 0 : i64, scratch_operands = 1 : i64, tpu.core_type = #tpu.core_type<tc>, window_params = [{transform_indices = @transform_0, window_bounds = array<i64: 6, 256>}, {transform_indices = @transform_1, window_bounds = array<i64: 6, 256>}, {transform_indices = @transform_2, window_bounds = array<i64: 6, 256>}, {transform_indices = @transform_3, window_bounds = array<i64: 6, 256>}, {pipeline_mode = #tpu.pipeline_mode<synchronous>, transform_indices = @transform_4, window_bounds = array<i64: 1, 255>}, {transform_indices = @transform_5, window_bounds = array<i64: 6, 256>}, {transform_indices = @transform_6, window_bounds = array<i64: 4>}]} {
    %c0_i32 = arith.constant 0 : i32
    %0 = arith.cmpi eq, %arg0, %c0_i32 : i32
    %1 = arith.extui %0 : i1 to i32
    %c0_i32_0 = arith.constant 0 : i32
    %2 = arith.cmpi ne, %1, %c0_i32_0 : i32
    scf.if %2 {
      %cst_23 = arith.constant 0.000000e+00 : f32
      %c0_24 = arith.constant 0 : index
      %58 = memref.load %arg8[%c0_24] : memref<4xf32, #tpu.memory_space<smem>>
      memref.store %cst_23, %arg8[%c0_24] : memref<4xf32, #tpu.memory_space<smem>>
      %cst_25 = arith.constant 0.000000e+00 : f32
      %c1_26 = arith.constant 1 : index
      %59 = memref.load %arg8[%c1_26] : memref<4xf32, #tpu.memory_space<smem>>
      memref.store %cst_25, %arg8[%c1_26] : memref<4xf32, #tpu.memory_space<smem>>
      %cst_27 = arith.constant 0.000000e+00 : f32
      %c2_28 = arith.constant 2 : index
      %60 = memref.load %arg8[%c2_28] : memref<4xf32, #tpu.memory_space<smem>>
      memref.store %cst_27, %arg8[%c2_28] : memref<4xf32, #tpu.memory_space<smem>>
      %cst_29 = arith.constant 0.000000e+00 : f32
      %c3_30 = arith.constant 3 : index
      %61 = memref.load %arg8[%c3_30] : memref<4xf32, #tpu.memory_space<smem>>
      memref.store %cst_29, %arg8[%c3_30] : memref<4xf32, #tpu.memory_space<smem>>
    } else {
    }
    %c0 = arith.constant 0 : index
    %c0_1 = arith.constant 0 : index
    %3 = vector.load %arg1[%c0, %c0_1] : memref<6x256xf32, #tpu.memory_space<vmem>>, vector<6x256xf32>
    %c0_2 = arith.constant 0 : index
    %c0_3 = arith.constant 0 : index
    %4 = vector.load %arg3[%c0_2, %c0_3] : memref<6x256xf32, #tpu.memory_space<vmem>>, vector<6x256xf32>
    %c0_4 = arith.constant 0 : index
    %c0_5 = arith.constant 0 : index
    %5 = vector.load %arg2[%c0_4, %c0_5] : memref<6x256xf32, #tpu.memory_space<vmem>>, vector<6x256xf32>
    %6 = arith.mulf %3, %5 : vector<6x256xf32>
    %cst = arith.constant 1.000000e+00 : f32
    %7 = vector.broadcast %cst : f32 to vector<6x256xf32>
    %8 = arith.subf %7, %3 : vector<6x256xf32>
    %9 = arith.mulf %8, %4 : vector<6x256xf32>
    %10 = arith.addf %6, %9 : vector<6x256xf32>
    %c0_6 = arith.constant 0 : index
    %c0_7 = arith.constant 0 : index
    %11 = vector.load %arg6[%c0_6, %c0_7] : memref<6x256xf32, #tpu.memory_space<vmem>>, vector<6x256xf32>
    tpu.vector_store %arg6[%c0_6, %c0_7], %10 {strides = array<i32>} : memref<6x256xf32, #tpu.memory_space<vmem>>, vector<6x256xf32>,
    %c0_8 = arith.constant 0 : index
    %c0_9 = arith.constant 0 : index
    %12 = vector.load %arg4[%c0_8, %c0_9] : memref<6x256xf32, #tpu.memory_space<vmem>>, vector<6x256xf32>
    %13 = arith.subf %4, %12 : vector<6x256xf32>
    %14 = math.absf %13 : vector<6x256xf32>
    %15 = arith.mulf %3, %14 : vector<6x256xf32>
    %16 = vector.extract_strided_slice %10 {offsets = [0, 0], sizes = [6, 255], strides = [1, 1]} : vector<6x256xf32> to vector<6x255xf32>
    %17 = vector.extract_strided_slice %10 {offsets = [0, 1], sizes = [6, 255], strides = [1, 1]} : vector<6x256xf32> to vector<6x255xf32>
    %18 = arith.subf %16, %17 : vector<6x255xf32>
    %19 = math.absf %18 : vector<6x255xf32>
    %20 = vector.extract_strided_slice %10 {offsets = [0, 0], sizes = [6, 240], strides = [1, 1]} : vector<6x256xf32> to vector<6x240xf32>
    %21 = vector.extract_strided_slice %10 {offsets = [0, 16], sizes = [6, 240], strides = [1, 1]} : vector<6x256xf32> to vector<6x240xf32>
    %22 = arith.subf %20, %21 : vector<6x240xf32>
    %23 = math.absf %22 : vector<6x240xf32>
    %c0_10 = arith.constant 0 : index
    %24 = memref.load %arg8[%c0_10] : memref<4xf32, #tpu.memory_space<smem>>
    %25 = vector.shape_cast %14 : vector<6x256xf32> to vector<1x6x256xf32>
    %cst_11 = arith.constant dense<0.000000e+00> : vector<1xf32>
    %26 = vector.multi_reduction <add>, %25, %cst_11 [1, 2] : vector<1x6x256xf32> to vector<1xf32>
    %27 = vector.shape_cast %26 : vector<1xf32> to vector<1x1x1xf32>
    %28 = vector.extract %27[0, 0, 0] : f32 from vector<1x1x1xf32>
    %29 = arith.addf %24, %28 : f32
    %c0_12 = arith.constant 0 : index
    %30 = memref.load %arg8[%c0_12] : memref<4xf32, #tpu.memory_space<smem>>
    memref.store %29, %arg8[%c0_12] : memref<4xf32, #tpu.memory_space<smem>>
    %c1 = arith.constant 1 : index
    %31 = memref.load %arg8[%c1] : memref<4xf32, #tpu.memory_space<smem>>
    %32 = vector.shape_cast %15 : vector<6x256xf32> to vector<1x6x256xf32>
    %cst_13 = arith.constant dense<0.000000e+00> : vector<1xf32>
    %33 = vector.multi_reduction <add>, %32, %cst_13 [1, 2] : vector<1x6x256xf32> to vector<1xf32>
    %34 = vector.shape_cast %33 : vector<1xf32> to vector<1x1x1xf32>
    %35 = vector.extract %34[0, 0, 0] : f32 from vector<1x1x1xf32>
    %36 = arith.addf %31, %35 : f32
    %c1_14 = arith.constant 1 : index
    %37 = memref.load %arg8[%c1_14] : memref<4xf32, #tpu.memory_space<smem>>
    memref.store %36, %arg8[%c1_14] : memref<4xf32, #tpu.memory_space<smem>>
    %c2 = arith.constant 2 : index
    %38 = memref.load %arg8[%c2] : memref<4xf32, #tpu.memory_space<smem>>
    %c0_15 = arith.constant 0 : index
    %c0_16 = arith.constant 0 : index
    %39 = vector.load %arg5[%c0_15, %c0_16] : memref<1x255xf32, #tpu.memory_space<vmem>>, vector<1x255xf32>
    %40 = vector.broadcast %39 : vector<1x255xf32> to vector<6x255xf32>
    %41 = arith.mulf %40, %19 : vector<6x255xf32>
    %42 = vector.shape_cast %41 : vector<6x255xf32> to vector<1x6x255xf32>
    %cst_17 = arith.constant dense<0.000000e+00> : vector<1xf32>
    %43 = vector.multi_reduction <add>, %42, %cst_17 [1, 2] : vector<1x6x255xf32> to vector<1xf32>
    %44 = vector.shape_cast %43 : vector<1xf32> to vector<1x1x1xf32>
    %45 = vector.extract %44[0, 0, 0] : f32 from vector<1x1x1xf32>
    %46 = arith.addf %38, %45 : f32
    %c2_18 = arith.constant 2 : index
    %47 = memref.load %arg8[%c2_18] : memref<4xf32, #tpu.memory_space<smem>>
    memref.store %46, %arg8[%c2_18] : memref<4xf32, #tpu.memory_space<smem>>
    %c3 = arith.constant 3 : index
    %48 = memref.load %arg8[%c3] : memref<4xf32, #tpu.memory_space<smem>>
    %49 = vector.shape_cast %23 : vector<6x240xf32> to vector<1x6x240xf32>
    %cst_19 = arith.constant dense<0.000000e+00> : vector<1xf32>
    %50 = vector.multi_reduction <add>, %49, %cst_19 [1, 2] : vector<1x6x240xf32> to vector<1xf32>
    %51 = vector.shape_cast %50 : vector<1xf32> to vector<1x1x1xf32>
    %52 = vector.extract %51[0, 0, 0] : f32 from vector<1x1x1xf32>
    %53 = arith.addf %48, %52 : f32
    %c3_20 = arith.constant 3 : index
    %54 = memref.load %arg8[%c3_20] : memref<4xf32, #tpu.memory_space<smem>>
    memref.store %53, %arg8[%c3_20] : memref<4xf32, #tpu.memory_space<smem>>
    %c0_i32_21 = arith.constant 0 : i32
    %55 = arith.cmpi eq, %arg0, %c0_i32_21 : i32
    %56 = arith.extui %55 : i1 to i32
    %c0_i32_22 = arith.constant 0 : i32
    %57 = arith.cmpi ne, %56, %c0_i32_22 : i32
    scf.if %57 {
      %c0_23 = arith.constant 0 : index
      %58 = memref.load %arg8[%c0_23] : memref<4xf32, #tpu.memory_space<smem>>
      %c0_24 = arith.constant 0 : index
      %59 = memref.load %arg7[%c0_24] : memref<4xf32, #tpu.memory_space<smem>>
      memref.store %58, %arg7[%c0_24] : memref<4xf32, #tpu.memory_space<smem>>
      %c1_25 = arith.constant 1 : index
      %60 = memref.load %arg8[%c1_25] : memref<4xf32, #tpu.memory_space<smem>>
      %c1_26 = arith.constant 1 : index
      %61 = memref.load %arg7[%c1_26] : memref<4xf32, #tpu.memory_space<smem>>
      memref.store %60, %arg7[%c1_26] : memref<4xf32, #tpu.memory_space<smem>>
      %c2_27 = arith.constant 2 : index
      %62 = memref.load %arg8[%c2_27] : memref<4xf32, #tpu.memory_space<smem>>
      %c2_28 = arith.constant 2 : index
      %63 = memref.load %arg7[%c2_28] : memref<4xf32, #tpu.memory_space<smem>>
      memref.store %62, %arg7[%c2_28] : memref<4xf32, #tpu.memory_space<smem>>
      %c3_29 = arith.constant 3 : index
      %64 = memref.load %arg8[%c3_29] : memref<4xf32, #tpu.memory_space<smem>>
      %c3_30 = arith.constant 3 : index
      %65 = memref.load %arg7[%c3_30] : memref<4xf32, #tpu.memory_space<smem>>
      memref.store %64, %arg7[%c3_30] : memref<4xf32, #tpu.memory_space<smem>>
    } else {
    }
    return
  }
  func.func @transform_0(%arg0: i32) -> (i32, i32) {
    %c0_i32 = arith.constant 0 : i32
    %c0_i32_0 = arith.constant 0 : i32
    return %arg0, %c0_i32 : i32, i32
  }
  func.func @transform_1(%arg0: i32) -> (i32, i32) {
    %c0_i32 = arith.constant 0 : i32
    %c0_i32_0 = arith.constant 0 : i32
    return %arg0, %c0_i32 : i32, i32
  }
  func.func @transform_2(%arg0: i32) -> (i32, i32) {
    %c0_i32 = arith.constant 0 : i32
    %c0_i32_0 = arith.constant 0 : i32
    return %arg0, %c0_i32 : i32, i32
  }
  func.func @transform_3(%arg0: i32) -> (i32, i32) {
    %c0_i32 = arith.constant 0 : i32
    %c0_i32_0 = arith.constant 0 : i32
    return %arg0, %c0_i32 : i32, i32
  }
  func.func @transform_4(%arg0: i32) -> (i32, i32) {
    %c0_i32 = arith.constant 0 : i32
    %c0_i32_0 = arith.constant 0 : i32
    %c0_i32_1 = arith.constant 0 : i32
    return %c0_i32, %c0_i32_0 : i32, i32
  }
  func.func @transform_5(%arg0: i32) -> (i32, i32) {
    %c0_i32 = arith.constant 0 : i32
    %c0_i32_0 = arith.constant 0 : i32
    return %arg0, %c0_i32 : i32, i32
  }
  func.func @transform_6(%arg0: i32) -> i32 {
    %c0_i32 = arith.constant 0 : i32
    %c0_i32_0 = arith.constant 0 : i32
    return %c0_i32 : i32
  }
}

module attributes {stable_mosaic.version = 11 : i64} {
  func.func @_matmul_bias_relu_kernel(%arg0: i32, %arg1: memref<384x32xbf16, #tpu.memory_space<vmem>>, %arg2: memref<32x128xbf16, #tpu.memory_space<vmem>>, %arg3: memref<1x128xf32, #tpu.memory_space<vmem>>, %arg4: memref<384x8xbf16, #tpu.memory_space<vmem>>) attributes {dimension_semantics = [#tpu.dimension_semantics<parallel>], iteration_bounds = array<i64: 1>, scalar_prefetch = 0 : i64, scratch_operands = 0 : i64, tpu.core_type = #tpu.core_type<tc>, window_params = [{transform_indices = @transform_0, window_bounds = array<i64: 384, 32>}, {pipeline_mode = #tpu.pipeline_mode<synchronous>, transform_indices = @transform_1, window_bounds = array<i64: 32, 128>}, {pipeline_mode = #tpu.pipeline_mode<synchronous>, transform_indices = @transform_2, window_bounds = array<i64: 1, 128>}, {transform_indices = @transform_3, window_bounds = array<i64: 384, 8>}]} {
    %c0 = arith.constant 0 : index
    %c0_0 = arith.constant 0 : index
    %0 = vector.load %arg1[%c0, %c0_0] : memref<384x32xbf16, #tpu.memory_space<vmem>>, vector<384x32xbf16>
    %c0_1 = arith.constant 0 : index
    %c0_2 = arith.constant 0 : index
    %1 = vector.load %arg2[%c0_1, %c0_2] : memref<32x128xbf16, #tpu.memory_space<vmem>>, vector<32x128xbf16>
    %cst = arith.constant dense<0.000000e+00> : vector<384x128xf32>
    %2 = tpu.matmul %0, %1, %cst {dimension_numbers = #tpu.dot_dimension_numbers<[1], [0], [0], [1], [0, 0, 1, 1], [], []>} : vector<384x32xbf16>, vector<32x128xbf16>, vector<384x128xf32> -> vector<384x128xf32>
    %c0_3 = arith.constant 0 : index
    %c0_4 = arith.constant 0 : index
    %3 = vector.load %arg3[%c0_3, %c0_4] : memref<1x128xf32, #tpu.memory_space<vmem>>, vector<1x128xf32>
    %4 = vector.broadcast %3 : vector<1x128xf32> to vector<384x128xf32>
    %5 = arith.addf %2, %4 : vector<384x128xf32>
    %cst_5 = arith.constant 0.000000e+00 : f32
    %6 = vector.broadcast %cst_5 : f32 to vector<384x128xf32>
    %7 = arith.maximumf %5, %6 : vector<384x128xf32>
    %8 = vector.extract_strided_slice %7 {offsets = [0, 0], sizes = [384, 8], strides = [1, 1]} : vector<384x128xf32> to vector<384x8xf32>
    %9 = arith.truncf %8 : vector<384x8xf32> to vector<384x8xbf16>
    %c0_6 = arith.constant 0 : index
    %c0_7 = arith.constant 0 : index
    %10 = vector.load %arg4[%c0_6, %c0_7] : memref<384x8xbf16, #tpu.memory_space<vmem>>, vector<384x8xbf16>
    tpu.vector_store %arg4[%c0_6, %c0_7], %9 {strides = array<i32>} : memref<384x8xbf16, #tpu.memory_space<vmem>>, vector<384x8xbf16>,
    return
  }
  func.func @transform_0(%arg0: i32) -> (i32, i32) {
    %c0_i32 = arith.constant 0 : i32
    %c0_i32_0 = arith.constant 0 : i32
    return %arg0, %c0_i32 : i32, i32
  }
  func.func @transform_1(%arg0: i32) -> (i32, i32) {
    %c0_i32 = arith.constant 0 : i32
    %c0_i32_0 = arith.constant 0 : i32
    %c0_i32_1 = arith.constant 0 : i32
    return %c0_i32, %c0_i32_0 : i32, i32
  }
  func.func @transform_2(%arg0: i32) -> (i32, i32) {
    %c0_i32 = arith.constant 0 : i32
    %c0_i32_0 = arith.constant 0 : i32
    %c0_i32_1 = arith.constant 0 : i32
    return %c0_i32, %c0_i32_0 : i32, i32
  }
  func.func @transform_3(%arg0: i32) -> (i32, i32) {
    %c0_i32 = arith.constant 0 : i32
    %c0_i32_0 = arith.constant 0 : i32
    return %arg0, %c0_i32 : i32, i32
  }
}

module attributes {stable_mosaic.version = 11 : i64} {
  func.func @_matmul_bias_relu_kernel(%arg0: i32, %arg1: memref<96x72xbf16, #tpu.memory_space<vmem>>, %arg2: memref<72x128xbf16, #tpu.memory_space<vmem>>, %arg3: memref<1x128xf32, #tpu.memory_space<vmem>>, %arg4: memref<96x16xbf16, #tpu.memory_space<vmem>>) attributes {dimension_semantics = [#tpu.dimension_semantics<parallel>], iteration_bounds = array<i64: 1>, scalar_prefetch = 0 : i64, scratch_operands = 0 : i64, tpu.core_type = #tpu.core_type<tc>, window_params = [{transform_indices = @transform_0, window_bounds = array<i64: 96, 72>}, {pipeline_mode = #tpu.pipeline_mode<synchronous>, transform_indices = @transform_1, window_bounds = array<i64: 72, 128>}, {pipeline_mode = #tpu.pipeline_mode<synchronous>, transform_indices = @transform_2, window_bounds = array<i64: 1, 128>}, {transform_indices = @transform_3, window_bounds = array<i64: 96, 16>}]} {
    %c0 = arith.constant 0 : index
    %c0_0 = arith.constant 0 : index
    %0 = vector.load %arg1[%c0, %c0_0] : memref<96x72xbf16, #tpu.memory_space<vmem>>, vector<96x72xbf16>
    %c0_1 = arith.constant 0 : index
    %c0_2 = arith.constant 0 : index
    %1 = vector.load %arg2[%c0_1, %c0_2] : memref<72x128xbf16, #tpu.memory_space<vmem>>, vector<72x128xbf16>
    %cst = arith.constant dense<0.000000e+00> : vector<96x128xf32>
    %2 = tpu.matmul %0, %1, %cst {dimension_numbers = #tpu.dot_dimension_numbers<[1], [0], [0], [1], [0, 0, 1, 1], [], []>} : vector<96x72xbf16>, vector<72x128xbf16>, vector<96x128xf32> -> vector<96x128xf32>
    %c0_3 = arith.constant 0 : index
    %c0_4 = arith.constant 0 : index
    %3 = vector.load %arg3[%c0_3, %c0_4] : memref<1x128xf32, #tpu.memory_space<vmem>>, vector<1x128xf32>
    %4 = vector.broadcast %3 : vector<1x128xf32> to vector<96x128xf32>
    %5 = arith.addf %2, %4 : vector<96x128xf32>
    %cst_5 = arith.constant 0.000000e+00 : f32
    %6 = vector.broadcast %cst_5 : f32 to vector<96x128xf32>
    %7 = arith.maximumf %5, %6 : vector<96x128xf32>
    %8 = vector.extract_strided_slice %7 {offsets = [0, 0], sizes = [96, 16], strides = [1, 1]} : vector<96x128xf32> to vector<96x16xf32>
    %9 = arith.truncf %8 : vector<96x16xf32> to vector<96x16xbf16>
    %c0_6 = arith.constant 0 : index
    %c0_7 = arith.constant 0 : index
    %10 = vector.load %arg4[%c0_6, %c0_7] : memref<96x16xbf16, #tpu.memory_space<vmem>>, vector<96x16xbf16>
    tpu.vector_store %arg4[%c0_6, %c0_7], %9 {strides = array<i32>} : memref<96x16xbf16, #tpu.memory_space<vmem>>, vector<96x16xbf16>,
    return
  }
  func.func @transform_0(%arg0: i32) -> (i32, i32) {
    %c0_i32 = arith.constant 0 : i32
    %c0_i32_0 = arith.constant 0 : i32
    return %arg0, %c0_i32 : i32, i32
  }
  func.func @transform_1(%arg0: i32) -> (i32, i32) {
    %c0_i32 = arith.constant 0 : i32
    %c0_i32_0 = arith.constant 0 : i32
    %c0_i32_1 = arith.constant 0 : i32
    return %c0_i32, %c0_i32_0 : i32, i32
  }
  func.func @transform_2(%arg0: i32) -> (i32, i32) {
    %c0_i32 = arith.constant 0 : i32
    %c0_i32_0 = arith.constant 0 : i32
    %c0_i32_1 = arith.constant 0 : i32
    return %c0_i32, %c0_i32_0 : i32, i32
  }
  func.func @transform_3(%arg0: i32) -> (i32, i32) {
    %c0_i32 = arith.constant 0 : i32
    %c0_i32_0 = arith.constant 0 : i32
    return %arg0, %c0_i32 : i32, i32
  }
}

module attributes {stable_mosaic.version = 11 : i64} {
  func.func @_feat_style_kernel(%arg0: i32, %arg1: memref<6x16x16xbf16, #tpu.memory_space<vmem>>, %arg2: memref<2xf32, #tpu.memory_space<smem>>, %arg3: memref<1xf32, #tpu.memory_space<smem>>, %arg4: memref<6x16x16xf32, #tpu.memory_space<vmem>>) attributes {dimension_semantics = [#tpu.dimension_semantics<arbitrary>], iteration_bounds = array<i64: 1>, scalar_prefetch = 0 : i64, scratch_operands = 2 : i64, tpu.core_type = #tpu.core_type<tc>, window_params = [{transform_indices = @transform_0, window_bounds = array<i64: 6, 16, 16>}, {transform_indices = @transform_1, window_bounds = array<i64: 2>}]} {
    %c0_i32 = arith.constant 0 : i32
    %0 = arith.cmpi eq, %arg0, %c0_i32 : i32
    %1 = arith.extui %0 : i1 to i32
    %c0_i32_0 = arith.constant 0 : i32
    %2 = arith.cmpi ne, %1, %c0_i32_0 : i32
    scf.if %2 {
      %cst_15 = arith.constant 0.000000e+00 : f32
      %c0_16 = arith.constant 0 : index
      %32 = memref.load %arg3[%c0_16] : memref<1xf32, #tpu.memory_space<smem>>
      memref.store %cst_15, %arg3[%c0_16] : memref<1xf32, #tpu.memory_space<smem>>
      %cst_17 = arith.constant 0.000000e+00 : f32
      %33 = vector.broadcast %cst_17 : f32 to vector<6x16x16xf32>
      %c0_18 = arith.constant 0 : index
      %c0_19 = arith.constant 0 : index
      %c0_20 = arith.constant 0 : index
      %34 = vector.load %arg4[%c0_18, %c0_19, %c0_20] : memref<6x16x16xf32, #tpu.memory_space<vmem>>, vector<6x16x16xf32>
      tpu.vector_store %arg4[%c0_18, %c0_19, %c0_20], %33 {strides = array<i32>} : memref<6x16x16xf32, #tpu.memory_space<vmem>>, vector<6x16x16xf32>,
    } else {
    }
    %c0 = arith.constant 0 : index
    %c0_1 = arith.constant 0 : index
    %c0_2 = arith.constant 0 : index
    %3 = vector.load %arg1[%c0, %c0_1, %c0_2] : memref<6x16x16xbf16, #tpu.memory_space<vmem>>, vector<6x16x16xbf16>
    %4 = arith.extf %3 : vector<6x16x16xbf16> to vector<6x16x16xf32>
    %c0_3 = arith.constant 0 : index
    %5 = memref.load %arg3[%c0_3] : memref<1xf32, #tpu.memory_space<smem>>
    %6 = vector.extract_strided_slice %4 {offsets = [2, 0, 0], sizes = [2, 16, 16], strides = [1, 1, 1]} : vector<6x16x16xf32> to vector<2x16x16xf32>
    %7 = vector.extract_strided_slice %4 {offsets = [4, 0, 0], sizes = [2, 16, 16], strides = [1, 1, 1]} : vector<6x16x16xf32> to vector<2x16x16xf32>
    %8 = arith.subf %6, %7 : vector<2x16x16xf32>
    %9 = math.absf %8 : vector<2x16x16xf32>
    %10 = vector.shape_cast %9 : vector<2x16x16xf32> to vector<1x2x16x16xf32>
    %cst = arith.constant dense<0.000000e+00> : vector<1xf32>
    %11 = vector.multi_reduction <add>, %10, %cst [1, 2, 3] : vector<1x2x16x16xf32> to vector<1xf32>
    %12 = vector.shape_cast %11 : vector<1xf32> to vector<1x1x1x1xf32>
    %13 = vector.extract %12[0, 0, 0, 0] : f32 from vector<1x1x1x1xf32>
    %14 = vector.extract_strided_slice %4 {offsets = [0, 0, 0], sizes = [2, 16, 16], strides = [1, 1, 1]} : vector<6x16x16xf32> to vector<2x16x16xf32>
    %15 = vector.extract_strided_slice %4 {offsets = [4, 0, 0], sizes = [2, 16, 16], strides = [1, 1, 1]} : vector<6x16x16xf32> to vector<2x16x16xf32>
    %16 = arith.subf %14, %15 : vector<2x16x16xf32>
    %17 = math.absf %16 : vector<2x16x16xf32>
    %18 = vector.shape_cast %17 : vector<2x16x16xf32> to vector<1x2x16x16xf32>
    %cst_4 = arith.constant dense<0.000000e+00> : vector<1xf32>
    %19 = vector.multi_reduction <add>, %18, %cst_4 [1, 2, 3] : vector<1x2x16x16xf32> to vector<1xf32>
    %20 = vector.shape_cast %19 : vector<1xf32> to vector<1x1x1x1xf32>
    %21 = vector.extract %20[0, 0, 0, 0] : f32 from vector<1x1x1x1xf32>
    %22 = arith.addf %13, %21 : f32
    %23 = arith.addf %5, %22 : f32
    %c0_5 = arith.constant 0 : index
    %24 = memref.load %arg3[%c0_5] : memref<1xf32, #tpu.memory_space<smem>>
    memref.store %23, %arg3[%c0_5] : memref<1xf32, #tpu.memory_space<smem>>
    %c0_6 = arith.constant 0 : index
    %c0_7 = arith.constant 0 : index
    %c0_8 = arith.constant 0 : index
    %25 = vector.load %arg4[%c0_6, %c0_7, %c0_8] : memref<6x16x16xf32, #tpu.memory_space<vmem>>, vector<6x16x16xf32>
    "tpu.trace_start"() <{level = 10 : i32, message = "bic,bid->bcd"}> : () -> ()
    %cst_9 = arith.constant dense<0.000000e+00> : vector<6x16x16xf32>
    %26 = tpu.matmul %3, %3, %cst_9 {dimension_numbers = #tpu.dot_dimension_numbers<[1], [1], [2], [2], [0, 0, 0, 2, 1, 2], [0], [0]>} : vector<6x16x16xbf16>, vector<6x16x16xbf16>, vector<6x16x16xf32> -> vector<6x16x16xf32>
    "tpu.trace_stop"() : () -> ()
    %27 = arith.addf %25, %26 : vector<6x16x16xf32>
    %c0_10 = arith.constant 0 : index
    %c0_11 = arith.constant 0 : index
    %c0_12 = arith.constant 0 : index
    %28 = vector.load %arg4[%c0_10, %c0_11, %c0_12] : memref<6x16x16xf32, #tpu.memory_space<vmem>>, vector<6x16x16xf32>
    tpu.vector_store %arg4[%c0_10, %c0_11, %c0_12], %27 {strides = array<i32>} : memref<6x16x16xf32, #tpu.memory_space<vmem>>, vector<6x16x16xf32>,
    %c0_i32_13 = arith.constant 0 : i32
    %29 = arith.cmpi eq, %arg0, %c0_i32_13 : i32
    %30 = arith.extui %29 : i1 to i32
    %c0_i32_14 = arith.constant 0 : i32
    %31 = arith.cmpi ne, %30, %c0_i32_14 : i32
    scf.if %31 {
      %c0_15 = arith.constant 0 : index
      %32 = memref.load %arg3[%c0_15] : memref<1xf32, #tpu.memory_space<smem>>
      %cst_16 = arith.constant 0.001953125 : f32
      %33 = arith.mulf %32, %cst_16 : f32
      %c0_17 = arith.constant 0 : index
      %34 = memref.load %arg2[%c0_17] : memref<2xf32, #tpu.memory_space<smem>>
      memref.store %33, %arg2[%c0_17] : memref<2xf32, #tpu.memory_space<smem>>
      %c0_18 = arith.constant 0 : index
      %c0_19 = arith.constant 0 : index
      %c0_20 = arith.constant 0 : index
      %35 = vector.load %arg4[%c0_18, %c0_19, %c0_20] : memref<6x16x16xf32, #tpu.memory_space<vmem>>, vector<6x16x16xf32>
      %cst_21 = arith.constant 3.906250e-03 : f32
      %36 = vector.broadcast %cst_21 : f32 to vector<6x16x16xf32>
      %37 = arith.mulf %35, %36 : vector<6x16x16xf32>
      %38 = vector.extract_strided_slice %37 {offsets = [0, 0, 0], sizes = [2, 16, 16], strides = [1, 1, 1]} : vector<6x16x16xf32> to vector<2x16x16xf32>
      %39 = vector.extract_strided_slice %37 {offsets = [2, 0, 0], sizes = [2, 16, 16], strides = [1, 1, 1]} : vector<6x16x16xf32> to vector<2x16x16xf32>
      %40 = vector.extract_strided_slice %37 {offsets = [4, 0, 0], sizes = [2, 16, 16], strides = [1, 1, 1]} : vector<6x16x16xf32> to vector<2x16x16xf32>
      %41 = arith.subf %39, %40 : vector<2x16x16xf32>
      %42 = math.absf %41 : vector<2x16x16xf32>
      %43 = vector.shape_cast %42 : vector<2x16x16xf32> to vector<1x2x16x16xf32>
      %cst_22 = arith.constant dense<0.000000e+00> : vector<1xf32>
      %44 = vector.multi_reduction <add>, %43, %cst_22 [1, 2, 3] : vector<1x2x16x16xf32> to vector<1xf32>
      %45 = vector.shape_cast %44 : vector<1xf32> to vector<1x1x1x1xf32>
      %46 = vector.extract %45[0, 0, 0, 0] : f32 from vector<1x1x1x1xf32>
      %47 = arith.subf %38, %40 : vector<2x16x16xf32>
      %48 = math.absf %47 : vector<2x16x16xf32>
      %49 = vector.shape_cast %48 : vector<2x16x16xf32> to vector<1x2x16x16xf32>
      %cst_23 = arith.constant dense<0.000000e+00> : vector<1xf32>
      %50 = vector.multi_reduction <add>, %49, %cst_23 [1, 2, 3] : vector<1x2x16x16xf32> to vector<1xf32>
      %51 = vector.shape_cast %50 : vector<1xf32> to vector<1x1x1x1xf32>
      %52 = vector.extract %51[0, 0, 0, 0] : f32 from vector<1x1x1x1xf32>
      %53 = arith.addf %46, %52 : f32
      %cst_24 = arith.constant 0.001953125 : f32
      %54 = arith.mulf %53, %cst_24 : f32
      %c1 = arith.constant 1 : index
      %55 = memref.load %arg2[%c1] : memref<2xf32, #tpu.memory_space<smem>>
      memref.store %54, %arg2[%c1] : memref<2xf32, #tpu.memory_space<smem>>
    } else {
    }
    return
  }
  func.func @transform_0(%arg0: i32) -> (i32, i32, i32) {
    %c0_i32 = arith.constant 0 : i32
    %c0_i32_0 = arith.constant 0 : i32
    %c0_i32_1 = arith.constant 0 : i32
    return %c0_i32, %arg0, %c0_i32_0 : i32, i32, i32
  }
  func.func @transform_1(%arg0: i32) -> i32 {
    %c0_i32 = arith.constant 0 : i32
    %c0_i32_0 = arith.constant 0 : i32
    return %c0_i32 : i32
  }
}

module attributes {stable_mosaic.version = 11 : i64} {
  func.func @_feat_style_kernel(%arg0: i32, %arg1: memref<6x64x8xbf16, #tpu.memory_space<vmem>>, %arg2: memref<2xf32, #tpu.memory_space<smem>>, %arg3: memref<1xf32, #tpu.memory_space<smem>>, %arg4: memref<6x8x8xf32, #tpu.memory_space<vmem>>) attributes {dimension_semantics = [#tpu.dimension_semantics<arbitrary>], iteration_bounds = array<i64: 1>, scalar_prefetch = 0 : i64, scratch_operands = 2 : i64, tpu.core_type = #tpu.core_type<tc>, window_params = [{transform_indices = @transform_0, window_bounds = array<i64: 6, 64, 8>}, {transform_indices = @transform_1, window_bounds = array<i64: 2>}]} {
    %c0_i32 = arith.constant 0 : i32
    %0 = arith.cmpi eq, %arg0, %c0_i32 : i32
    %1 = arith.extui %0 : i1 to i32
    %c0_i32_0 = arith.constant 0 : i32
    %2 = arith.cmpi ne, %1, %c0_i32_0 : i32
    scf.if %2 {
      %cst_15 = arith.constant 0.000000e+00 : f32
      %c0_16 = arith.constant 0 : index
      %32 = memref.load %arg3[%c0_16] : memref<1xf32, #tpu.memory_space<smem>>
      memref.store %cst_15, %arg3[%c0_16] : memref<1xf32, #tpu.memory_space<smem>>
      %cst_17 = arith.constant 0.000000e+00 : f32
      %33 = vector.broadcast %cst_17 : f32 to vector<6x8x8xf32>
      %c0_18 = arith.constant 0 : index
      %c0_19 = arith.constant 0 : index
      %c0_20 = arith.constant 0 : index
      %34 = vector.load %arg4[%c0_18, %c0_19, %c0_20] : memref<6x8x8xf32, #tpu.memory_space<vmem>>, vector<6x8x8xf32>
      tpu.vector_store %arg4[%c0_18, %c0_19, %c0_20], %33 {strides = array<i32>} : memref<6x8x8xf32, #tpu.memory_space<vmem>>, vector<6x8x8xf32>,
    } else {
    }
    %c0 = arith.constant 0 : index
    %c0_1 = arith.constant 0 : index
    %c0_2 = arith.constant 0 : index
    %3 = vector.load %arg1[%c0, %c0_1, %c0_2] : memref<6x64x8xbf16, #tpu.memory_space<vmem>>, vector<6x64x8xbf16>
    %4 = arith.extf %3 : vector<6x64x8xbf16> to vector<6x64x8xf32>
    %c0_3 = arith.constant 0 : index
    %5 = memref.load %arg3[%c0_3] : memref<1xf32, #tpu.memory_space<smem>>
    %6 = vector.extract_strided_slice %4 {offsets = [2, 0, 0], sizes = [2, 64, 8], strides = [1, 1, 1]} : vector<6x64x8xf32> to vector<2x64x8xf32>
    %7 = vector.extract_strided_slice %4 {offsets = [4, 0, 0], sizes = [2, 64, 8], strides = [1, 1, 1]} : vector<6x64x8xf32> to vector<2x64x8xf32>
    %8 = arith.subf %6, %7 : vector<2x64x8xf32>
    %9 = math.absf %8 : vector<2x64x8xf32>
    %10 = vector.shape_cast %9 : vector<2x64x8xf32> to vector<1x2x64x8xf32>
    %cst = arith.constant dense<0.000000e+00> : vector<1xf32>
    %11 = vector.multi_reduction <add>, %10, %cst [1, 2, 3] : vector<1x2x64x8xf32> to vector<1xf32>
    %12 = vector.shape_cast %11 : vector<1xf32> to vector<1x1x1x1xf32>
    %13 = vector.extract %12[0, 0, 0, 0] : f32 from vector<1x1x1x1xf32>
    %14 = vector.extract_strided_slice %4 {offsets = [0, 0, 0], sizes = [2, 64, 8], strides = [1, 1, 1]} : vector<6x64x8xf32> to vector<2x64x8xf32>
    %15 = vector.extract_strided_slice %4 {offsets = [4, 0, 0], sizes = [2, 64, 8], strides = [1, 1, 1]} : vector<6x64x8xf32> to vector<2x64x8xf32>
    %16 = arith.subf %14, %15 : vector<2x64x8xf32>
    %17 = math.absf %16 : vector<2x64x8xf32>
    %18 = vector.shape_cast %17 : vector<2x64x8xf32> to vector<1x2x64x8xf32>
    %cst_4 = arith.constant dense<0.000000e+00> : vector<1xf32>
    %19 = vector.multi_reduction <add>, %18, %cst_4 [1, 2, 3] : vector<1x2x64x8xf32> to vector<1xf32>
    %20 = vector.shape_cast %19 : vector<1xf32> to vector<1x1x1x1xf32>
    %21 = vector.extract %20[0, 0, 0, 0] : f32 from vector<1x1x1x1xf32>
    %22 = arith.addf %13, %21 : f32
    %23 = arith.addf %5, %22 : f32
    %c0_5 = arith.constant 0 : index
    %24 = memref.load %arg3[%c0_5] : memref<1xf32, #tpu.memory_space<smem>>
    memref.store %23, %arg3[%c0_5] : memref<1xf32, #tpu.memory_space<smem>>
    %c0_6 = arith.constant 0 : index
    %c0_7 = arith.constant 0 : index
    %c0_8 = arith.constant 0 : index
    %25 = vector.load %arg4[%c0_6, %c0_7, %c0_8] : memref<6x8x8xf32, #tpu.memory_space<vmem>>, vector<6x8x8xf32>
    "tpu.trace_start"() <{level = 10 : i32, message = "bic,bid->bcd"}> : () -> ()
    %cst_9 = arith.constant dense<0.000000e+00> : vector<6x8x8xf32>
    %26 = tpu.matmul %3, %3, %cst_9 {dimension_numbers = #tpu.dot_dimension_numbers<[1], [1], [2], [2], [0, 0, 0, 2, 1, 2], [0], [0]>} : vector<6x64x8xbf16>, vector<6x64x8xbf16>, vector<6x8x8xf32> -> vector<6x8x8xf32>
    "tpu.trace_stop"() : () -> ()
    %27 = arith.addf %25, %26 : vector<6x8x8xf32>
    %c0_10 = arith.constant 0 : index
    %c0_11 = arith.constant 0 : index
    %c0_12 = arith.constant 0 : index
    %28 = vector.load %arg4[%c0_10, %c0_11, %c0_12] : memref<6x8x8xf32, #tpu.memory_space<vmem>>, vector<6x8x8xf32>
    tpu.vector_store %arg4[%c0_10, %c0_11, %c0_12], %27 {strides = array<i32>} : memref<6x8x8xf32, #tpu.memory_space<vmem>>, vector<6x8x8xf32>,
    %c0_i32_13 = arith.constant 0 : i32
    %29 = arith.cmpi eq, %arg0, %c0_i32_13 : i32
    %30 = arith.extui %29 : i1 to i32
    %c0_i32_14 = arith.constant 0 : i32
    %31 = arith.cmpi ne, %30, %c0_i32_14 : i32
    scf.if %31 {
      %c0_15 = arith.constant 0 : index
      %32 = memref.load %arg3[%c0_15] : memref<1xf32, #tpu.memory_space<smem>>
      %cst_16 = arith.constant 9.765625E-4 : f32
      %33 = arith.mulf %32, %cst_16 : f32
      %c0_17 = arith.constant 0 : index
      %34 = memref.load %arg2[%c0_17] : memref<2xf32, #tpu.memory_space<smem>>
      memref.store %33, %arg2[%c0_17] : memref<2xf32, #tpu.memory_space<smem>>
      %c0_18 = arith.constant 0 : index
      %c0_19 = arith.constant 0 : index
      %c0_20 = arith.constant 0 : index
      %35 = vector.load %arg4[%c0_18, %c0_19, %c0_20] : memref<6x8x8xf32, #tpu.memory_space<vmem>>, vector<6x8x8xf32>
      %cst_21 = arith.constant 0.001953125 : f32
      %36 = vector.broadcast %cst_21 : f32 to vector<6x8x8xf32>
      %37 = arith.mulf %35, %36 : vector<6x8x8xf32>
      %38 = vector.extract_strided_slice %37 {offsets = [0, 0, 0], sizes = [2, 8, 8], strides = [1, 1, 1]} : vector<6x8x8xf32> to vector<2x8x8xf32>
      %39 = vector.extract_strided_slice %37 {offsets = [2, 0, 0], sizes = [2, 8, 8], strides = [1, 1, 1]} : vector<6x8x8xf32> to vector<2x8x8xf32>
      %40 = vector.extract_strided_slice %37 {offsets = [4, 0, 0], sizes = [2, 8, 8], strides = [1, 1, 1]} : vector<6x8x8xf32> to vector<2x8x8xf32>
      %41 = arith.subf %39, %40 : vector<2x8x8xf32>
      %42 = math.absf %41 : vector<2x8x8xf32>
      %43 = vector.shape_cast %42 : vector<2x8x8xf32> to vector<1x2x8x8xf32>
      %cst_22 = arith.constant dense<0.000000e+00> : vector<1xf32>
      %44 = vector.multi_reduction <add>, %43, %cst_22 [1, 2, 3] : vector<1x2x8x8xf32> to vector<1xf32>
      %45 = vector.shape_cast %44 : vector<1xf32> to vector<1x1x1x1xf32>
      %46 = vector.extract %45[0, 0, 0, 0] : f32 from vector<1x1x1x1xf32>
      %47 = arith.subf %38, %40 : vector<2x8x8xf32>
      %48 = math.absf %47 : vector<2x8x8xf32>
      %49 = vector.shape_cast %48 : vector<2x8x8xf32> to vector<1x2x8x8xf32>
      %cst_23 = arith.constant dense<0.000000e+00> : vector<1xf32>
      %50 = vector.multi_reduction <add>, %49, %cst_23 [1, 2, 3] : vector<1x2x8x8xf32> to vector<1xf32>
      %51 = vector.shape_cast %50 : vector<1xf32> to vector<1x1x1x1xf32>
      %52 = vector.extract %51[0, 0, 0, 0] : f32 from vector<1x1x1x1xf32>
      %53 = arith.addf %46, %52 : f32
      %cst_24 = arith.constant 7.812500e-03 : f32
      %54 = arith.mulf %53, %cst_24 : f32
      %c1 = arith.constant 1 : index
      %55 = memref.load %arg2[%c1] : memref<2xf32, #tpu.memory_space<smem>>
      memref.store %54, %arg2[%c1] : memref<2xf32, #tpu.memory_space<smem>>
    } else {
    }
    return
  }
  func.func @transform_0(%arg0: i32) -> (i32, i32, i32) {
    %c0_i32 = arith.constant 0 : i32
    %c0_i32_0 = arith.constant 0 : i32
    %c0_i32_1 = arith.constant 0 : i32
    return %c0_i32, %arg0, %c0_i32_0 : i32, i32, i32
  }
  func.func @transform_1(%arg0: i32) -> i32 {
    %c0_i32 = arith.constant 0 : i32
    %c0_i32_0 = arith.constant 0 : i32
    return %c0_i32 : i32
  }
}

module attributes {stable_mosaic.version = 11 : i64} {
  func.func @_matmul_bias_relu_kernel(%arg0: i32, %arg1: memref<24x144xbf16, #tpu.memory_space<vmem>>, %arg2: memref<144x128xbf16, #tpu.memory_space<vmem>>, %arg3: memref<1x128xf32, #tpu.memory_space<vmem>>, %arg4: memref<24x32xbf16, #tpu.memory_space<vmem>>) attributes {dimension_semantics = [#tpu.dimension_semantics<parallel>], iteration_bounds = array<i64: 1>, scalar_prefetch = 0 : i64, scratch_operands = 0 : i64, tpu.core_type = #tpu.core_type<tc>, window_params = [{transform_indices = @transform_0, window_bounds = array<i64: 24, 144>}, {pipeline_mode = #tpu.pipeline_mode<synchronous>, transform_indices = @transform_1, window_bounds = array<i64: 144, 128>}, {pipeline_mode = #tpu.pipeline_mode<synchronous>, transform_indices = @transform_2, window_bounds = array<i64: 1, 128>}, {transform_indices = @transform_3, window_bounds = array<i64: 24, 32>}]} {
    %c0 = arith.constant 0 : index
    %c0_0 = arith.constant 0 : index
    %0 = vector.load %arg1[%c0, %c0_0] : memref<24x144xbf16, #tpu.memory_space<vmem>>, vector<24x144xbf16>
    %c0_1 = arith.constant 0 : index
    %c0_2 = arith.constant 0 : index
    %1 = vector.load %arg2[%c0_1, %c0_2] : memref<144x128xbf16, #tpu.memory_space<vmem>>, vector<144x128xbf16>
    %cst = arith.constant dense<0.000000e+00> : vector<24x128xf32>
    %2 = tpu.matmul %0, %1, %cst {dimension_numbers = #tpu.dot_dimension_numbers<[1], [0], [0], [1], [0, 0, 1, 1], [], []>} : vector<24x144xbf16>, vector<144x128xbf16>, vector<24x128xf32> -> vector<24x128xf32>
    %c0_3 = arith.constant 0 : index
    %c0_4 = arith.constant 0 : index
    %3 = vector.load %arg3[%c0_3, %c0_4] : memref<1x128xf32, #tpu.memory_space<vmem>>, vector<1x128xf32>
    %4 = vector.broadcast %3 : vector<1x128xf32> to vector<24x128xf32>
    %5 = arith.addf %2, %4 : vector<24x128xf32>
    %cst_5 = arith.constant 0.000000e+00 : f32
    %6 = vector.broadcast %cst_5 : f32 to vector<24x128xf32>
    %7 = arith.maximumf %5, %6 : vector<24x128xf32>
    %8 = vector.extract_strided_slice %7 {offsets = [0, 0], sizes = [24, 32], strides = [1, 1]} : vector<24x128xf32> to vector<24x32xf32>
    %9 = arith.truncf %8 : vector<24x32xf32> to vector<24x32xbf16>
    %c0_6 = arith.constant 0 : index
    %c0_7 = arith.constant 0 : index
    %10 = vector.load %arg4[%c0_6, %c0_7] : memref<24x32xbf16, #tpu.memory_space<vmem>>, vector<24x32xbf16>
    tpu.vector_store %arg4[%c0_6, %c0_7], %9 {strides = array<i32>} : memref<24x32xbf16, #tpu.memory_space<vmem>>, vector<24x32xbf16>,
    return
  }
  func.func @transform_0(%arg0: i32) -> (i32, i32) {
    %c0_i32 = arith.constant 0 : i32
    %c0_i32_0 = arith.constant 0 : i32
    return %arg0, %c0_i32 : i32, i32
  }
  func.func @transform_1(%arg0: i32) -> (i32, i32) {
    %c0_i32 = arith.constant 0 : i32
    %c0_i32_0 = arith.constant 0 : i32
    %c0_i32_1 = arith.constant 0 : i32
    return %c0_i32, %c0_i32_0 : i32, i32
  }
  func.func @transform_2(%arg0: i32) -> (i32, i32) {
    %c0_i32 = arith.constant 0 : i32
    %c0_i32_0 = arith.constant 0 : i32
    %c0_i32_1 = arith.constant 0 : i32
    return %c0_i32, %c0_i32_0 : i32, i32
  }
  func.func @transform_3(%arg0: i32) -> (i32, i32) {
    %c0_i32 = arith.constant 0 : i32
    %c0_i32_0 = arith.constant 0 : i32
    return %arg0, %c0_i32 : i32, i32
  }
}

module attributes {stable_mosaic.version = 11 : i64} {
  func.func @_feat_style_kernel(%arg0: i32, %arg1: memref<6x4x32xbf16, #tpu.memory_space<vmem>>, %arg2: memref<2xf32, #tpu.memory_space<smem>>, %arg3: memref<1xf32, #tpu.memory_space<smem>>, %arg4: memref<6x32x32xf32, #tpu.memory_space<vmem>>) attributes {dimension_semantics = [#tpu.dimension_semantics<arbitrary>], iteration_bounds = array<i64: 1>, scalar_prefetch = 0 : i64, scratch_operands = 2 : i64, tpu.core_type = #tpu.core_type<tc>, window_params = [{transform_indices = @transform_0, window_bounds = array<i64: 6, 4, 32>}, {transform_indices = @transform_1, window_bounds = array<i64: 2>}]} {
    %c0_i32 = arith.constant 0 : i32
    %0 = arith.cmpi eq, %arg0, %c0_i32 : i32
    %1 = arith.extui %0 : i1 to i32
    %c0_i32_0 = arith.constant 0 : i32
    %2 = arith.cmpi ne, %1, %c0_i32_0 : i32
    scf.if %2 {
      %cst_15 = arith.constant 0.000000e+00 : f32
      %c0_16 = arith.constant 0 : index
      %32 = memref.load %arg3[%c0_16] : memref<1xf32, #tpu.memory_space<smem>>
      memref.store %cst_15, %arg3[%c0_16] : memref<1xf32, #tpu.memory_space<smem>>
      %cst_17 = arith.constant 0.000000e+00 : f32
      %33 = vector.broadcast %cst_17 : f32 to vector<6x32x32xf32>
      %c0_18 = arith.constant 0 : index
      %c0_19 = arith.constant 0 : index
      %c0_20 = arith.constant 0 : index
      %34 = vector.load %arg4[%c0_18, %c0_19, %c0_20] : memref<6x32x32xf32, #tpu.memory_space<vmem>>, vector<6x32x32xf32>
      tpu.vector_store %arg4[%c0_18, %c0_19, %c0_20], %33 {strides = array<i32>} : memref<6x32x32xf32, #tpu.memory_space<vmem>>, vector<6x32x32xf32>,
    } else {
    }
    %c0 = arith.constant 0 : index
    %c0_1 = arith.constant 0 : index
    %c0_2 = arith.constant 0 : index
    %3 = vector.load %arg1[%c0, %c0_1, %c0_2] : memref<6x4x32xbf16, #tpu.memory_space<vmem>>, vector<6x4x32xbf16>
    %4 = arith.extf %3 : vector<6x4x32xbf16> to vector<6x4x32xf32>
    %c0_3 = arith.constant 0 : index
    %5 = memref.load %arg3[%c0_3] : memref<1xf32, #tpu.memory_space<smem>>
    %6 = vector.extract_strided_slice %4 {offsets = [2, 0, 0], sizes = [2, 4, 32], strides = [1, 1, 1]} : vector<6x4x32xf32> to vector<2x4x32xf32>
    %7 = vector.extract_strided_slice %4 {offsets = [4, 0, 0], sizes = [2, 4, 32], strides = [1, 1, 1]} : vector<6x4x32xf32> to vector<2x4x32xf32>
    %8 = arith.subf %6, %7 : vector<2x4x32xf32>
    %9 = math.absf %8 : vector<2x4x32xf32>
    %10 = vector.shape_cast %9 : vector<2x4x32xf32> to vector<1x2x4x32xf32>
    %cst = arith.constant dense<0.000000e+00> : vector<1xf32>
    %11 = vector.multi_reduction <add>, %10, %cst [1, 2, 3] : vector<1x2x4x32xf32> to vector<1xf32>
    %12 = vector.shape_cast %11 : vector<1xf32> to vector<1x1x1x1xf32>
    %13 = vector.extract %12[0, 0, 0, 0] : f32 from vector<1x1x1x1xf32>
    %14 = vector.extract_strided_slice %4 {offsets = [0, 0, 0], sizes = [2, 4, 32], strides = [1, 1, 1]} : vector<6x4x32xf32> to vector<2x4x32xf32>
    %15 = vector.extract_strided_slice %4 {offsets = [4, 0, 0], sizes = [2, 4, 32], strides = [1, 1, 1]} : vector<6x4x32xf32> to vector<2x4x32xf32>
    %16 = arith.subf %14, %15 : vector<2x4x32xf32>
    %17 = math.absf %16 : vector<2x4x32xf32>
    %18 = vector.shape_cast %17 : vector<2x4x32xf32> to vector<1x2x4x32xf32>
    %cst_4 = arith.constant dense<0.000000e+00> : vector<1xf32>
    %19 = vector.multi_reduction <add>, %18, %cst_4 [1, 2, 3] : vector<1x2x4x32xf32> to vector<1xf32>
    %20 = vector.shape_cast %19 : vector<1xf32> to vector<1x1x1x1xf32>
    %21 = vector.extract %20[0, 0, 0, 0] : f32 from vector<1x1x1x1xf32>
    %22 = arith.addf %13, %21 : f32
    %23 = arith.addf %5, %22 : f32
    %c0_5 = arith.constant 0 : index
    %24 = memref.load %arg3[%c0_5] : memref<1xf32, #tpu.memory_space<smem>>
    memref.store %23, %arg3[%c0_5] : memref<1xf32, #tpu.memory_space<smem>>
    %c0_6 = arith.constant 0 : index
    %c0_7 = arith.constant 0 : index
    %c0_8 = arith.constant 0 : index
    %25 = vector.load %arg4[%c0_6, %c0_7, %c0_8] : memref<6x32x32xf32, #tpu.memory_space<vmem>>, vector<6x32x32xf32>
    "tpu.trace_start"() <{level = 10 : i32, message = "bic,bid->bcd"}> : () -> ()
    %cst_9 = arith.constant dense<0.000000e+00> : vector<6x32x32xf32>
    %26 = tpu.matmul %3, %3, %cst_9 {dimension_numbers = #tpu.dot_dimension_numbers<[1], [1], [2], [2], [0, 0, 0, 2, 1, 2], [0], [0]>} : vector<6x4x32xbf16>, vector<6x4x32xbf16>, vector<6x32x32xf32> -> vector<6x32x32xf32>
    "tpu.trace_stop"() : () -> ()
    %27 = arith.addf %25, %26 : vector<6x32x32xf32>
    %c0_10 = arith.constant 0 : index
    %c0_11 = arith.constant 0 : index
    %c0_12 = arith.constant 0 : index
    %28 = vector.load %arg4[%c0_10, %c0_11, %c0_12] : memref<6x32x32xf32, #tpu.memory_space<vmem>>, vector<6x32x32xf32>
    tpu.vector_store %arg4[%c0_10, %c0_11, %c0_12], %27 {strides = array<i32>} : memref<6x32x32xf32, #tpu.memory_space<vmem>>, vector<6x32x32xf32>,
    %c0_i32_13 = arith.constant 0 : i32
    %29 = arith.cmpi eq, %arg0, %c0_i32_13 : i32
    %30 = arith.extui %29 : i1 to i32
    %c0_i32_14 = arith.constant 0 : i32
    %31 = arith.cmpi ne, %30, %c0_i32_14 : i32
    scf.if %31 {
      %c0_15 = arith.constant 0 : index
      %32 = memref.load %arg3[%c0_15] : memref<1xf32, #tpu.memory_space<smem>>
      %cst_16 = arith.constant 3.906250e-03 : f32
      %33 = arith.mulf %32, %cst_16 : f32
      %c0_17 = arith.constant 0 : index
      %34 = memref.load %arg2[%c0_17] : memref<2xf32, #tpu.memory_space<smem>>
      memref.store %33, %arg2[%c0_17] : memref<2xf32, #tpu.memory_space<smem>>
      %c0_18 = arith.constant 0 : index
      %c0_19 = arith.constant 0 : index
      %c0_20 = arith.constant 0 : index
      %35 = vector.load %arg4[%c0_18, %c0_19, %c0_20] : memref<6x32x32xf32, #tpu.memory_space<vmem>>, vector<6x32x32xf32>
      %cst_21 = arith.constant 7.812500e-03 : f32
      %36 = vector.broadcast %cst_21 : f32 to vector<6x32x32xf32>
      %37 = arith.mulf %35, %36 : vector<6x32x32xf32>
      %38 = vector.extract_strided_slice %37 {offsets = [0, 0, 0], sizes = [2, 32, 32], strides = [1, 1, 1]} : vector<6x32x32xf32> to vector<2x32x32xf32>
      %39 = vector.extract_strided_slice %37 {offsets = [2, 0, 0], sizes = [2, 32, 32], strides = [1, 1, 1]} : vector<6x32x32xf32> to vector<2x32x32xf32>
      %40 = vector.extract_strided_slice %37 {offsets = [4, 0, 0], sizes = [2, 32, 32], strides = [1, 1, 1]} : vector<6x32x32xf32> to vector<2x32x32xf32>
      %41 = arith.subf %39, %40 : vector<2x32x32xf32>
      %42 = math.absf %41 : vector<2x32x32xf32>
      %43 = vector.shape_cast %42 : vector<2x32x32xf32> to vector<1x2x32x32xf32>
      %cst_22 = arith.constant dense<0.000000e+00> : vector<1xf32>
      %44 = vector.multi_reduction <add>, %43, %cst_22 [1, 2, 3] : vector<1x2x32x32xf32> to vector<1xf32>
      %45 = vector.shape_cast %44 : vector<1xf32> to vector<1x1x1x1xf32>
      %46 = vector.extract %45[0, 0, 0, 0] : f32 from vector<1x1x1x1xf32>
      %47 = arith.subf %38, %40 : vector<2x32x32xf32>
      %48 = math.absf %47 : vector<2x32x32xf32>
      %49 = vector.shape_cast %48 : vector<2x32x32xf32> to vector<1x2x32x32xf32>
      %cst_23 = arith.constant dense<0.000000e+00> : vector<1xf32>
      %50 = vector.multi_reduction <add>, %49, %cst_23 [1, 2, 3] : vector<1x2x32x32xf32> to vector<1xf32>
      %51 = vector.shape_cast %50 : vector<1xf32> to vector<1x1x1x1xf32>
      %52 = vector.extract %51[0, 0, 0, 0] : f32 from vector<1x1x1x1xf32>
      %53 = arith.addf %46, %52 : f32
      %cst_24 = arith.constant 4.8828125E-4 : f32
      %54 = arith.mulf %53, %cst_24 : f32
      %c1 = arith.constant 1 : index
      %55 = memref.load %arg2[%c1] : memref<2xf32, #tpu.memory_space<smem>>
      memref.store %54, %arg2[%c1] : memref<2xf32, #tpu.memory_space<smem>>
    } else {
    }
    return
  }
  func.func @transform_0(%arg0: i32) -> (i32, i32, i32) {
    %c0_i32 = arith.constant 0 : i32
    %c0_i32_0 = arith.constant 0 : i32
    %c0_i32_1 = arith.constant 0 : i32
    return %c0_i32, %arg0, %c0_i32_0 : i32, i32, i32
  }
  func.func @transform_1(%arg0: i32) -> i32 {
    %c0_i32 = arith.constant 0 : i32
    %c0_i32_0 = arith.constant 0 : i32
    return %c0_i32 : i32
  }
}

</mosaic_0001>

<bundles_post_ra>
// kernel: inpainting_loss.7
= control target key start
LH: loop header
LB: loop body
LE: loop exit
PB: predicated region body
PF: predicated region fallthrough
CT: control target
= control target key end

     0   :  { %s311_s0 = inlined_call_operand.vmem [shape: f32[6,256], index: 0, kind: input, shape index: {}]   ;;  %s312_s1 = inlined_call_operand.vmem [shape: f32[6,256], index: 1, kind: input, shape index: {}]   ;;  %s313_s2 = inlined_call_operand.vmem [shape: f32[6,256], index: 2, kind: input, shape index: {}]   ;;  %s314_s3 = inlined_call_operand.vmem [shape: f32[6,256], index: 3, kind: input, shape index: {}]   ;;  %s315_s4 = inlined_call_operand.vmem [shape: f32[1,255], index: 4, kind: input, shape index: {}]   ;;  %s316_s5 = inlined_call_operand.vmem [shape: f32[6,256], index: 5, kind: output, shape index: {0}]   ;;  %s317_s6 = inlined_call_operand.vmem [shape: f32[4], index: 6, kind: output, shape index: {1}]  }
   0x1   :  { %v35_v0 = vld [vmem:[%s311_s0] sm:$0x3f]  ;;  %v36_v5 = vld [vmem:[%s311_s0 + $0x8] sm:$0x3f] }
   0x2   :  { %v37_v1 = vld [vmem:[%s313_s2] sm:$0x3f]  ;;  %v43_v4 = vsub.f32 1.0, %v35_v0  ;;  %v38_v6 = vld [vmem:[%s313_s2 + $0x8] sm:$0x3f]  ;;  %v44_v8 = vsub.f32 1.0, %v36_v5 }
   0x3   :  { %v39_v2 = vld [vmem:[%s312_s1] sm:$0x3f]  ;;  %v40_v7 = vld [vmem:[%s312_s1 + $0x8] sm:$0x3f] }
   0x4   :  { %v41_v3 = vmul.f32 %v39_v2, %v35_v0  ;;  %v45_v9 = vmul.f32 %v43_v4, %v37_v1  ;;  %v42_v10 = vmul.f32 %v40_v7, %v36_v5  ;;  %v46_v11 = vmul.f32 %v44_v8, %v38_v6 }
   0x5   :  { %12 = vsyncpa [#allocation4], 0  ;;  %s231_s9 = smov 127   ;;  %s232_s0 = smov 112   ;;  %v51_v14 = vld [vmem:[%s314_s3] sm:$0x3f]  ;;  %v121_v28 = vlaneseq }
   0x6   :  { %v47_v12 = vadd.f32 %v45_v9, %v41_v3  ;;  %v48_v13 = vadd.f32 %v46_v11, %v42_v10  ;;  %v52_v15 = vld [vmem:[%s314_s3 + $0x8] sm:$0x3f]  ;;  %v53_v16 = vsub.f32 %v37_v1, %v51_v14  ;;  %vm86_vm0 = vcmask 1045504   ;;  %v119_v33 = vld [vmem:[%s315_s4] sm:$0x3]  ;;  %s189_s20 = sshll.u32 %s317_s6, 4  ;;  %s190_s20 = int_to_ptr.vmem [resolvable:$true] %s189_s20 }
   0x7   :  { %v54_v17 = vsub.f32 %v38_v6, %v52_v15  ;;  %v122_v29 = vshrl.u32 %v121_v28, 7  ;;  %vm65_vm1 = vcmask 1039360   ;;  %vm77_vm2 = vcmask 916480   ;;  %s217_s22 = scalar_lea.vmem %s190_s20, 16  ;;  %p222_p1 = scmp.lt.s32.totalorder %s190_s20, %s190_s20 }
   0x8   :  { %61 = vrot.lane.b32.xlu0 %v47_v12, %s231_s9  ;;  %49 = vst [vmem:[%s316_s5] sm:$0x3f] %v47_v12  ;;  %73 = vrot.lane.b32.xlu1 %v47_v12, %s232_s0  ;;  %50 = vst [vmem:[%s316_s5 + $0x8] sm:$0x3f] %v48_v13  ;;  %v55_v18 = vand.u32 2147483647, %v53_v16  ;;  %vm134_vm3 = vcmask 1037312   ;;  %p218_p0 = scmp.ne.s32.totalorder %s190_s20, %s217_s22  ;;  %p223_p2 = scmp.lt.s32.totalorder %s217_s22, %s217_s22 }
   0x9   :  { %v56_v19 = vand.u32 2147483647, %v54_v17  ;;  %v127_v32 = vsub.s32 1, %v122_v29  ;;  %v123_v34 = vsub.s32 0, %v122_v29  ;;  %vm151_vm4 = vcmask 914432  }
   0xa   :  { %v87_v20 = vsel %vm86_vm0, %v55_v18, 0.0  ;;  %v57_v22 = vmul.f32 %v55_v18, %v35_v0  ;;  %p224_p3 = por %p223_p2, %p222_p1 }
   0xb   :  { %v88_v21 = vsel %vm86_vm0, %v56_v19, 0.0  ;;  %v58_v23 = vmul.f32 %v56_v19, %v36_v5  ;;  %v128_v37 = vrot.slane %v119_v33, %v127_v32  ;;  %v124_v44 = vrot.slane %v119_v33, %v123_v34 }
   0xc   :  { %63 = vrot.lane.b32.xlu0 %v48_v13, %s231_s9  ;;  %75 = vrot.lane.b32.xlu1 %v48_v13, %s232_s0  ;;  %v89_v24 = vadd.f32 %v88_v21, %v87_v20  ;;  %v103_v25 = vsel %vm86_vm0, %v57_v22, 0.0  ;;  %p225_p4 = pnand %p224_p3, %p218_p0 }
   0xd   :  { %v104_v26 = vsel %vm86_vm0, %v58_v23, 0.0 }
   0xe   :  { %v105_v27 = vadd.f32 %v104_v26, %v103_v25 }
  0x2b   :  { %90 = vadd.xlane.f32.xlu0 %v89_v24 }
  0x30   :  { %106 = vadd.xlane.f32.xlu1 %v105_v27 }
  0x7a   :  { %v62_v30 = vpop.permute.xlu0 %61  ;;  %v74_v31 = vpop.permute.xlu1 %73 }
  0x7e   :  { %v64_v35 = vpop.permute.xlu0 %63  ;;  %v76_v36 = vpop.permute.xlu1 %75 }
  0x7f   :  { %v66_v38 = vsel %vm65_vm1, %v62_v30, %v64_v35  ;;  %v70_v39 = vsub.f32 %v48_v13, %v64_v35  ;;  %v78_v40 = vsel %vm77_vm2, %v74_v31, %v76_v36  ;;  %v82_v43 = vsub.f32 %v48_v13, %v76_v36 }
  0x80   :  { %v69_v41 = vsub.f32 %v47_v12, %v66_v38  ;;  %v81_v42 = vsub.f32 %v47_v12, %v78_v40 }
  0x81   :  { %v72_v45 = vand.u32 2147483647, %v70_v39  ;;  %v84_v49 = vand.u32 2147483647, %v82_v43 }
  0x82   :  { %v71_v46 = vand.u32 2147483647, %v69_v41  ;;  %v83_v48 = vand.u32 2147483647, %v81_v42 }
  0x83   :  { %v132_v47 = vmul.f32 %v128_v37, %v72_v45  ;;  %v152_v55 = vsel %vm151_vm4, %v84_v49, 0.0 }
  0x84   :  { %v131_v50 = vmul.f32 %v124_v44, %v71_v46  ;;  %v150_v54 = vsel %vm86_vm0, %v83_v48, 0.0 }
  0x85   :  { %v135_v51 = vsel %vm134_vm3, %v132_v47, 0.0  ;;  %v153_v56 = vadd.f32 %v152_v55, %v150_v54 }
  0x86   :  { %v133_v52 = vsel %vm86_vm0, %v131_v50, 0.0 }
  0x87   :  { %v136_v53 = vadd.f32 %v135_v51, %v133_v52 }
  0x89   :  { %137 = vadd.xlane.f32.xlu0 %v136_v53 }
  0x8d   :  { %154 = vadd.xlane.f32.xlu0 %v153_v56 }
  0xb8   :  { %v91_v57 = vpop.xlane.xlu0 %90 }
  0xb9   :  { %v92_v58 = vrot.slane %v91_v57, 4 }
  0xbb   :  { %v93_v59 = vadd.f32 %v92_v58, %v91_v57 }
  0xbd   :  { %v94_v60 = vrot.slane %v93_v59, 2  ;;  %v107_v61 = vpop.xlane.xlu1 %106 }
  0xbe   :  { %v108_v62 = vrot.slane %v107_v61, 4 }
  0xbf   :  { %v95_v63 = vadd.f32 %v94_v60, %v93_v59 }
  0xc0   :  { %v109_v0 = vadd.f32 %v108_v62, %v107_v61 }
  0xc1   :  { %v96_v1 = vrot.slane %v95_v63, 1 }
  0xc2   :  { %v110_v2 = vrot.slane %v109_v0, 2 }
  0xc3   :  { %v97_v3 = vadd.f32 %v96_v1, %v95_v63 }
  0xc4   :  { %v111_v4 = vadd.f32 %v110_v2, %v109_v0 }
  0xc5   :  { %206 = vpush %v97_v3 }
  0xc6   :  { %v112_v5 = vrot.slane %v111_v4, 1 }
  0xc8   :  { %v113_v6 = vadd.f32 %v112_v5, %v111_v4 }
  0xca   :  { %208 = vpush %v113_v6 }
  0xf6   :  { %s207_s4 = spop %206 }
  0xf7   :  { %171 = sst [smem:[#allocation3]] %s207_s4 }
  0xfb   :  { %s209_s16 = spop %208 }
  0xfc   :  { %174 = sst [smem:[#allocation3 + $0x1]] %s209_s16 }
 0x116   :  { %v138_v7 = vpop.xlane.xlu0 %137 }
 0x117   :  { %v139_v8 = vrot.slane %v138_v7, 4 }
 0x119   :  { %v140_v9 = vadd.f32 %v139_v8, %v138_v7 }
 0x11a   :  { %v155_v10 = vpop.xlane.xlu0 %154 }
 0x11b   :  { %v141_v11 = vrot.slane %v140_v9, 2  ;;  %v156_v12 = vrot.slane %v155_v10, 4 }
 0x11d   :  { %v157_v13 = vadd.f32 %v156_v12, %v155_v10  ;;  %v142_v14 = vadd.f32 %v141_v11, %v140_v9 }
 0x11f   :  { %v158_v15 = vrot.slane %v157_v13, 2  ;;  %v143_v16 = vrot.slane %v142_v14, 1 }
 0x121   :  { %v159_v17 = vadd.f32 %v158_v15, %v157_v13  ;;  %v144_v18 = vadd.f32 %v143_v16, %v142_v14 }
 0x123   :  { %210 = vpush %v144_v18  ;;  %v160_v19 = vrot.slane %v159_v17, 1 }
 0x125   :  { %v161_v20 = vadd.f32 %v160_v19, %v159_v17 }
 0x127   :  { %212 = vpush %v161_v20 }
 0x154   :  { %s211_s17 = spop %210 }
 0x155   :  { %177 = sst [smem:[#allocation3 + $0x2]] %s211_s17 }
 0x158   :  { %s213_s21 = spop %212 }
 0x159   :  { %180 = sst [smem:[#allocation3 + $0x3]] %s213_s21 }
 0x15a   :  { %228 = shalt.err (!%p225_p4)
}
 0x15b   :  { %s233_s23 = smov [#allocation3]  }
 0x15c   :  { %192 = dma.smem_to_vmem %s233_s23, 16, %s190_s20, [#allocation4]  }
 0x15d   :  { %229 = dma.done.wait [#allocation4], 16  }
 0x15e   :  { %230 = vsyncadd [#allocation4], 4294967280 }
 0x15f   :  { %198 = sfence }
 0x160   :  { %199 = vsyncpa [#allocation4], 1 }

// kernel: inpainting_loss.8
= control target key start
LH: loop header
LB: loop body
LE: loop exit
PB: predicated region body
PF: predicated region fallthrough
CT: control target
= control target key end

     0   :  { %vm206_vm0 = vcmask 261120   ;;  %vm744_vm1 = vcmask 60416   ;;  %s1419_s1 = inlined_call_operand.vmem [shape: bf16[32,128], index: 1, kind: input, shape index: {}]   ;;  %s1420_s0 = inlined_call_operand.vmem [shape: bf16[384,32], index: 0, kind: input, shape index: {}]   ;;  %s1421_s2 = inlined_call_operand.vmem [shape: f32[1,128], index: 2, kind: input, shape index: {}]   ;;  %s1422_s3 = inlined_call_operand.vmem [shape: bf16[384,8], index: 3, kind: output, shape index: {}]  }
   0x1   :  { %v1026_v0 = vld [vmem:[%s1419_s1] sm:$0xff]   ;;  %v1027_v1 = vld [vmem:[%s1419_s1 + $0x8] sm:$0xff]   ;;  %v1032_v6 = vld [vmem:[%s1420_s0 + $0x10] sm:$0xff]  }
   0x2   :  { %970 = vmatprep.subr.bf16.mxu0 %v1026_v0  ;;  %1022 = vmatprep.subr.bf16.mxu1 %v1026_v0  ;;  %v1028_v2 = vld [vmem:[%s1420_s0] sm:$0xff]   ;;  %v1030_v4 = vld [vmem:[%s1420_s0 + $0x8] sm:$0xff]   ;;  %v1033_v7 = vld [vmem:[%s1420_s0 + $0x70] sm:$0xff]  }
   0x3   :  { %971 = vmatpush3.bf16.msra.mxu0 %v1026_v0  ;;  %1024 = vmatpush3.bf16.msra.mxu1 %v1026_v0  ;;  %v1029_v3 = vld [vmem:[%s1420_s0 + $0x60] sm:$0xff]   ;;  %v1031_v5 = vld [vmem:[%s1420_s0 + $0x68] sm:$0xff]   ;;  %v1034_v8 = vld [vmem:[%s1420_s0 + $0x18] sm:$0xff]  }
   0x4   :  { %972 = vmatprep.subr.bf16.mxu0 %v1027_v1  ;;  %1023 = vmatprep.subr.bf16.mxu1 %v1027_v1  ;;  %v1035_v9 = vld [vmem:[%s1420_s0 + $0x78] sm:$0xff]   ;;  %v1036_v10 = vld [vmem:[%s1420_s0 + $0x20] sm:$0xff]   ;;  %v1038_v12 = vld [vmem:[%s1420_s0 + $0x28] sm:$0xff]  }
   0x5   :  { %974 = vmatprep.mubr.msk.bf16.mxu0 %vm206_vm0, %v1028_v2  ;;  %998 = vmatprep.mubr.msk.bf16.mxu1 %vm206_vm0, %v1029_v3  ;;  %v1037_v11 = vld [vmem:[%s1420_s0 + $0x80] sm:$0xff]   ;;  %v1039_v13 = vld [vmem:[%s1420_s0 + $0x88] sm:$0xff]   ;;  %v1040_v14 = vld [vmem:[%s1420_s0 + $0x30] sm:$0xff]  }
   0x6   :  { %v1041_v15 = vld [vmem:[%s1420_s0 + $0x90] sm:$0xff]   ;;  %v1042_v16 = vld [vmem:[%s1420_s0 + $0x38] sm:$0xff]   ;;  %v1044_v18 = vld [vmem:[%s1420_s0 + $0x40] sm:$0xff]  }
   0x7   :  { %973 = vmatpush3.bf16.msra.mxu0 %v1027_v1  ;;  %1025 = vmatpush3.bf16.msra.mxu1 %v1027_v1  ;;  %v1043_v17 = vld [vmem:[%s1420_s0 + $0x98] sm:$0xff]   ;;  %v1045_v19 = vld [vmem:[%s1420_s0 + $0xa0] sm:$0xff]   ;;  %v1046_v20 = vld [vmem:[%s1420_s0 + $0x48] sm:$0xff]  }
   0x8   :  { %v1047_v21 = vld [vmem:[%s1420_s0 + $0xa8] sm:$0xff]   ;;  %v1048_v22 = vld [vmem:[%s1420_s0 + $0x50] sm:$0xff]   ;;  %v1050_v24 = vld [vmem:[%s1420_s0 + $0x58] sm:$0xff]  }
   0x9   :  { %v1049_v23 = vld [vmem:[%s1420_s0 + $0xb0] sm:$0xff]   ;;  %v1051_v25 = vld [vmem:[%s1420_s0 + $0xb8] sm:$0xff]   ;;  %v1177_v26 = vld [vmem:[%s1421_s2] ss:$0 sm:$0xff] }
   0xa   :  { %975 = vmatmul.mubr.msk.bf16.vlgmr.msra.gmra.mrb[0].mxu0 %vm206_vm0, %v1030_v4  ;;  %999 = vmatmul.mubr.msk.bf16.vlgmr.msra.gmra.mrb[0].mxu1 %vm206_vm0, %v1031_v5 }
   0xb   :  { %978 = vmatprep.mubr.msk.bf16.mxu0 %vm206_vm0, %v1032_v6  ;;  %1002 = vmatprep.mubr.msk.bf16.mxu1 %vm206_vm0, %v1033_v7 }
  0x12   :  { %979 = vmatmul.mubr.msk.bf16.gmra.mrb[4].mxu0 %vm206_vm0, %v1034_v8  ;;  %1003 = vmatmul.mubr.msk.bf16.gmra.mrb[4].mxu1 %vm206_vm0, %v1035_v9 }
  0x13   :  { %982 = vmatprep.mubr.msk.bf16.mxu0 %vm206_vm0, %v1036_v10  ;;  %1006 = vmatprep.mubr.msk.bf16.mxu1 %vm206_vm0, %v1037_v11 }
  0x1a   :  { %983 = vmatmul.mubr.msk.bf16.gmra.mrb[8].mxu0 %vm206_vm0, %v1038_v12  ;;  %1007 = vmatmul.mubr.msk.bf16.gmra.mrb[8].mxu1 %vm206_vm0, %v1039_v13 }
  0x1b   :  { %986 = vmatprep.mubr.msk.bf16.mxu0 %vm206_vm0, %v1040_v14  ;;  %1010 = vmatprep.mubr.msk.bf16.mxu1 %vm206_vm0, %v1041_v15 }
  0x22   :  { %987 = vmatmul.mubr.msk.bf16.gmra.mrb[12].mxu0 %vm206_vm0, %v1042_v16  ;;  %1011 = vmatmul.mubr.msk.bf16.gmra.mrb[12].mxu1 %vm206_vm0, %v1043_v17 }
  0x23   :  { %990 = vmatprep.mubr.msk.bf16.mxu0 %vm206_vm0, %v1044_v18  ;;  %1014 = vmatprep.mubr.msk.bf16.mxu1 %vm206_vm0, %v1045_v19 }
  0x2a   :  { %991 = vmatmul.mubr.msk.bf16.gmra.mrb[16].mxu0 %vm206_vm0, %v1046_v20  ;;  %1015 = vmatmul.mubr.msk.bf16.gmra.mrb[16].mxu1 %vm206_vm0, %v1047_v21 }
  0x2b   :  { %994 = vmatprep.mubr.msk.bf16.mxu0 %vm206_vm0, %v1048_v22  ;;  %1018 = vmatprep.mubr.msk.bf16.mxu1 %vm206_vm0, %v1049_v23 }
  0x32   :  { %995 = vmatmul.mubr.msk.bf16.gmra.mrb[20].mxu0 %vm206_vm0, %v1050_v24  ;;  %1019 = vmatmul.mubr.msk.bf16.gmra.mrb[20].mxu1 %vm206_vm0, %v1051_v25 }
  0xdd   :  { %v976_v27 = vpop.f32.mrb[0].mxu0  ;;  %v1000_v28 = vpop.f32.mrb[0].mxu1 }
  0xde   :  { %v322_v29 = vadd.f32 %v976_v27, %v1177_v26  ;;  %v418_v30 = vadd.f32 %v1000_v28, %v1177_v26  ;;  %v313_v31 = vpop.f32.mrb[1].mxu0  ;;  %v409_v32 = vpop.f32.mrb[1].mxu1 }
  0xdf   :  { %v314_v33 = vadd.f32 %v1177_v26, %v313_v31  ;;  %v410_v34 = vadd.f32 %v1177_v26, %v409_v32  ;;  %v977_v35 = vpop.f32.mrb[2].mxu0  ;;  %v1001_v36 = vpop.f32.mrb[2].mxu1 }
  0xe0   :  { %v506_v37 = vmax.f32 %v322_v29, 0.0  ;;  %v530_v38 = vmax.f32 %v418_v30, 0.0  ;;  %v325_v39 = vadd.f32 %v977_v35, %v1177_v26  ;;  %v421_v40 = vadd.f32 %v1001_v36, %v1177_v26  ;;  %v316_v41 = vpop.f32.mrb[3].mxu0  ;;  %v412_v42 = vpop.f32.mrb[3].mxu1 }
  0xe1   :  { %v504_v43 = vmax.f32 %v314_v33, 0.0  ;;  %v528_v44 = vmax.f32 %v410_v34, 0.0  ;;  %v317_v45 = vadd.f32 %v1177_v26, %v316_v41  ;;  %v413_v46 = vadd.f32 %v1177_v26, %v412_v42 }
  0xe2   :  { %v898_v47 = vpack.c.bf16 %v506_v37, %v506_v37  ;;  %v922_v48 = vpack.c.bf16 %v530_v38, %v530_v38  ;;  %v507_v49 = vmax.f32 %v325_v39, 0.0  ;;  %v531_v50 = vmax.f32 %v421_v40, 0.0 }
  0xe3   :  { %v896_v51 = vpack.c.bf16 %v504_v43, %v504_v43  ;;  %v920_v52 = vpack.c.bf16 %v528_v44, %v528_v44  ;;  %v505_v53 = vmax.f32 %v317_v45, 0.0  ;;  %v529_v54 = vmax.f32 %v413_v46, 0.0 }
  0xe4   :  { %747 = vst.msk [vmem:[%s1422_s3 + $0x8] sm:$0xf] %vm744_vm1, %v898_v47  ;;  %771 = vst.msk [vmem:[%s1422_s3 + $0x68] sm:$0xf] %vm744_vm1, %v922_v48  ;;  %v899_v55 = vpack.c.bf16 %v507_v49, %v507_v49  ;;  %v923_v56 = vpack.c.bf16 %v531_v50, %v531_v50 }
  0xe5   :  { %745 = vst.msk [vmem:[%s1422_s3] sm:$0xf] %vm744_vm1, %v896_v51  ;;  %769 = vst.msk [vmem:[%s1422_s3 + $0x60] sm:$0xf] %vm744_vm1, %v920_v52  ;;  %v897_v57 = vpack.c.bf16 %v505_v53, %v505_v53  ;;  %v921_v58 = vpack.c.bf16 %v529_v54, %v529_v54  ;;  %v980_v59 = vpop.f32.mrb[4].mxu0  ;;  %v1004_v60 = vpop.f32.mrb[4].mxu1 }
  0xe6   :  { %748 = vst.msk [vmem:[%s1422_s3 + $0xc] sm:$0xf] %vm744_vm1, %v899_v55  ;;  %772 = vst.msk [vmem:[%s1422_s3 + $0x6c] sm:$0xf] %vm744_vm1, %v923_v56  ;;  %v338_v61 = vadd.f32 %v980_v59, %v1177_v26  ;;  %v434_v62 = vadd.f32 %v1004_v60, %v1177_v26  ;;  %v329_v63 = vpop.f32.mrb[5].mxu0  ;;  %v425_v0 = vpop.f32.mrb[5].mxu1 }
  0xe7   :  { %746 = vst.msk [vmem:[%s1422_s3 + $0x4] sm:$0xf] %vm744_vm1, %v897_v57  ;;  %770 = vst.msk [vmem:[%s1422_s3 + $0x64] sm:$0xf] %vm744_vm1, %v921_v58  ;;  %v330_v1 = vadd.f32 %v1177_v26, %v329_v63  ;;  %v426_v2 = vadd.f32 %v1177_v26, %v425_v0  ;;  %v981_v3 = vpop.f32.mrb[6].mxu0  ;;  %v1005_v4 = vpop.f32.mrb[6].mxu1 }
  0xe8   :  { %v510_v5 = vmax.f32 %v338_v61, 0.0  ;;  %v534_v6 = vmax.f32 %v434_v62, 0.0  ;;  %v341_v7 = vadd.f32 %v981_v3, %v1177_v26  ;;  %v437_v8 = vadd.f32 %v1005_v4, %v1177_v26  ;;  %v332_v9 = vpop.f32.mrb[7].mxu0  ;;  %v428_v10 = vpop.f32.mrb[7].mxu1 }
  0xe9   :  { %v508_v11 = vmax.f32 %v330_v1, 0.0  ;;  %v532_v12 = vmax.f32 %v426_v2, 0.0  ;;  %v333_v13 = vadd.f32 %v1177_v26, %v332_v9  ;;  %v429_v14 = vadd.f32 %v1177_v26, %v428_v10 }
  0xea   :  { %v902_v15 = vpack.c.bf16 %v510_v5, %v510_v5  ;;  %v926_v16 = vpack.c.bf16 %v534_v6, %v534_v6  ;;  %v511_v17 = vmax.f32 %v341_v7, 0.0  ;;  %v535_v18 = vmax.f32 %v437_v8, 0.0 }
  0xeb   :  { %v900_v19 = vpack.c.bf16 %v508_v11, %v508_v11  ;;  %v924_v20 = vpack.c.bf16 %v532_v12, %v532_v12  ;;  %v509_v21 = vmax.f32 %v333_v13, 0.0  ;;  %v533_v22 = vmax.f32 %v429_v14, 0.0 }
  0xec   :  { %751 = vst.msk [vmem:[%s1422_s3 + $0x18] sm:$0xf] %vm744_vm1, %v902_v15  ;;  %775 = vst.msk [vmem:[%s1422_s3 + $0x78] sm:$0xf] %vm744_vm1, %v926_v16  ;;  %v903_v23 = vpack.c.bf16 %v511_v17, %v511_v17  ;;  %v927_v24 = vpack.c.bf16 %v535_v18, %v535_v18 }
  0xed   :  { %749 = vst.msk [vmem:[%s1422_s3 + $0x10] sm:$0xf] %vm744_vm1, %v900_v19  ;;  %773 = vst.msk [vmem:[%s1422_s3 + $0x70] sm:$0xf] %vm744_vm1, %v924_v20  ;;  %v901_v25 = vpack.c.bf16 %v509_v21, %v509_v21  ;;  %v925_v27 = vpack.c.bf16 %v533_v22, %v533_v22  ;;  %v984_v28 = vpop.f32.mrb[8].mxu0  ;;  %v1008_v29 = vpop.f32.mrb[8].mxu1 }
  0xee   :  { %752 = vst.msk [vmem:[%s1422_s3 + $0x1c] sm:$0xf] %vm744_vm1, %v903_v23  ;;  %776 = vst.msk [vmem:[%s1422_s3 + $0x7c] sm:$0xf] %vm744_vm1, %v927_v24  ;;  %v354_v30 = vadd.f32 %v984_v28, %v1177_v26  ;;  %v450_v31 = vadd.f32 %v1008_v29, %v1177_v26  ;;  %v345_v32 = vpop.f32.mrb[9].mxu0  ;;  %v441_v33 = vpop.f32.mrb[9].mxu1 }
  0xef   :  { %750 = vst.msk [vmem:[%s1422_s3 + $0x14] sm:$0xf] %vm744_vm1, %v901_v25  ;;  %774 = vst.msk [vmem:[%s1422_s3 + $0x74] sm:$0xf] %vm744_vm1, %v925_v27  ;;  %v346_v34 = vadd.f32 %v1177_v26, %v345_v32  ;;  %v442_v35 = vadd.f32 %v1177_v26, %v441_v33  ;;  %v985_v36 = vpop.f32.mrb[10].mxu0  ;;  %v1009_v37 = vpop.f32.mrb[10].mxu1 }
  0xf0   :  { %v514_v38 = vmax.f32 %v354_v30, 0.0  ;;  %v538_v39 = vmax.f32 %v450_v31, 0.0  ;;  %v357_v40 = vadd.f32 %v985_v36, %v1177_v26  ;;  %v453_v41 = vadd.f32 %v1009_v37, %v1177_v26  ;;  %v348_v42 = vpop.f32.mrb[11].mxu0  ;;  %v444_v43 = vpop.f32.mrb[11].mxu1 }
  0xf1   :  { %v512_v44 = vmax.f32 %v346_v34, 0.0  ;;  %v536_v45 = vmax.f32 %v442_v35, 0.0  ;;  %v349_v46 = vadd.f32 %v1177_v26, %v348_v42  ;;  %v445_v47 = vadd.f32 %v1177_v26, %v444_v43 }
  0xf2   :  { %v906_v48 = vpack.c.bf16 %v514_v38, %v514_v38  ;;  %v930_v49 = vpack.c.bf16 %v538_v39, %v538_v39  ;;  %v515_v50 = vmax.f32 %v357_v40, 0.0  ;;  %v539_v51 = vmax.f32 %v453_v41, 0.0 }
  0xf3   :  { %v904_v52 = vpack.c.bf16 %v512_v44, %v512_v44  ;;  %v928_v53 = vpack.c.bf16 %v536_v45, %v536_v45  ;;  %v513_v54 = vmax.f32 %v349_v46, 0.0  ;;  %v537_v55 = vmax.f32 %v445_v47, 0.0 }
  0xf4   :  { %755 = vst.msk [vmem:[%s1422_s3 + $0x28] sm:$0xf] %vm744_vm1, %v906_v48  ;;  %779 = vst.msk [vmem:[%s1422_s3 + $0x88] sm:$0xf] %vm744_vm1, %v930_v49  ;;  %v907_v56 = vpack.c.bf16 %v515_v50, %v515_v50  ;;  %v931_v57 = vpack.c.bf16 %v539_v51, %v539_v51 }
  0xf5   :  { %753 = vst.msk [vmem:[%s1422_s3 + $0x20] sm:$0xf] %vm744_vm1, %v904_v52  ;;  %777 = vst.msk [vmem:[%s1422_s3 + $0x80] sm:$0xf] %vm744_vm1, %v928_v53  ;;  %v905_v58 = vpack.c.bf16 %v513_v54, %v513_v54  ;;  %v929_v59 = vpack.c.bf16 %v537_v55, %v537_v55  ;;  %v988_v60 = vpop.f32.mrb[12].mxu0  ;;  %v1012_v61 = vpop.f32.mrb[12].mxu1 }
  0xf6   :  { %756 = vst.msk [vmem:[%s1422_s3 + $0x2c] sm:$0xf] %vm744_vm1, %v907_v56  ;;  %780 = vst.msk [vmem:[%s1422_s3 + $0x8c] sm:$0xf] %vm744_vm1, %v931_v57  ;;  %v370_v62 = vadd.f32 %v988_v60, %v1177_v26  ;;  %v466_v63 = vadd.f32 %v1012_v61, %v1177_v26  ;;  %v361_v0 = vpop.f32.mrb[13].mxu0  ;;  %v457_v1 = vpop.f32.mrb[13].mxu1 }
  0xf7   :  { %754 = vst.msk [vmem:[%s1422_s3 + $0x24] sm:$0xf] %vm744_vm1, %v905_v58  ;;  %778 = vst.msk [vmem:[%s1422_s3 + $0x84] sm:$0xf] %vm744_vm1, %v929_v59  ;;  %v362_v2 = vadd.f32 %v1177_v26, %v361_v0  ;;  %v458_v3 = vadd.f32 %v1177_v26, %v457_v1  ;;  %v989_v4 = vpop.f32.mrb[14].mxu0  ;;  %v1013_v5 = vpop.f32.mrb[14].mxu1 }
  0xf8   :  { %v518_v6 = vmax.f32 %v370_v62, 0.0  ;;  %v542_v7 = vmax.f32 %v466_v63, 0.0  ;;  %v373_v8 = vadd.f32 %v989_v4, %v1177_v26  ;;  %v469_v9 = vadd.f32 %v1013_v5, %v1177_v26  ;;  %v364_v10 = vpop.f32.mrb[15].mxu0  ;;  %v460_v11 = vpop.f32.mrb[15].mxu1 }
  0xf9   :  { %v516_v12 = vmax.f32 %v362_v2, 0.0  ;;  %v540_v13 = vmax.f32 %v458_v3, 0.0  ;;  %v365_v14 = vadd.f32 %v1177_v26, %v364_v10  ;;  %v461_v15 = vadd.f32 %v1177_v26, %v460_v11 }
  0xfa   :  { %v910_v16 = vpack.c.bf16 %v518_v6, %v518_v6  ;;  %v934_v17 = vpack.c.bf16 %v542_v7, %v542_v7  ;;  %v519_v18 = vmax.f32 %v373_v8, 0.0  ;;  %v543_v19 = vmax.f32 %v469_v9, 0.0 }
  0xfb   :  { %v908_v20 = vpack.c.bf16 %v516_v12, %v516_v12  ;;  %v932_v21 = vpack.c.bf16 %v540_v13, %v540_v13  ;;  %v517_v22 = vmax.f32 %v365_v14, 0.0  ;;  %v541_v23 = vmax.f32 %v461_v15, 0.0 }
  0xfc   :  { %759 = vst.msk [vmem:[%s1422_s3 + $0x38] sm:$0xf] %vm744_vm1, %v910_v16  ;;  %783 = vst.msk [vmem:[%s1422_s3 + $0x98] sm:$0xf] %vm744_vm1, %v934_v17  ;;  %v911_v24 = vpack.c.bf16 %v519_v18, %v519_v18  ;;  %v935_v25 = vpack.c.bf16 %v543_v19, %v543_v19 }
  0xfd   :  { %757 = vst.msk [vmem:[%s1422_s3 + $0x30] sm:$0xf] %vm744_vm1, %v908_v20  ;;  %781 = vst.msk [vmem:[%s1422_s3 + $0x90] sm:$0xf] %vm744_vm1, %v932_v21  ;;  %v909_v27 = vpack.c.bf16 %v517_v22, %v517_v22  ;;  %v933_v28 = vpack.c.bf16 %v541_v23, %v541_v23  ;;  %v992_v29 = vpop.f32.mrb[16].mxu0  ;;  %v1016_v30 = vpop.f32.mrb[16].mxu1 }
  0xfe   :  { %760 = vst.msk [vmem:[%s1422_s3 + $0x3c] sm:$0xf] %vm744_vm1, %v911_v24  ;;  %784 = vst.msk [vmem:[%s1422_s3 + $0x9c] sm:$0xf] %vm744_vm1, %v935_v25  ;;  %v386_v31 = vadd.f32 %v992_v29, %v1177_v26  ;;  %v482_v32 = vadd.f32 %v1016_v30, %v1177_v26  ;;  %v377_v33 = vpop.f32.mrb[17].mxu0  ;;  %v473_v34 = vpop.f32.mrb[17].mxu1 }
  0xff   :  { %758 = vst.msk [vmem:[%s1422_s3 + $0x34] sm:$0xf] %vm744_vm1, %v909_v27  ;;  %782 = vst.msk [vmem:[%s1422_s3 + $0x94] sm:$0xf] %vm744_vm1, %v933_v28  ;;  %v378_v35 = vadd.f32 %v1177_v26, %v377_v33  ;;  %v474_v36 = vadd.f32 %v1177_v26, %v473_v34  ;;  %v993_v37 = vpop.f32.mrb[18].mxu0  ;;  %v1017_v38 = vpop.f32.mrb[18].mxu1 }
 0x100   :  { %v522_v39 = vmax.f32 %v386_v31, 0.0  ;;  %v546_v40 = vmax.f32 %v482_v32, 0.0  ;;  %v389_v41 = vadd.f32 %v993_v37, %v1177_v26  ;;  %v485_v42 = vadd.f32 %v1017_v38, %v1177_v26  ;;  %v380_v43 = vpop.f32.mrb[19].mxu0  ;;  %v476_v44 = vpop.f32.mrb[19].mxu1 }
 0x101   :  { %v520_v45 = vmax.f32 %v378_v35, 0.0  ;;  %v544_v46 = vmax.f32 %v474_v36, 0.0  ;;  %v381_v47 = vadd.f32 %v1177_v26, %v380_v43  ;;  %v477_v48 = vadd.f32 %v1177_v26, %v476_v44 }
 0x102   :  { %v914_v49 = vpack.c.bf16 %v522_v39, %v522_v39  ;;  %v938_v50 = vpack.c.bf16 %v546_v40, %v546_v40  ;;  %v523_v51 = vmax.f32 %v389_v41, 0.0  ;;  %v547_v52 = vmax.f32 %v485_v42, 0.0 }
 0x103   :  { %v912_v53 = vpack.c.bf16 %v520_v45, %v520_v45  ;;  %v936_v54 = vpack.c.bf16 %v544_v46, %v544_v46  ;;  %v521_v55 = vmax.f32 %v381_v47, 0.0  ;;  %v545_v56 = vmax.f32 %v477_v48, 0.0 }
 0x104   :  { %763 = vst.msk [vmem:[%s1422_s3 + $0x48] sm:$0xf] %vm744_vm1, %v914_v49  ;;  %787 = vst.msk [vmem:[%s1422_s3 + $0xa8] sm:$0xf] %vm744_vm1, %v938_v50  ;;  %v915_v57 = vpack.c.bf16 %v523_v51, %v523_v51  ;;  %v939_v58 = vpack.c.bf16 %v547_v52, %v547_v52 }
 0x105   :  { %761 = vst.msk [vmem:[%s1422_s3 + $0x40] sm:$0xf] %vm744_vm1, %v912_v53  ;;  %785 = vst.msk [vmem:[%s1422_s3 + $0xa0] sm:$0xf] %vm744_vm1, %v936_v54  ;;  %v913_v59 = vpack.c.bf16 %v521_v55, %v521_v55  ;;  %v937_v60 = vpack.c.bf16 %v545_v56, %v545_v56  ;;  %v996_v61 = vpop.f32.mrb[20].mxu0  ;;  %v1020_v62 = vpop.f32.mrb[20].mxu1 }
 0x106   :  { %764 = vst.msk [vmem:[%s1422_s3 + $0x4c] sm:$0xf] %vm744_vm1, %v915_v57  ;;  %788 = vst.msk [vmem:[%s1422_s3 + $0xac] sm:$0xf] %vm744_vm1, %v939_v58  ;;  %v402_v63 = vadd.f32 %v996_v61, %v1177_v26  ;;  %v498_v0 = vadd.f32 %v1020_v62, %v1177_v26  ;;  %v393_v1 = vpop.f32.mrb[21].mxu0  ;;  %v489_v2 = vpop.f32.mrb[21].mxu1 }
 0x107   :  { %762 = vst.msk [vmem:[%s1422_s3 + $0x44] sm:$0xf] %vm744_vm1, %v913_v59  ;;  %786 = vst.msk [vmem:[%s1422_s3 + $0xa4] sm:$0xf] %vm744_vm1, %v937_v60  ;;  %v394_v3 = vadd.f32 %v1177_v26, %v393_v1  ;;  %v490_v4 = vadd.f32 %v1177_v26, %v489_v2  ;;  %v997_v5 = vpop.f32.mrb[22].mxu0  ;;  %v1021_v6 = vpop.f32.mrb[22].mxu1 }
 0x108   :  { %v526_v7 = vmax.f32 %v402_v63, 0.0  ;;  %v550_v8 = vmax.f32 %v498_v0, 0.0  ;;  %v405_v9 = vadd.f32 %v997_v5, %v1177_v26  ;;  %v501_v10 = vadd.f32 %v1021_v6, %v1177_v26  ;;  %v396_v11 = vpop.f32.mrb[23].mxu0  ;;  %v492_v12 = vpop.f32.mrb[23].mxu1 }
 0x109   :  { %v524_v13 = vmax.f32 %v394_v3, 0.0  ;;  %v548_v14 = vmax.f32 %v490_v4, 0.0  ;;  %v397_v15 = vadd.f32 %v1177_v26, %v396_v11  ;;  %v493_v16 = vadd.f32 %v1177_v26, %v492_v12 }
 0x10a   :  { %v918_v17 = vpack.c.bf16 %v526_v7, %v526_v7  ;;  %v942_v18 = vpack.c.bf16 %v550_v8, %v550_v8  ;;  %v527_v19 = vmax.f32 %v405_v9, 0.0  ;;  %v551_v20 = vmax.f32 %v501_v10, 0.0 }
 0x10b   :  { %v916_v21 = vpack.c.bf16 %v524_v13, %v524_v13  ;;  %v940_v22 = vpack.c.bf16 %v548_v14, %v548_v14  ;;  %v525_v23 = vmax.f32 %v397_v15, 0.0  ;;  %v549_v24 = vmax.f32 %v493_v16, 0.0 }
 0x10c   :  { %767 = vst.msk [vmem:[%s1422_s3 + $0x58] sm:$0xf] %vm744_vm1, %v918_v17  ;;  %791 = vst.msk [vmem:[%s1422_s3 + $0xb8] sm:$0xf] %vm744_vm1, %v942_v18  ;;  %v919_v25 = vpack.c.bf16 %v527_v19, %v527_v19  ;;  %v943_v26 = vpack.c.bf16 %v551_v20, %v551_v20 }
 0x10d   :  { %765 = vst.msk [vmem:[%s1422_s3 + $0x50] sm:$0xf] %vm744_vm1, %v916_v21  ;;  %789 = vst.msk [vmem:[%s1422_s3 + $0xb0] sm:$0xf] %vm744_vm1, %v940_v22  ;;  %v917_v27 = vpack.c.bf16 %v525_v23, %v525_v23  ;;  %v941_v28 = vpack.c.bf16 %v549_v24, %v549_v24 }
 0x10e   :  { %768 = vst.msk [vmem:[%s1422_s3 + $0x5c] sm:$0xf] %vm744_vm1, %v919_v25  ;;  %792 = vst.msk [vmem:[%s1422_s3 + $0xbc] sm:$0xf] %vm744_vm1, %v943_v26 }
 0x10f   :  { %766 = vst.msk [vmem:[%s1422_s3 + $0x54] sm:$0xf] %vm744_vm1, %v917_v27  ;;  %790 = vst.msk [vmem:[%s1422_s3 + $0xb4] sm:$0xf] %vm744_vm1, %v941_v28 }

// kernel: inpainting_loss.9
= control target key start
LH: loop header
LB: loop body
LE: loop exit
PB: predicated region body
PF: predicated region fallthrough
CT: control target
= control target key end

     0   :  { %vm100_vm0 = vcmask 588800   ;;  %vm119_vm1 = vcmask 1043456   ;;  %vm264_vm2 = vcmask 125952   ;;  %s489_s1 = inlined_call_operand.vmem [shape: bf16[72,128], index: 1, kind: input, shape index: {}]   ;;  %s490_s0 = inlined_call_operand.vmem [shape: bf16[96,72], index: 0, kind: input, shape index: {}]   ;;  %s491_s2 = inlined_call_operand.vmem [shape: f32[1,128], index: 2, kind: input, shape index: {}]   ;;  %s492_s3 = inlined_call_operand.vmem [shape: bf16[96,16], index: 3, kind: output, shape index: {}]  }
   0x1   :  { %v368_v0 = vld [vmem:[%s489_s1] sm:$0xff]   ;;  %v369_v1 = vld [vmem:[%s489_s1 + $0x8] sm:$0xff]   ;;  %v370_v2 = vld [vmem:[%s489_s1 + $0x10] sm:$0xff]  }
   0x2   :  { %356 = vmatprep.subr.bf16.mxu1 %v368_v0  ;;  %334 = vmatprep.subr.bf16.mxu0 %v368_v0  ;;  %v373_v3 = vld [vmem:[%s490_s0 + $0x10] sm:$0xff]   ;;  %v375_v4 = vld [vmem:[%s490_s0] sm:$0xff]   ;;  %v371_v5 = vld [vmem:[%s489_s1 + $0x18] sm:$0xff]  }
   0x3   :  { %361 = vmatpush3.bf16.msra.mxu1 %v368_v0  ;;  %335 = vmatpush3.bf16.msra.mxu0 %v368_v0  ;;  %v372_v6 = vld [vmem:[%s489_s1 + $0x20] ss:$0 sps:$4 sm:$0xff]   ;;  %v374_v8 = vld [vmem:[%s490_s0 + $0x18] sm:$0xff]   ;;  %v376_v9 = vld [vmem:[%s490_s0 + $0x8] sm:$0xff]  }
   0x4   :  { %357 = vmatprep.subr.bf16.mxu1 %v369_v1  ;;  %336 = vmatprep.subr.bf16.mxu0 %v369_v1  ;;  %v121_v7 = vsel %vm119_vm1, %v372_v6, 0  ;;  %v377_v10 = vld [vmem:[%s490_s0 + $0x20] sm:$0xff]   ;;  %v378_v11 = vld [vmem:[%s490_s0 + $0x28] sm:$0xff]  }
   0x5   :  { %348 = vmatprep.mubr.msk.bf16.mxu1 %vm100_vm0, %v373_v3  ;;  %344 = vmatprep.mubr.msk.bf16.mxu0 %vm100_vm0, %v375_v4  ;;  %v281_v12 = vld [vmem:[%s491_s2] ss:$0 sm:$0xff] }
   0x7   :  { %362 = vmatpush3.bf16.msra.mxu1 %v369_v1  ;;  %337 = vmatpush3.bf16.msra.mxu0 %v369_v1 }
   0x8   :  { %358 = vmatprep.subr.bf16.mxu1 %v370_v2  ;;  %338 = vmatprep.subr.bf16.mxu0 %v370_v2 }
   0xb   :  { %363 = vmatpush3.bf16.msra.mxu1 %v370_v2  ;;  %339 = vmatpush3.bf16.msra.mxu0 %v370_v2 }
   0xc   :  { %359 = vmatprep.subr.bf16.mxu1 %v371_v5  ;;  %340 = vmatprep.subr.bf16.mxu0 %v371_v5 }
   0xf   :  { %364 = vmatpush3.bf16.msra.mxu1 %v371_v5  ;;  %341 = vmatpush3.bf16.msra.mxu0 %v371_v5 }
  0x10   :  { %367 = vmatprep.subr.msk.bf16.mxu1 %vm119_vm1, %v372_v6  ;;  %366 = vmatprep.subr.msk.bf16.mxu0 %vm119_vm1, %v372_v6 }
  0x13   :  { %365 = vmatpush3.bf16.msra.mxu1 %v121_v7  ;;  %343 = vmatpush3.bf16.msra.mxu0 %v121_v7 }
  0x16   :  { %349 = vmatmul.mubr.msk.bf16.vlgmr.msra.gmra.mrb[0].mxu1 %vm100_vm0, %v374_v8  ;;  %345 = vmatmul.mubr.msk.bf16.vlgmr.msra.gmra.mrb[0].mxu0 %vm100_vm0, %v376_v9 }
  0x17   :  { %352 = vmatprep.mubr.msk.bf16.mxu1 %vm100_vm0, %v377_v10 }
  0x1e   :  { %353 = vmatmul.mubr.msk.bf16.gmra.mrb[4].mxu1 %vm100_vm0, %v378_v11 }
  0xe9   :  { %v350_v13 = vpop.f32.mrb[0].mxu1  ;;  %v346_v14 = vpop.f32.mrb[0].mxu0 }
  0xea   :  { %v182_v15 = vadd.f32 %v350_v13, %v281_v12  ;;  %v173_v16 = vpop.f32.mrb[1].mxu1  ;;  %v166_v17 = vadd.f32 %v346_v14, %v281_v12  ;;  %v157_v18 = vpop.f32.mrb[1].mxu0 }
  0xeb   :  { %v174_v19 = vadd.f32 %v281_v12, %v173_v16  ;;  %v351_v20 = vpop.f32.mrb[2].mxu1  ;;  %v158_v21 = vadd.f32 %v281_v12, %v157_v18  ;;  %v347_v22 = vpop.f32.mrb[2].mxu0 }
  0xec   :  { %v210_v23 = vmax.f32 %v182_v15, 0.0  ;;  %v185_v24 = vadd.f32 %v351_v20, %v281_v12  ;;  %v176_v25 = vpop.f32.mrb[3].mxu1  ;;  %v206_v26 = vmax.f32 %v166_v17, 0.0  ;;  %v169_v27 = vadd.f32 %v347_v22, %v281_v12  ;;  %v160_v28 = vpop.f32.mrb[3].mxu0 }
  0xed   :  { %v208_v29 = vmax.f32 %v174_v19, 0.0  ;;  %v177_v30 = vadd.f32 %v281_v12, %v176_v25  ;;  %v204_v31 = vmax.f32 %v158_v21, 0.0  ;;  %v161_v32 = vadd.f32 %v281_v12, %v160_v28 }
  0xee   :  { %v317_v33 = vpack.c.bf16 %v210_v23, %v210_v23  ;;  %v211_v34 = vmax.f32 %v185_v24, 0.0  ;;  %v313_v35 = vpack.c.bf16 %v206_v26, %v206_v26  ;;  %v207_v36 = vmax.f32 %v169_v27, 0.0 }
  0xef   :  { %v315_v37 = vpack.c.bf16 %v208_v29, %v208_v29  ;;  %v209_v38 = vmax.f32 %v177_v30, 0.0  ;;  %v311_v39 = vpack.c.bf16 %v204_v31, %v204_v31  ;;  %v205_v40 = vmax.f32 %v161_v32, 0.0 }
  0xf0   :  { %271 = vst.msk [vmem:[%s492_s3 + $0x18] sm:$0xf] %vm264_vm2, %v317_v33  ;;  %v318_v41 = vpack.c.bf16 %v211_v34, %v211_v34  ;;  %267 = vst.msk [vmem:[%s492_s3 + $0x8] sm:$0xf] %vm264_vm2, %v313_v35  ;;  %v314_v42 = vpack.c.bf16 %v207_v36, %v207_v36 }
  0xf1   :  { %269 = vst.msk [vmem:[%s492_s3 + $0x10] sm:$0xf] %vm264_vm2, %v315_v37  ;;  %v316_v43 = vpack.c.bf16 %v209_v38, %v209_v38  ;;  %265 = vst.msk [vmem:[%s492_s3] sm:$0xf] %vm264_vm2, %v311_v39  ;;  %v312_v44 = vpack.c.bf16 %v205_v40, %v205_v40  ;;  %v354_v45 = vpop.f32.mrb[4].mxu1 }
  0xf2   :  { %272 = vst.msk [vmem:[%s492_s3 + $0x1c] sm:$0xf] %vm264_vm2, %v318_v41  ;;  %268 = vst.msk [vmem:[%s492_s3 + $0xc] sm:$0xf] %vm264_vm2, %v314_v42  ;;  %v198_v46 = vadd.f32 %v354_v45, %v281_v12  ;;  %v189_v47 = vpop.f32.mrb[5].mxu1 }
  0xf3   :  { %270 = vst.msk [vmem:[%s492_s3 + $0x14] sm:$0xf] %vm264_vm2, %v316_v43  ;;  %266 = vst.msk [vmem:[%s492_s3 + $0x4] sm:$0xf] %vm264_vm2, %v312_v44  ;;  %v190_v48 = vadd.f32 %v281_v12, %v189_v47  ;;  %v355_v49 = vpop.f32.mrb[6].mxu1 }
  0xf4   :  { %v214_v50 = vmax.f32 %v198_v46, 0.0  ;;  %v201_v51 = vadd.f32 %v355_v49, %v281_v12  ;;  %v192_v52 = vpop.f32.mrb[7].mxu1 }
  0xf5   :  { %v212_v53 = vmax.f32 %v190_v48, 0.0  ;;  %v193_v54 = vadd.f32 %v281_v12, %v192_v52 }
  0xf6   :  { %v321_v55 = vpack.c.bf16 %v214_v50, %v214_v50  ;;  %v215_v56 = vmax.f32 %v201_v51, 0.0 }
  0xf7   :  { %v319_v57 = vpack.c.bf16 %v212_v53, %v212_v53  ;;  %v213_v58 = vmax.f32 %v193_v54, 0.0 }
  0xf8   :  { %275 = vst.msk [vmem:[%s492_s3 + $0x28] sm:$0xf] %vm264_vm2, %v321_v55  ;;  %v322_v59 = vpack.c.bf16 %v215_v56, %v215_v56 }
  0xf9   :  { %273 = vst.msk [vmem:[%s492_s3 + $0x20] sm:$0xf] %vm264_vm2, %v319_v57  ;;  %v320_v60 = vpack.c.bf16 %v213_v58, %v213_v58 }
  0xfa   :  { %276 = vst.msk [vmem:[%s492_s3 + $0x2c] sm:$0xf] %vm264_vm2, %v322_v59 }
  0xfb   :  { %274 = vst.msk [vmem:[%s492_s3 + $0x24] sm:$0xf] %vm264_vm2, %v320_v60 }

// kernel: inpainting_loss.12
= control target key start
LH: loop header
LB: loop body
LE: loop exit
PB: predicated region body
PF: predicated region fallthrough
CT: control target
= control target key end

     0   :  { %v735_v4 = vmov 0.0   ;;  %vm736_vm0 = vmmov 0   ;;  %s863_s0 = inlined_call_operand.vmem [shape: bf16[6,16,16], index: 0, kind: input, shape index: {}]   ;;  %s864_s1 = inlined_call_operand.vmem [shape: f32[2], index: 1, kind: output, shape index: {}]  }
   0x1   :  { %v29_v0 = vld [vmem:[%s863_s0] sm:$0xff]   ;;  %v754_v1 = vld [vmem:[%s863_s0 + $0x8] sm:$0xff]   ;;  %v33_v2 = vld [vmem:[%s863_s0 + $0x10] sm:$0xff]   ;;  %661 = vmatprep.subr.bf16.mxu0 %v735_v4  ;;  %663 = vmatprep.mubr.msk.bf16.mxu0 %vm736_vm0, %v735_v4 }
   0x2   :  { %v762_v3 = vld [vmem:[%s863_s0 + $0x18] sm:$0xff]   ;;  %v42_v5 = vunpack.c.h.bf16 %v29_v0  ;;  %v41_v6 = vunpack.c.l.bf16 %v29_v0  ;;  %v46_v7 = vunpack.c.h.bf16 %v33_v2  ;;  %667 = vmatprep.subr.bf16.mxu1 %v735_v4  ;;  %669 = vmatprep.mubr.msk.bf16.mxu1 %vm736_vm0, %v735_v4 }
   0x3   :  { %6 = vsyncpa [#allocation5], 0  ;;  %125 = vxpose.xlu0.c.b16.start.end [1/1] (short) (narrow) %v29_v0, 16  ;;  %v43_v8 = vunpack.c.l.bf16 %v754_v1  ;;  %v45_v9 = vunpack.c.l.bf16 %v33_v2  ;;  %v47_v10 = vunpack.c.l.bf16 %v762_v3  ;;  %v37_v11 = vld [vmem:[%s863_s0 + $0x20] sm:$0xff]   ;;  %v778_v12 = vld [vmem:[%s863_s0 + $0x28] sm:$0xff]   ;;  %662 = vmatpush3.bf16.msra.mxu0 %v29_v0  ;;  %vm16_vm1 = vcmask 130048  }
   0x4   :  { %257 = vxpose.xlu1.c.b16.start.end [1/1] (short) (narrow) %v33_v2, 16  ;;  %v49_v13 = vunpack.c.l.bf16 %v37_v11  ;;  %v50_v14 = vunpack.c.h.bf16 %v37_v11  ;;  %v51_v15 = vunpack.c.l.bf16 %v778_v12  ;;  %673 = vmatprep.subr.bf16.mxu0 %v735_v4  ;;  %17 = vst.msk [vmem:[#allocation3] sm:$0xff] %vm16_vm1, %v735_v4  ;;  %18 = vst.msk [vmem:[#allocation3 + $0x8] sm:$0xff] %vm16_vm1, %v735_v4  ;;  %v44_v28 = vunpack.c.h.bf16 %v754_v1  ;;  %s628_s24 = sshll.u32 %s864_s1, 4  ;;  %s629_s24 = int_to_ptr.vmem [resolvable:$true] %s628_s24 }
   0x5   :  { %668 = vmatpush3.bf16.msra.mxu1 %v754_v1  ;;  %19 = vst.msk [vmem:[#allocation3 + $0x10] sm:$0xff] %vm16_vm1, %v735_v4  ;;  %20 = vst.msk [vmem:[#allocation3 + $0x18] sm:$0xff] %vm16_vm1, %v735_v4  ;;  %v52_v31 = vunpack.c.h.bf16 %v778_v12  ;;  %v48_v33 = vunpack.c.h.bf16 %v762_v3  ;;  %s721_s28 = scalar_lea.vmem %s629_s24, 16  ;;  %p726_p1 = scmp.lt.s32.totalorder %s629_s24, %s629_s24 }
   0x6   :  { %v54_v16 = vsub.f32 %v45_v9, %v49_v13  ;;  %v55_v17 = vsub.f32 %v46_v7, %v50_v14  ;;  %v80_v18 = vsub.f32 %v42_v5, %v50_v14  ;;  %v79_v19 = vsub.f32 %v41_v6, %v49_v13  ;;  %21 = vst.msk [vmem:[#allocation3 + $0x20] sm:$0xff] %vm16_vm1, %v735_v4  ;;  %p722_p0 = scmp.ne.s32.totalorder %s629_s24, %s721_s28  ;;  %p727_p2 = scmp.lt.s32.totalorder %s721_s28, %s721_s28 }
   0x7   :  { %22 = vst.msk [vmem:[#allocation3 + $0x28] sm:$0xff] %vm16_vm1, %v735_v4  ;;  %23 = vst.msk [vmem:[#allocation3 + $0x30] sm:$0xff] %vm16_vm1, %v735_v4  ;;  %679 = vmatprep.subr.bf16.mxu1 %v735_v4  ;;  %191 = vxpose.xlu0.c.b16.start.end [1/1] (short) (narrow) %v754_v1, 16  ;;  %v56_v20 = vsub.f32 %v47_v10, %v51_v15  ;;  %v81_v21 = vsub.f32 %v43_v8, %v51_v15 }
   0x8   :  { %24 = vst.msk [vmem:[#allocation3 + $0x38] sm:$0xff] %vm16_vm1, %v735_v4  ;;  %25 = vst.msk [vmem:[#allocation3 + $0x40] sm:$0xff] %vm16_vm1, %v735_v4  ;;  %323 = vxpose.xlu1.c.b16.start.end [1/1] (short) (narrow) %v762_v3, 16  ;;  %v84_v29 = vand.u32 2147483647, %v80_v18  ;;  %v82_v37 = vsub.f32 %v44_v28, %v52_v31  ;;  %v57_v42 = vsub.f32 %v48_v33, %v52_v31  ;;  %p728_p3 = por %p727_p2, %p726_p1 }
   0x9   :  { %26 = vst.msk [vmem:[#allocation3 + $0x48] sm:$0xff] %vm16_vm1, %v735_v4  ;;  %27 = vst.msk [vmem:[#allocation3 + $0x50] sm:$0xff] %vm16_vm1, %v735_v4  ;;  %v83_v30 = vand.u32 2147483647, %v79_v19  ;;  %v85_v32 = vand.u32 2147483647, %v81_v21 }
   0xa   :  { %28 = vst.msk [vmem:[#allocation3 + $0x58] sm:$0xff] %vm16_vm1, %v735_v4  ;;  %v58_v34 = vand.u32 2147483647, %v54_v16  ;;  %v59_v35 = vand.u32 2147483647, %v55_v17  ;;  %v88_v39 = vsel %vm16_vm1, %v84_v29, 0.0  ;;  %p729_p4 = pnand %p728_p3, %p722_p0 }
   0xb   :  { %389 = vxpose.xlu0.c.b16.start.end [1/1] (short) (narrow) %v37_v11, 16  ;;  %v60_v36 = vand.u32 2147483647, %v56_v20  ;;  %v87_v38 = vsel %vm16_vm1, %v83_v30, 0.0  ;;  %v90_v40 = vsel %vm16_vm1, %v85_v32, 0.0  ;;  %v107_v55 = vld [vmem:[#allocation3] sm:$0xff] }
   0xc   :  { %455 = vxpose.xlu1.c.b16.start.end [1/1] (short) (narrow) %v778_v12, 16  ;;  %v89_v41 = vadd.f32 %v88_v39, %v87_v38  ;;  %v63_v43 = vsel %vm16_vm1, %v58_v34, 0.0  ;;  %v64_v44 = vsel %vm16_vm1, %v59_v35, 0.0  ;;  %v86_v45 = vand.u32 2147483647, %v82_v37  ;;  %v108_v57 = vld [vmem:[#allocation3 + $0x8] sm:$0xff] }
   0xd   :  { %v65_v46 = vadd.f32 %v64_v44, %v63_v43  ;;  %v66_v47 = vsel %vm16_vm1, %v60_v36, 0.0  ;;  %v61_v49 = vand.u32 2147483647, %v57_v42  ;;  %v109_v61 = vld [vmem:[#allocation3 + $0x10] sm:$0xff]  ;;  %v110_v1 = vld [vmem:[#allocation3 + $0x18] sm:$0xff]  ;;  %v111_v5 = vld [vmem:[#allocation3 + $0x20] sm:$0xff] }
   0xe   :  { %v91_v48 = vadd.f32 %v90_v40, %v89_v41  ;;  %v92_v50 = vsel %vm16_vm1, %v86_v45, 0.0  ;;  %v112_v9 = vld [vmem:[#allocation3 + $0x28] sm:$0xff]  ;;  %v113_v13 = vld [vmem:[#allocation3 + $0x30] sm:$0xff] }
   0xf   :  { %v67_v51 = vadd.f32 %v66_v47, %v65_v46  ;;  %v68_v53 = vsel %vm16_vm1, %v61_v49, 0.0  ;;  %v114_v17 = vld [vmem:[#allocation3 + $0x38] sm:$0xff]  ;;  %v115_v21 = vld [vmem:[#allocation3 + $0x40] sm:$0xff] }
  0x10   :  { %v93_v52 = vadd.f32 %v92_v50, %v91_v48  ;;  %v117_v29 = vld [vmem:[#allocation3 + $0x50] sm:$0xff] }
  0x11   :  { %v69_v54 = vadd.f32 %v68_v53, %v67_v51  ;;  %v118_v33 = vld [vmem:[#allocation3 + $0x58] sm:$0xff] }
  0x18   :  { %70 = vadd.xlane.f32.xlu0 %v69_v54 }
  0x19   :  { %94 = vadd.xlane.f32.xlu1 %v93_v52 }
  0x69   :  { %v133_v22 = vpop.trf.xlu0 }
  0x6a   :  { %664 = vmatmul.mubr.msk.bf16.vlgmr.msra.gmra.mrb[0].mxu0 %vm16_vm1, %v133_v22  ;;  %v265_v24 = vpop.trf.xlu1 }
  0x6b   :  { %674 = vmatpush3.bf16.msra.mxu0 %v33_v2  ;;  %675 = vmatprep.mubr.msk.bf16.mxu0 %vm736_vm0, %v735_v4 }
  0x6c   :  { %685 = vmatprep.subr.bf16.mxu0 %v735_v4 }
  0x6d   :  { %v199_v23 = vpop.trf.xlu0 }
  0x6e   :  { %670 = vmatmul.mubr.msk.bf16.vlgmr.msra.gmra.mrb[0].mxu1 %vm16_vm1, %v199_v23  ;;  %v331_v25 = vpop.trf.xlu1 }
  0x6f   :  { %680 = vmatpush3.bf16.msra.mxu1 %v762_v3  ;;  %681 = vmatprep.mubr.msk.bf16.mxu1 %vm736_vm0, %v735_v4 }
  0x70   :  { %691 = vmatprep.subr.bf16.mxu1 %v735_v4 }
  0x71   :  { %v397_v26 = vpop.trf.xlu0 }
  0x72   :  { %676 = vmatmul.mubr.msk.bf16.vlgmr.msra.gmra.mrb[4].mxu0 %vm16_vm1, %v265_v24  ;;  %v463_v27 = vpop.trf.xlu1 }
  0x73   :  { %686 = vmatpush3.bf16.msra.mxu0 %v37_v11  ;;  %687 = vmatprep.mubr.msk.bf16.mxu0 %vm736_vm0, %v735_v4 }
  0x76   :  { %682 = vmatmul.mubr.msk.bf16.vlgmr.msra.gmra.mrb[4].mxu1 %vm16_vm1, %v331_v25  ;;  %v116_v25 = vld [vmem:[#allocation3 + $0x48] sm:$0xff] }
  0x77   :  { %692 = vmatpush3.bf16.msra.mxu1 %v778_v12  ;;  %693 = vmatprep.mubr.msk.bf16.mxu1 %vm736_vm0, %v735_v4 }
  0x7a   :  { %688 = vmatmul.mubr.msk.bf16.vlgmr.msra.gmra.mrb[8].mxu0 %vm16_vm1, %v397_v26 }
  0x7e   :  { %694 = vmatmul.mubr.msk.bf16.vlgmr.msra.gmra.mrb[8].mxu1 %vm16_vm1, %v463_v27 }
 0x13d   :  { %v178_v56 = vpop.f32.mrb[0].mxu0 }
 0x13e   :  { %v515_v58 = vadd.f32 %v178_v56, %v107_v55  ;;  %v665_v59 = vpop.f32.mrb[1].mxu0 }
 0x13f   :  { %v181_v60 = vpop.f32.mrb[2].mxu0 }
 0x140   :  { %527 = vst.msk [vmem:[#allocation3] sm:$0xff] %vm16_vm1, %v515_v58  ;;  %v516_v62 = vadd.f32 %v181_v60, %v108_v57  ;;  %v666_v63 = vpop.f32.mrb[3].mxu0 }
 0x141   :  { %v244_v0 = vpop.f32.mrb[0].mxu1 }
 0x142   :  { %528 = vst.msk [vmem:[#allocation3 + $0x8] sm:$0xff] %vm16_vm1, %v516_v62  ;;  %v517_v2 = vadd.f32 %v244_v0, %v109_v61  ;;  %v671_v3 = vpop.f32.mrb[1].mxu1 }
 0x143   :  { %v247_v4 = vpop.f32.mrb[2].mxu1 }
 0x144   :  { %529 = vst.msk [vmem:[#allocation3 + $0x10] sm:$0xff] %vm16_vm1, %v517_v2  ;;  %v518_v6 = vadd.f32 %v247_v4, %v110_v1  ;;  %v672_v7 = vpop.f32.mrb[3].mxu1 }
 0x145   :  { %v310_v8 = vpop.f32.mrb[4].mxu0 }
 0x146   :  { %530 = vst.msk [vmem:[#allocation3 + $0x18] sm:$0xff] %vm16_vm1, %v518_v6  ;;  %v519_v10 = vadd.f32 %v310_v8, %v111_v5  ;;  %v677_v11 = vpop.f32.mrb[5].mxu0 }
 0x147   :  { %v313_v12 = vpop.f32.mrb[6].mxu0  ;;  %v546_v40 = vld [vmem:[#allocation3] sm:$0xff] }
 0x148   :  { %531 = vst.msk [vmem:[#allocation3 + $0x20] sm:$0xff] %vm16_vm1, %v519_v10  ;;  %v520_v14 = vadd.f32 %v313_v12, %v112_v9  ;;  %v678_v15 = vpop.f32.mrb[7].mxu0  ;;  %v558_v47 = vmul.f32 0.00390625, %v546_v40 }
 0x149   :  { %v376_v16 = vpop.f32.mrb[4].mxu1  ;;  %v547_v41 = vld [vmem:[#allocation3 + $0x8] sm:$0xff] }
 0x14a   :  { %532 = vst.msk [vmem:[#allocation3 + $0x28] sm:$0xff] %vm16_vm1, %v520_v14  ;;  %v521_v18 = vadd.f32 %v376_v16, %v113_v13  ;;  %v683_v19 = vpop.f32.mrb[5].mxu1  ;;  %v559_v49 = vmul.f32 0.00390625, %v547_v41 }
 0x14b   :  { %v379_v20 = vpop.f32.mrb[6].mxu1  ;;  %v548_v53 = vld [vmem:[#allocation3 + $0x10] sm:$0xff] }
 0x14c   :  { %533 = vst.msk [vmem:[#allocation3 + $0x30] sm:$0xff] %vm16_vm1, %v521_v18  ;;  %v522_v22 = vadd.f32 %v379_v20, %v114_v17  ;;  %v684_v23 = vpop.f32.mrb[7].mxu1  ;;  %v560_v0 = vmul.f32 0.00390625, %v548_v53 }
 0x14d   :  { %v442_v24 = vpop.f32.mrb[8].mxu0  ;;  %v549_v54 = vld [vmem:[#allocation3 + $0x18] sm:$0xff] }
 0x14e   :  { %534 = vst.msk [vmem:[#allocation3 + $0x38] sm:$0xff] %vm16_vm1, %v522_v22  ;;  %v523_v26 = vadd.f32 %v442_v24, %v115_v21  ;;  %v689_v27 = vpop.f32.mrb[9].mxu0  ;;  %v561_v1 = vmul.f32 0.00390625, %v549_v54 }
 0x14f   :  { %v445_v28 = vpop.f32.mrb[10].mxu0  ;;  %v550_v39 = vld [vmem:[#allocation3 + $0x20] sm:$0xff] }
 0x150   :  { %535 = vst.msk [vmem:[#allocation3 + $0x40] sm:$0xff] %vm16_vm1, %v523_v26  ;;  %v524_v30 = vadd.f32 %v445_v28, %v116_v25  ;;  %v690_v31 = vpop.f32.mrb[11].mxu0  ;;  %v562_v45 = vmul.f32 0.00390625, %v550_v39 }
 0x151   :  { %v508_v32 = vpop.f32.mrb[8].mxu1  ;;  %v551_v42 = vld [vmem:[#allocation3 + $0x28] sm:$0xff]  ;;  %v71_v31 = vpop.xlane.xlu0 %70 }
 0x152   :  { %536 = vst.msk [vmem:[#allocation3 + $0x48] sm:$0xff] %vm16_vm1, %v524_v30  ;;  %v525_v34 = vadd.f32 %v508_v32, %v117_v29  ;;  %v695_v35 = vpop.f32.mrb[9].mxu1  ;;  %v563_v50 = vmul.f32 0.00390625, %v551_v42  ;;  %v95_v29 = vpop.xlane.xlu1 %94  ;;  %v72_v32 = vrot.slane %v71_v31, 4 }
 0x153   :  { %v511_v36 = vpop.f32.mrb[10].mxu1  ;;  %v552_v44 = vld [vmem:[#allocation3 + $0x30] sm:$0xff]  ;;  %v96_v30 = vrot.slane %v95_v29, 4 }
 0x154   :  { %537 = vst.msk [vmem:[#allocation3 + $0x50] sm:$0xff] %vm16_vm1, %v525_v34  ;;  %v526_v37 = vadd.f32 %v511_v36, %v118_v33  ;;  %v696_v38 = vpop.f32.mrb[11].mxu1  ;;  %v564_v58 = vmul.f32 0.00390625, %v552_v44  ;;  %v73_v34 = vadd.f32 %v72_v32, %v71_v31 }
 0x155   :  { %v553_v56 = vld [vmem:[#allocation3 + $0x38] sm:$0xff]  ;;  %v97_v33 = vadd.f32 %v96_v30, %v95_v29 }
 0x156   :  { %538 = vst.msk [vmem:[#allocation3 + $0x58] sm:$0xff] %vm16_vm1, %v526_v37  ;;  %v565_v3 = vmul.f32 0.00390625, %v553_v56  ;;  %v74_v36 = vrot.slane %v73_v34, 2 }
 0x157   :  { %v554_v43 = vld [vmem:[#allocation3 + $0x40] sm:$0xff]  ;;  %v98_v35 = vrot.slane %v97_v33, 2 }
 0x158   :  { %v566_v46 = vmul.f32 0.00390625, %v554_v43  ;;  %v75_v37 = vadd.f32 %v74_v36, %v73_v34 }
 0x159   :  { %v555_v48 = vld [vmem:[#allocation3 + $0x48] sm:$0xff]  ;;  %v99_v38 = vadd.f32 %v98_v35, %v97_v33 }
 0x15a   :  { %v567_v51 = vmul.f32 0.00390625, %v555_v48  ;;  %v570_v52 = vsub.f32 %v562_v45, %v566_v46  ;;  %v594_v55 = vsub.f32 %v558_v47, %v566_v46  ;;  %v76_v39 = vrot.slane %v75_v37, 1 }
 0x15b   :  { %v556_v57 = vld [vmem:[#allocation3 + $0x50] sm:$0xff]  ;;  %v100_v40 = vrot.slane %v99_v38, 1 }
 0x15c   :  { %v568_v59 = vmul.f32 0.00390625, %v556_v57  ;;  %v571_v60 = vsub.f32 %v563_v50, %v567_v51  ;;  %v574_v61 = vand.u32 2147483647, %v570_v52  ;;  %v595_v62 = vsub.f32 %v559_v49, %v567_v51 }
 0x15d   :  { %v557_v63 = vld [vmem:[#allocation3 + $0x58] sm:$0xff]  ;;  %v598_v2 = vand.u32 2147483647, %v594_v55  ;;  %v77_v41 = vadd.f32 %v76_v39, %v75_v37  ;;  %v101_v42 = vadd.f32 %v100_v40, %v99_v38 }
 0x15e   :  { %v569_v4 = vmul.f32 0.00390625, %v557_v63  ;;  %v572_v5 = vsub.f32 %v564_v58, %v568_v59  ;;  %v575_v6 = vand.u32 2147483647, %v571_v60  ;;  %v578_v7 = vsel %vm16_vm1, %v574_v61, 0.0 }
 0x15f   :  { %v596_v8 = vsub.f32 %v560_v0, %v568_v59  ;;  %v599_v9 = vand.u32 2147483647, %v595_v62  ;;  %v602_v16 = vsel %vm16_vm1, %v598_v2, 0.0  ;;  %697 = vpush %v77_v41 }
 0x160   :  { %v573_v10 = vsub.f32 %v565_v3, %v569_v4  ;;  %v576_v11 = vand.u32 2147483647, %v572_v5  ;;  %v579_v12 = vsel %vm16_vm1, %v575_v6, 0.0  ;;  %v597_v13 = vsub.f32 %v561_v1, %v569_v4  ;;  %699 = vpush %v101_v42 }
 0x161   :  { %v580_v14 = vadd.f32 %v579_v12, %v578_v7  ;;  %v600_v15 = vand.u32 2147483647, %v596_v8  ;;  %v603_v17 = vsel %vm16_vm1, %v599_v9, 0.0 }
 0x162   :  { %v577_v18 = vand.u32 2147483647, %v573_v10  ;;  %v581_v19 = vsel %vm16_vm1, %v576_v11, 0.0  ;;  %v601_v20 = vand.u32 2147483647, %v597_v13  ;;  %v604_v21 = vadd.f32 %v603_v17, %v602_v16 }
 0x163   :  { %v582_v22 = vadd.f32 %v581_v19, %v580_v14  ;;  %v605_v23 = vsel %vm16_vm1, %v600_v15, 0.0 }
 0x164   :  { %v583_v24 = vsel %vm16_vm1, %v577_v18, 0.0  ;;  %v606_v25 = vadd.f32 %v605_v23, %v604_v21  ;;  %v607_v26 = vsel %vm16_vm1, %v601_v20, 0.0 }
 0x165   :  { %v584_v27 = vadd.f32 %v583_v24, %v582_v22 }
 0x166   :  { %v608_v28 = vadd.f32 %v607_v26, %v606_v25 }
 0x167   :  { %585 = vadd.xlane.f32.xlu0 %v584_v27 }
 0x168   :  { %609 = vadd.xlane.f32.xlu1 %v608_v28 }
 0x190   :  { %s698_s0 = spop %697 }
 0x191   :  { %s700_s18 = spop %699 }
 0x192   :  { %s103_s19 = sadd.f32 %s700_s18, %s698_s0 }
 0x194   :  { %s543_s20 = smul.f32 0.001953125, %s103_s19 }
 0x196   :  { %545 = sst [smem:[#allocation4]] %s543_s20 }
 0x1f4   :  { %v586_v43 = vpop.xlane.xlu0 %585 }
 0x1f5   :  { %v587_v44 = vrot.slane %v586_v43, 4  ;;  %v610_v45 = vpop.xlane.xlu1 %609 }
 0x1f6   :  { %v611_v46 = vrot.slane %v610_v45, 4 }
 0x1f7   :  { %v588_v47 = vadd.f32 %v587_v44, %v586_v43 }
 0x1f8   :  { %v612_v48 = vadd.f32 %v611_v46, %v610_v45 }
 0x1f9   :  { %v589_v49 = vrot.slane %v588_v47, 2 }
 0x1fa   :  { %v613_v50 = vrot.slane %v612_v48, 2 }
 0x1fb   :  { %v590_v51 = vadd.f32 %v589_v49, %v588_v47 }
 0x1fc   :  { %v614_v52 = vadd.f32 %v613_v50, %v612_v48 }
 0x1fd   :  { %v591_v53 = vrot.slane %v590_v51, 1 }
 0x1fe   :  { %v615_v54 = vrot.slane %v614_v52, 1 }
 0x1ff   :  { %v592_v55 = vadd.f32 %v591_v53, %v590_v51 }
 0x200   :  { %v616_v56 = vadd.f32 %v615_v54, %v614_v52 }
 0x201   :  { %701 = vpush %v592_v55 }
 0x202   :  { %703 = vpush %v616_v56 }
 0x232   :  { %s702_s21 = spop %701 }
 0x233   :  { %s704_s25 = spop %703 }
 0x234   :  { %s618_s26 = sadd.f32 %s704_s25, %s702_s21 }
 0x236   :  { %s619_s27 = smul.f32 0.001953125, %s618_s26 }
 0x238   :  { %621 = sst [smem:[#allocation4 + $0x1]] %s619_s27 }
 0x239   :  { %732 = shalt.err (!%p729_p4)
}
 0x23a   :  { %s737_s29 = smov [#allocation4]  }
 0x23b   :  { %631 = dma.smem_to_vmem %s737_s29, 16, %s629_s24, [#allocation5]  }
 0x23c   :  { %733 = dma.done.wait [#allocation5], 16  }
 0x23d   :  { %734 = vsyncadd [#allocation5], 4294967280 }
 0x23e   :  { %635 = sfence }
 0x23f   :  { %636 = vsyncpa [#allocation5], 1 }

// kernel: inpainting_loss.11
= control target key start
LH: loop header
LB: loop body
LE: loop exit
PB: predicated region body
PF: predicated region fallthrough
CT: control target
= control target key end

     0   :  { %vm16_vm0 = vcmask 64512   ;;  %v1062_v4 = vmov 0.0   ;;  %s1444_s0 = inlined_call_operand.vmem [shape: bf16[6,64,8], index: 0, kind: input, shape index: {}]   ;;  %s1445_s1 = inlined_call_operand.vmem [shape: f32[2], index: 1, kind: output, shape index: {}]  }
   0x1   :  { %v1078_v0 = vld [vmem:[%s1444_s0 + $0x20] sm:$0xff]   ;;  %v1088_v2 = vld [vmem:[%s1444_s0 + $0x28] sm:$0xff]   ;;  %916 = vmatprep.subr.bf16.mxu0 %v1062_v4  ;;  %17 = vst.msk [vmem:[#allocation3] sm:$0xff] %vm16_vm0, %v1062_v4  ;;  %18 = vst.msk [vmem:[#allocation3 + $0x8] sm:$0xff] %vm16_vm0, %v1062_v4  ;;  %928 = vmatprep.subr.bf16.mxu1 %v1062_v4 }
   0x2   :  { %v1083_v1 = vld [vmem:[%s1444_s0] sm:$0xff]   ;;  %v1093_v3 = vld [vmem:[%s1444_s0 + $0x8] sm:$0xff]   ;;  %19 = vst.msk [vmem:[#allocation3 + $0x10] sm:$0xff] %vm16_vm0, %v1062_v4  ;;  %20 = vst.msk [vmem:[#allocation3 + $0x18] sm:$0xff] %vm16_vm0, %v1062_v4  ;;  %383 = vxpose.xlu1.c.b16.start [1/4] (short) (narrow) %v1078_v0, 16  ;;  %929 = vmatpush3.bf16.msra.mxu1 %v1078_v0  ;;  %v80_v7 = vunpack.c.h.bf16 %v1078_v0 }
   0x3   :  { %21 = vst.msk [vmem:[#allocation3 + $0x20] sm:$0xff] %vm16_vm0, %v1062_v4  ;;  %22 = vst.msk [vmem:[#allocation3 + $0x28] sm:$0xff] %vm16_vm0, %v1062_v4  ;;  %299 = vxpose.xlu0.c.b16.start [1/4] (short) (narrow) %v1083_v1, 16  ;;  %v1115_v5 = vld [vmem:[%s1444_s0 + $0x30] sm:$0xff]   ;;  %917 = vmatpush3.bf16.msra.mxu0 %v1083_v1  ;;  %v1132_v8 = vld [vmem:[%s1444_s0 + $0x38] sm:$0xff]  }
   0x4   :  { %v1121_v6 = vld [vmem:[%s1444_s0 + $0x10] sm:$0xff]   ;;  %918 = vmatprep.subr.bf16.mxu0 %v1062_v4  ;;  %930 = vmatprep.subr.bf16.mxu1 %v1062_v4  ;;  %v1137_v9 = vld [vmem:[%s1444_s0 + $0x18] sm:$0xff]  }
   0x6   :  { %384 = vxpose.xlu1.c.b16.cont [2/4] (short) (narrow) %v1088_v2, 16  ;;  %931 = vmatpush3.bf16.msra.mxu1 %v1088_v2 }
   0x7   :  { %300 = vxpose.xlu0.c.b16.cont [2/4] (short) (narrow) %v1093_v3, 16  ;;  %919 = vmatpush3.bf16.msra.mxu0 %v1093_v3 }
   0x8   :  { %6 = vsyncpa [#allocation5], 0  ;;  %v79_v10 = vunpack.c.l.bf16 %v1078_v0  ;;  %v72_v11 = vunpack.c.h.bf16 %v1083_v1  ;;  %v71_v12 = vunpack.c.l.bf16 %v1083_v1  ;;  %v81_v13 = vunpack.c.l.bf16 %v1088_v2  ;;  %v1147_v14 = vld [vmem:[%s1444_s0 + $0x60] sm:$0xff]   ;;  %920 = vmatprep.subr.bf16.mxu0 %v1062_v4  ;;  %932 = vmatprep.subr.bf16.mxu1 %v1062_v4  ;;  %v1170_v24 = vld [vmem:[%s1444_s0 + $0x68] sm:$0xff]   ;;  %s847_s2 = sshll.u32 %s1445_s1, 4  ;;  %s848_s2 = int_to_ptr.vmem [resolvable:$true] %s847_s2 }
   0x9   :  { %v1152_v15 = vld [vmem:[%s1444_s0 + $0x40] sm:$0xff]   ;;  %v82_v16 = vunpack.c.h.bf16 %v1088_v2  ;;  %v73_v17 = vunpack.c.l.bf16 %v1093_v3  ;;  %v74_v18 = vunpack.c.h.bf16 %v1093_v3  ;;  %v83_v19 = vunpack.c.l.bf16 %v1115_v5  ;;  %v1190_v31 = vld [vmem:[%s1444_s0 + $0xa8] sm:$0xff]   ;;  %v1232_v56 = vld [vmem:[%s1444_s0 + $0x70] sm:$0xff]   ;;  %s1048_s6 = scalar_lea.vmem %s848_s2, 16  ;;  %p1053_p1 = scmp.lt.s32.totalorder %s848_s2, %s848_s2 }
   0xa   :  { %385 = vxpose.xlu1.c.b16.cont [3/4] (short) (narrow) %v1115_v5, 16  ;;  %v95_v20 = vunpack.c.l.bf16 %v1147_v14  ;;  %v96_v21 = vunpack.c.h.bf16 %v1147_v14  ;;  %933 = vmatpush3.bf16.msra.mxu1 %v1115_v5  ;;  %v87_v22 = vunpack.c.l.bf16 %v1152_v15  ;;  %v88_v23 = vunpack.c.h.bf16 %v1152_v15  ;;  %v1175_v25 = vld [vmem:[%s1444_s0 + $0xa0] sm:$0xff]   ;;  %v1214_v47 = vld [vmem:[%s1444_s0 + $0x48] sm:$0xff]   ;;  %v1241_v62 = vld [vmem:[%s1444_s0 + $0x50] sm:$0xff]   ;;  %p1049_p0 = scmp.ne.s32.totalorder %s848_s2, %s1048_s6  ;;  %p1054_p2 = scmp.lt.s32.totalorder %s1048_s6, %s1048_s6 }
   0xb   :  { %301 = vxpose.xlu0.c.b16.cont [3/4] (short) (narrow) %v1121_v6, 16  ;;  %v1180_v26 = vld [vmem:[%s1444_s0 + $0x80] sm:$0xff]   ;;  %921 = vmatpush3.bf16.msra.mxu0 %v1121_v6  ;;  %v97_v27 = vunpack.c.l.bf16 %v1170_v24  ;;  %v111_v28 = vunpack.c.l.bf16 %v1175_v25  ;;  %v112_v29 = vunpack.c.h.bf16 %v1175_v25  ;;  %v98_v32 = vunpack.c.h.bf16 %v1170_v24  ;;  %v1270_v2 = vld [vmem:[%s1444_s0 + $0xb0] sm:$0xff]  }
   0xc   :  { %v103_v30 = vunpack.c.l.bf16 %v1180_v26  ;;  %922 = vmatprep.subr.bf16.mxu0 %v1062_v4  ;;  %934 = vmatprep.subr.bf16.mxu1 %v1062_v4  ;;  %v104_v33 = vunpack.c.h.bf16 %v1180_v26  ;;  %v113_v34 = vunpack.c.l.bf16 %v1190_v31  ;;  %v114_v35 = vunpack.c.h.bf16 %v1190_v31  ;;  %p1055_p3 = por %p1054_p2, %p1053_p1 }
   0xd   :  { %v1199_v36 = vsub.f32 %v95_v20, %v111_v28  ;;  %v1201_v37 = vsub.f32 %v96_v21, %v112_v29  ;;  %v1203_v38 = vsub.f32 %v80_v7, %v112_v29  ;;  %v1205_v39 = vsub.f32 %v79_v10, %v111_v28  ;;  %v1263_v20 = vld [vmem:[%s1444_s0 + $0x78] sm:$0xff]  }
   0xe   :  { %386 = vxpose.xlu1.c.b16.end [4/4] (short) (narrow) %v1132_v8, 16  ;;  %v120_v40 = vsub.f32 %v87_v22, %v103_v30  ;;  %v121_v41 = vsub.f32 %v88_v23, %v104_v33  ;;  %v194_v42 = vsub.f32 %v72_v11, %v104_v33  ;;  %v193_v43 = vsub.f32 %v71_v12, %v103_v30  ;;  %v1257_v12 = vld [vmem:[%s1444_s0 + $0x88] sm:$0xff]   ;;  %p1056_p4 = pnand %p1055_p3, %p1049_p0 }
   0xf   :  { %302 = vxpose.xlu0.c.b16.end [4/4] (short) (narrow) %v1137_v9, 16  ;;  %v84_v44 = vunpack.c.h.bf16 %v1115_v5  ;;  %v75_v45 = vunpack.c.l.bf16 %v1121_v6  ;;  %v76_v46 = vunpack.c.h.bf16 %v1121_v6  ;;  %v1216_v48 = vsub.f32 %v97_v27, %v113_v34  ;;  %923 = vmatpush3.bf16.msra.mxu0 %v1137_v9  ;;  %v1278_v27 = vld [vmem:[%s1444_s0 + $0x58] sm:$0xff]  }
  0x10   :  { %935 = vmatpush3.bf16.msra.mxu1 %v1132_v8  ;;  %v77_v49 = vunpack.c.l.bf16 %v1137_v9  ;;  %v136_v50 = vand.u32 2147483647, %v120_v40  ;;  %v137_v51 = vand.u32 2147483647, %v121_v41  ;;  %v1221_v52 = vsub.f32 %v98_v32, %v114_v35  ;;  %940 = vmatprep.subr.bf16.mxu0 %v1062_v4  ;;  %v1295_v41 = vld [vmem:[%s1444_s0 + $0x90] sm:$0xff]  }
  0x11   :  { %952 = vmatprep.subr.bf16.mxu1 %v1062_v4  ;;  %v78_v53 = vunpack.c.h.bf16 %v1137_v9  ;;  %v89_v54 = vunpack.c.l.bf16 %v1214_v47  ;;  %v210_v55 = vand.u32 2147483647, %v194_v42  ;;  %v209_v59 = vand.u32 2147483647, %v193_v43 }
  0x12   :  { %549 = vxpose.xlu1.c.b16.start [1/4] (short) (narrow) %v1147_v14, 16  ;;  %v153_v57 = vsel %vm16_vm0, %v136_v50, 0.0  ;;  %v154_v58 = vsel %vm16_vm0, %v137_v51, 0.0  ;;  %v90_v60 = vunpack.c.h.bf16 %v1214_v47  ;;  %v99_v61 = vunpack.c.l.bf16 %v1232_v56 }
  0x13   :  { %466 = vxpose.xlu0.c.b16.start [1/4] (short) (narrow) %v1152_v15, 16  ;;  %v155_v63 = vadd.f32 %v154_v58, %v153_v57  ;;  %v226_v0 = vsel %vm16_vm0, %v210_v55, 0.0  ;;  %v100_v1 = vunpack.c.h.bf16 %v1232_v56  ;;  %v225_v7 = vsel %vm16_vm0, %v209_v59, 0.0 }
  0x14   :  { %v1248_v10 = vsub.f32 %v81_v13, %v113_v34  ;;  %v1252_v11 = vsub.f32 %v82_v16, %v114_v35  ;;  %v227_v21 = vadd.f32 %v226_v0, %v225_v7  ;;  %v105_v13 = vunpack.c.l.bf16 %v1257_v12 }
  0x15   :  { %v106_v22 = vunpack.c.h.bf16 %v1257_v12  ;;  %v91_v16 = vunpack.c.l.bf16 %v1241_v62  ;;  %v92_v23 = vunpack.c.h.bf16 %v1241_v62  ;;  %v115_v28 = vunpack.c.l.bf16 %v1270_v2 }
  0x16   :  { %550 = vxpose.xlu1.c.b16.cont [2/4] (short) (narrow) %v1170_v24, 16  ;;  %v122_v29 = vsub.f32 %v89_v54, %v105_v13  ;;  %v195_v32 = vsub.f32 %v73_v17, %v105_v13  ;;  %v116_v34 = vunpack.c.h.bf16 %v1270_v2  ;;  %v107_v3 = vunpack.c.l.bf16 %v1295_v41  ;;  %v1320_v13 = vld [vmem:[%s1444_s0 + $0x98] sm:$0xff]  }
  0x17   :  { %467 = vxpose.xlu0.c.b16.cont [2/4] (short) (narrow) %v1214_v47, 16  ;;  %v123_v30 = vsub.f32 %v90_v60, %v106_v22  ;;  %v196_v33 = vsub.f32 %v74_v18, %v106_v22  ;;  %v1286_v35 = vsub.f32 %v99_v61, %v115_v28  ;;  %v1290_v40 = vsub.f32 %v83_v19, %v115_v28 }
  0x18   :  { %v138_v42 = vand.u32 2147483647, %v122_v29  ;;  %v211_v18 = vand.u32 2147483647, %v195_v32  ;;  %v1300_v50 = vsub.f32 %v100_v1, %v116_v34  ;;  %v1302_v5 = vsub.f32 %v84_v44, %v116_v34 }
  0x19   :  { %v139_v17 = vand.u32 2147483647, %v123_v30  ;;  %v212_v43 = vand.u32 2147483647, %v196_v33  ;;  %v93_v19 = vunpack.c.l.bf16 %v1278_v27  ;;  %v94_v51 = vunpack.c.h.bf16 %v1278_v27 }
  0x1a   :  { %551 = vxpose.xlu1.c.b16.cont [3/4] (short) (narrow) %v1232_v56, 16  ;;  %v156_v54 = vsel %vm16_vm0, %v138_v42, 0.0  ;;  %v228_v58 = vsel %vm16_vm0, %v211_v18, 0.0  ;;  %v108_v60 = vunpack.c.h.bf16 %v1295_v41  ;;  %v124_v44 = vsub.f32 %v91_v16, %v107_v3 }
  0x1b   :  { %468 = vxpose.xlu0.c.b16.cont [3/4] (short) (narrow) %v1241_v62, 16  ;;  %v158_v55 = vsel %vm16_vm0, %v139_v17, 0.0  ;;  %v157_v57 = vadd.f32 %v156_v54, %v155_v63  ;;  %v230_v59 = vsel %vm16_vm0, %v212_v43, 0.0  ;;  %v229_v61 = vadd.f32 %v228_v58, %v227_v21 }
  0x1c   :  { %v197_v0 = vsub.f32 %v75_v45, %v107_v3  ;;  %v125_v7 = vsub.f32 %v92_v23, %v108_v60  ;;  %v198_v63 = vsub.f32 %v76_v46, %v108_v60  ;;  %v144_v22 = vand.u32 2147483647, %v1199_v36 }
  0x1d   :  { %v159_v1 = vadd.f32 %v158_v55, %v157_v57  ;;  %v231_v28 = vadd.f32 %v230_v59, %v229_v61  ;;  %v140_v21 = vand.u32 2147483647, %v124_v44  ;;  %v109_v45 = vunpack.c.l.bf16 %v1320_v13 }
  0x1e   :  { %552 = vxpose.xlu1.c.b16.end [4/4] (short) (narrow) %v1263_v20, 16  ;;  %v213_v16 = vand.u32 2147483647, %v197_v0  ;;  %v141_v29 = vand.u32 2147483647, %v125_v7  ;;  %v110_v46 = vunpack.c.h.bf16 %v1320_v13  ;;  %vm1063_vm1 = vmmov 0  }
  0x1f   :  { %469 = vxpose.xlu0.c.b16.end [4/4] (short) (narrow) %v1278_v27, 16  ;;  %v214_v30 = vand.u32 2147483647, %v198_v63  ;;  %v160_v23 = vsel %vm16_vm0, %v140_v21, 0.0  ;;  %v126_v42 = vsub.f32 %v93_v19, %v109_v45  ;;  %v199_v3 = vsub.f32 %v77_v49, %v109_v45  ;;  %924 = vmatprep.mubr.msk.bf16.mxu0 %vm1063_vm1, %v1062_v4  ;;  %v1343_v49 = vld [vmem:[%s1444_s0 + $0xb8] sm:$0xff]  }
  0x20   :  { %v232_v6 = vsel %vm16_vm0, %v213_v16, 0.0  ;;  %v161_v32 = vadd.f32 %v160_v23, %v159_v1  ;;  %v162_v36 = vsel %vm16_vm0, %v141_v29, 0.0  ;;  %v127_v17 = vsub.f32 %v94_v51, %v110_v46  ;;  %936 = vmatprep.mubr.msk.bf16.mxu1 %vm1063_vm1, %v1062_v4 }
  0x21   :  { %v233_v33 = vadd.f32 %v232_v6, %v231_v28  ;;  %v234_v34 = vsel %vm16_vm0, %v214_v30, 0.0  ;;  %v200_v18 = vsub.f32 %v78_v53, %v110_v46  ;;  %v217_v43 = vand.u32 2147483647, %v1205_v39 }
  0x22   :  { %715 = vxpose.xlu1.c.b16.start [1/4] (short) (narrow) %v1175_v25, 16  ;;  %v163_v54 = vadd.f32 %v162_v36, %v161_v32  ;;  %v142_v57 = vand.u32 2147483647, %v126_v42  ;;  %v143_v58 = vand.u32 2147483647, %v127_v17  ;;  %v168_v61 = vsel %vm16_vm0, %v144_v22, 0.0 }
  0x23   :  { %632 = vxpose.xlu0.c.b16.start [1/4] (short) (narrow) %v1180_v26, 16  ;;  %v235_v55 = vadd.f32 %v234_v34, %v233_v33  ;;  %v215_v9 = vand.u32 2147483647, %v199_v3  ;;  %v216_v53 = vand.u32 2147483647, %v200_v18  ;;  %v240_v0 = vsel %vm16_vm0, %v217_v43, 0.0 }
  0x24   :  { %v164_v39 = vsel %vm16_vm0, %v142_v57, 0.0  ;;  %v166_v19 = vsel %vm16_vm0, %v143_v58, 0.0  ;;  %vm315_vm2 = vcmask 523264   ;;  %v117_v22 = vunpack.c.l.bf16 %v1343_v49 }
  0x25   :  { %v165_v51 = vadd.f32 %v164_v39, %v163_v54  ;;  %v236_v59 = vsel %vm16_vm0, %v215_v9, 0.0  ;;  %v238_v60 = vsel %vm16_vm0, %v216_v53, 0.0  ;;  %v86_v29 = vunpack.c.h.bf16 %v1132_v8 }
  0x26   :  { %716 = vxpose.xlu1.c.b16.cont [2/4] (short) (narrow) %v1190_v31, 16  ;;  %v237_v44 = vadd.f32 %v236_v59, %v235_v55  ;;  %v102_v45 = vunpack.c.h.bf16 %v1263_v20  ;;  %v118_v23 = vunpack.c.h.bf16 %v1343_v49 }
  0x27   :  { %633 = vxpose.xlu0.c.b16.cont [2/4] (short) (narrow) %v1257_v12, 16  ;;  %v167_v1 = vadd.f32 %v166_v19, %v165_v51 }
  0x28   :  { %v239_v7 = vadd.f32 %v238_v60, %v237_v44  ;;  %v135_v43 = vsub.f32 %v102_v45, %v118_v23  ;;  %v270_v44 = vld [vmem:[#allocation3 + $0x8] sm:$0xff] }
  0x29   :  { %v169_v63 = vadd.f32 %v168_v61, %v167_v1 }
  0x2a   :  { %717 = vxpose.xlu1.c.b16.cont [3/4] (short) (narrow) %v1270_v2, 16  ;;  %v241_v28 = vadd.f32 %v240_v0, %v239_v7  ;;  %v151_v9 = vand.u32 2147483647, %v135_v43  ;;  %v269_v0 = vld [vmem:[#allocation3] sm:$0xff] }
  0x2b   :  { %634 = vxpose.xlu0.c.b16.cont [3/4] (short) (narrow) %v1295_v41, 16 }
  0x2c   :  { %v182_v51 = vsel %vm16_vm0, %v151_v9, 0.0 }
  0x2e   :  { %718 = vxpose.xlu1.c.b16.end [4/4] (short) (narrow) %v1343_v49, 16 }
  0x2f   :  { %635 = vxpose.xlu0.c.b16.end [4/4] (short) (narrow) %v1320_v13, 16 }
  0x68   :  { %v391_v21 = vpop.trf.xlu1 }
  0x69   :  { %v307_v16 = vpop.trf.xlu0  ;;  %937 = vmatmul.mubr.msk.bf16.vlgmr.msra.gmra.mrb[0].mxu1 %vm315_vm2, %v391_v21 }
  0x6a   :  { %925 = vmatmul.mubr.msk.bf16.vlgmr.msra.gmra.mrb[0].mxu0 %vm315_vm2, %v307_v16  ;;  %953 = vmatpush3.bf16.msra.mxu1 %v1147_v14 }
  0x6b   :  { %941 = vmatpush3.bf16.msra.mxu0 %v1152_v15  ;;  %954 = vmatprep.subr.bf16.mxu1 %v1062_v4 }
  0x6c   :  { %942 = vmatprep.subr.bf16.mxu0 %v1062_v4  ;;  %948 = vmatprep.mubr.msk.bf16.mxu0 %vm1063_vm1, %v1062_v4 }
  0x6d   :  { %960 = vmatprep.mubr.msk.bf16.mxu1 %vm1063_vm1, %v1062_v4 }
  0x6e   :  { %955 = vmatpush3.bf16.msra.mxu1 %v1170_v24 }
  0x6f   :  { %943 = vmatpush3.bf16.msra.mxu0 %v1214_v47  ;;  %956 = vmatprep.subr.bf16.mxu1 %v1062_v4  ;;  %v146_v47 = vand.u32 2147483647, %v1216_v48  ;;  %v101_v48 = vunpack.c.l.bf16 %v1263_v20 }
  0x70   :  { %944 = vmatprep.subr.bf16.mxu0 %v1062_v4 }
  0x72   :  { %957 = vmatpush3.bf16.msra.mxu1 %v1232_v56  ;;  %v219_v56 = vand.u32 2147483647, %v1248_v10  ;;  %v221_v10 = vand.u32 2147483647, %v1290_v40  ;;  %v222_v40 = vand.u32 2147483647, %v1302_v5 }
  0x73   :  { %945 = vmatpush3.bf16.msra.mxu0 %v1241_v62  ;;  %958 = vmatprep.subr.bf16.mxu1 %v1062_v4 }
  0x74   :  { %946 = vmatprep.subr.bf16.mxu0 %v1062_v4  ;;  %v248_v34 = vsel %vm16_vm0, %v221_v10, 0.0  ;;  %v250_v18 = vsel %vm16_vm0, %v222_v40, 0.0 }
  0x76   :  { %959 = vmatpush3.bf16.msra.mxu1 %v1263_v20  ;;  %v208_v20 = vsub.f32 %v86_v29, %v118_v23 }
  0x77   :  { %947 = vmatpush3.bf16.msra.mxu0 %v1278_v27  ;;  %976 = vmatprep.subr.bf16.mxu1 %v1062_v4  ;;  %v172_v27 = vsel %vm16_vm0, %v146_v47, 0.0 }
  0x78   :  { %v557_v14 = vpop.trf.xlu1  ;;  %964 = vmatprep.subr.bf16.mxu0 %v1062_v4 }
  0x79   :  { %v474_v15 = vpop.trf.xlu0  ;;  %961 = vmatmul.mubr.msk.bf16.vlgmr.msra.gmra.mrb[4].mxu1 %vm315_vm2, %v557_v14 }
  0x7a   :  { %949 = vmatmul.mubr.msk.bf16.vlgmr.msra.gmra.mrb[4].mxu0 %vm315_vm2, %v474_v15  ;;  %977 = vmatpush3.bf16.msra.mxu1 %v1175_v25 }
  0x7b   :  { %965 = vmatpush3.bf16.msra.mxu0 %v1180_v26  ;;  %978 = vmatprep.subr.bf16.mxu1 %v1062_v4  ;;  %v145_v26 = vand.u32 2147483647, %v1201_v37 }
  0x7c   :  { %966 = vmatprep.subr.bf16.mxu0 %v1062_v4  ;;  %972 = vmatprep.mubr.msk.bf16.mxu0 %vm1063_vm1, %v1062_v4 }
  0x7d   :  { %984 = vmatprep.mubr.msk.bf16.mxu1 %vm1063_vm1, %v1062_v4 }
  0x7e   :  { %979 = vmatpush3.bf16.msra.mxu1 %v1190_v31  ;;  %v218_v31 = vand.u32 2147483647, %v1203_v38  ;;  %v85_v38 = vunpack.c.l.bf16 %v1132_v8  ;;  %v134_v8 = vsub.f32 %v101_v48, %v117_v22  ;;  %v273_v48 = vld [vmem:[#allocation3 + $0x20] sm:$0xff] }
  0x7f   :  { %967 = vmatpush3.bf16.msra.mxu0 %v1257_v12  ;;  %980 = vmatprep.subr.bf16.mxu1 %v1062_v4  ;;  %v147_v12 = vand.u32 2147483647, %v1221_v52  ;;  %v148_v52 = vand.u32 2147483647, %v1286_v35  ;;  %v149_v35 = vand.u32 2147483647, %v1300_v50 }
  0x80   :  { %968 = vmatprep.subr.bf16.mxu0 %v1062_v4  ;;  %v242_v62 = vsel %vm16_vm0, %v218_v31, 0.0  ;;  %v207_v33 = vsub.f32 %v85_v38, %v117_v22  ;;  %v150_v55 = vand.u32 2147483647, %v134_v8  ;;  %v271_v31 = vld [vmem:[#allocation3 + $0x10] sm:$0xff]  ;;  %v274_v38 = vld [vmem:[#allocation3 + $0x28] sm:$0xff] }
  0x81   :  { %v174_v46 = vsel %vm16_vm0, %v147_v12, 0.0  ;;  %v176_v17 = vsel %vm16_vm0, %v148_v52, 0.0  ;;  %v178_v58 = vsel %vm16_vm0, %v149_v35, 0.0 }
  0x82   :  { %981 = vmatpush3.bf16.msra.mxu1 %v1270_v2  ;;  %v220_v2 = vand.u32 2147483647, %v1252_v11  ;;  %v223_v3 = vand.u32 2147483647, %v207_v33  ;;  %v180_v50 = vsel %vm16_vm0, %v150_v55, 0.0 }
  0x83   :  { %969 = vmatpush3.bf16.msra.mxu0 %v1295_v41  ;;  %982 = vmatprep.subr.bf16.mxu1 %v1062_v4  ;;  %v244_v41 = vsel %vm16_vm0, %v219_v56, 0.0 }
  0x84   :  { %970 = vmatprep.subr.bf16.mxu0 %v1062_v4  ;;  %v170_v4 = vsel %vm16_vm0, %v145_v26, 0.0  ;;  %v246_v6 = vsel %vm16_vm0, %v220_v2, 0.0  ;;  %v252_v5 = vsel %vm16_vm0, %v223_v3, 0.0  ;;  %v272_v26 = vld [vmem:[#allocation3 + $0x18] sm:$0xff] }
  0x85   :  { %v171_v37 = vadd.f32 %v170_v4, %v169_v63 }
  0x86   :  { %983 = vmatpush3.bf16.msra.mxu1 %v1343_v49  ;;  %v224_v49 = vand.u32 2147483647, %v208_v20 }
  0x87   :  { %971 = vmatpush3.bf16.msra.mxu0 %v1320_v13  ;;  %v243_v13 = vadd.f32 %v242_v62, %v241_v28  ;;  %v173_v11 = vadd.f32 %v172_v27, %v171_v37 }
  0x88   :  { %v723_v24 = vpop.trf.xlu1  ;;  %v254_v19 = vsel %vm16_vm0, %v224_v49, 0.0 }
  0x89   :  { %v640_v25 = vpop.trf.xlu0  ;;  %985 = vmatmul.mubr.msk.bf16.vlgmr.msra.gmra.mrb[8].mxu1 %vm315_vm2, %v723_v24  ;;  %v245_v30 = vadd.f32 %v244_v41, %v243_v13  ;;  %v175_v36 = vadd.f32 %v174_v46, %v173_v11 }
  0x8a   :  { %973 = vmatmul.mubr.msk.bf16.vlgmr.msra.gmra.mrb[8].mxu0 %vm315_vm2, %v640_v25 }
  0x8b   :  { %v247_v32 = vadd.f32 %v246_v6, %v245_v30  ;;  %v177_v57 = vadd.f32 %v176_v17, %v175_v36 }
  0x8d   :  { %v249_v42 = vadd.f32 %v248_v34, %v247_v32  ;;  %v179_v39 = vadd.f32 %v178_v58, %v177_v57 }
  0x8f   :  { %v251_v54 = vadd.f32 %v250_v18, %v249_v42  ;;  %v181_v60 = vadd.f32 %v180_v50, %v179_v39 }
  0x91   :  { %v253_v53 = vadd.f32 %v252_v5, %v251_v54  ;;  %v183_v61 = vadd.f32 %v182_v51, %v181_v60 }
  0x93   :  { %v255_v59 = vadd.f32 %v254_v19, %v253_v53  ;;  %184 = vadd.xlane.f32.xlu0 %v183_v61 }
  0x95   :  { %256 = vadd.xlane.f32.xlu1 %v255_v59 }
 0x122   :  { %v257_v60 = vpop.xlane.xlu1 %256 }
 0x123   :  { %v258_v61 = vrot.slane %v257_v60, 4 }
 0x13c   :  { %v436_v1 = vpop.f32.mrb[0].mxu1 }
 0x13d   :  { %v353_v7 = vpop.f32.mrb[0].mxu0  ;;  %v775_v63 = vadd.f32 %v436_v1, %v270_v44  ;;  %v938_v28 = vpop.f32.mrb[1].mxu1 }
 0x13e   :  { %v774_v21 = vadd.f32 %v353_v7, %v269_v0  ;;  %v926_v16 = vpop.f32.mrb[1].mxu0  ;;  %v439_v14 = vpop.f32.mrb[2].mxu1  ;;  %v259_v0 = vadd.f32 %v258_v61, %v257_v60 }
 0x13f   :  { %781 = vst.msk [vmem:[#allocation3 + $0x8] sm:$0xff] %vm16_vm0, %v775_v63  ;;  %v356_v15 = vpop.f32.mrb[2].mxu0  ;;  %v939_v24 = vpop.f32.mrb[3].mxu1 }
 0x140   :  { %780 = vst.msk [vmem:[#allocation3] sm:$0xff] %vm16_vm0, %v774_v21  ;;  %v927_v25 = vpop.f32.mrb[3].mxu0  ;;  %v185_v44 = vpop.xlane.xlu0 %184  ;;  %v260_v7 = vrot.slane %v259_v0, 2 }
 0x141   :  { %v186_v1 = vrot.slane %v185_v44, 4 }
 0x142   :  { %v261_v21 = vadd.f32 %v260_v7, %v259_v0 }
 0x143   :  { %v187_v63 = vadd.f32 %v186_v1, %v185_v44 }
 0x144   :  { %v262_v14 = vrot.slane %v261_v21, 1 }
 0x145   :  { %v188_v28 = vrot.slane %v187_v63, 2 }
 0x146   :  { %v794_v36 = vld [vmem:[#allocation3 + $0x8] sm:$0xff]  ;;  %v263_v24 = vadd.f32 %v262_v14, %v261_v21 }
 0x147   :  { %v793_v40 = vld [vmem:[#allocation3] sm:$0xff]  ;;  %v800_v17 = vmul.f32 0.001953125, %v794_v36  ;;  %v189_v16 = vadd.f32 %v188_v28, %v187_v63 }
 0x148   :  { %v799_v18 = vmul.f32 0.001953125, %v793_v40 }
 0x149   :  { %v190_v15 = vrot.slane %v189_v16, 1 }
 0x14b   :  { %v191_v25 = vadd.f32 %v190_v15, %v189_v16 }
 0x14c   :  { %v602_v47 = vpop.f32.mrb[4].mxu1 }
 0x14d   :  { %v519_v56 = vpop.f32.mrb[4].mxu0  ;;  %v777_v4 = vadd.f32 %v602_v47, %v272_v26  ;;  %v962_v62 = vpop.f32.mrb[5].mxu1  ;;  %988 = vpush %v191_v25 }
 0x14e   :  { %v776_v12 = vadd.f32 %v519_v56, %v271_v31  ;;  %v950_v2 = vpop.f32.mrb[5].mxu0  ;;  %v605_v27 = vpop.f32.mrb[6].mxu1  ;;  %990 = vpush %v263_v24 }
 0x14f   :  { %783 = vst.msk [vmem:[#allocation3 + $0x18] sm:$0xff] %vm16_vm0, %v777_v4  ;;  %v522_v41 = vpop.f32.mrb[6].mxu0  ;;  %v963_v13 = vpop.f32.mrb[7].mxu1 }
 0x150   :  { %782 = vst.msk [vmem:[#allocation3 + $0x10] sm:$0xff] %vm16_vm0, %v776_v12  ;;  %v951_v37 = vpop.f32.mrb[7].mxu0 }
 0x156   :  { %v796_v32 = vld [vmem:[#allocation3 + $0x18] sm:$0xff] }
 0x157   :  { %v795_v33 = vld [vmem:[#allocation3 + $0x10] sm:$0xff]  ;;  %v802_v42 = vmul.f32 0.001953125, %v796_v32 }
 0x158   :  { %v801_v20 = vmul.f32 0.001953125, %v795_v33 }
 0x15c   :  { %v768_v10 = vpop.f32.mrb[8].mxu1 }
 0x15d   :  { %v685_v22 = vpop.f32.mrb[8].mxu0  ;;  %v779_v29 = vadd.f32 %v768_v10, %v274_v38  ;;  %v986_v52 = vpop.f32.mrb[9].mxu1 }
 0x15e   :  { %v778_v30 = vadd.f32 %v685_v22, %v273_v48  ;;  %v974_v11 = vpop.f32.mrb[9].mxu0  ;;  %v771_v45 = vpop.f32.mrb[10].mxu1 }
 0x15f   :  { %785 = vst.msk [vmem:[#allocation3 + $0x28] sm:$0xff] %vm16_vm0, %v779_v29  ;;  %v688_v23 = vpop.f32.mrb[10].mxu0  ;;  %v987_v6 = vpop.f32.mrb[11].mxu1 }
 0x160   :  { %784 = vst.msk [vmem:[#allocation3 + $0x20] sm:$0xff] %vm16_vm0, %v778_v30  ;;  %v975_v46 = vpop.f32.mrb[11].mxu0 }
 0x166   :  { %v798_v34 = vld [vmem:[#allocation3 + $0x28] sm:$0xff] }
 0x167   :  { %v797_v8 = vld [vmem:[#allocation3 + $0x20] sm:$0xff]  ;;  %v804_v35 = vmul.f32 0.001953125, %v798_v34 }
 0x168   :  { %v803_v3 = vmul.f32 0.001953125, %v797_v8 }
 0x169   :  { %v806_v43 = vsub.f32 %v802_v42, %v804_v35  ;;  %v822_v54 = vsub.f32 %v800_v17, %v804_v35 }
 0x16a   :  { %v805_v55 = vsub.f32 %v801_v20, %v803_v3  ;;  %v821_v57 = vsub.f32 %v799_v18, %v803_v3 }
 0x16b   :  { %v808_v58 = vand.u32 2147483647, %v806_v43  ;;  %v824_v49 = vand.u32 2147483647, %v822_v54 }
 0x16c   :  { %v807_v5 = vand.u32 2147483647, %v805_v55  ;;  %v823_v9 = vand.u32 2147483647, %v821_v57 }
 0x16d   :  { %v810_v53 = vsel %vm16_vm0, %v808_v58, 0.0  ;;  %v826_v39 = vsel %vm16_vm0, %v824_v49, 0.0 }
 0x16e   :  { %v809_v50 = vsel %vm16_vm0, %v807_v5, 0.0  ;;  %v825_v19 = vsel %vm16_vm0, %v823_v9, 0.0 }
 0x16f   :  { %v811_v51 = vadd.f32 %v810_v53, %v809_v50  ;;  %v827_v59 = vadd.f32 %v826_v39, %v825_v19 }
 0x171   :  { %812 = vadd.xlane.f32.xlu0 %v811_v51  ;;  %828 = vadd.xlane.f32.xlu1 %v827_v59 }
 0x17e   :  { %s989_s0 = spop %988 }
 0x17f   :  { %s991_s25 = spop %990 }
 0x180   :  { %s265_s26 = sadd.f32 %s991_s25, %s989_s0 }
 0x182   :  { %s790_s27 = smul.f32 0.0009765625, %s265_s26 }
 0x184   :  { %792 = sst [smem:[#allocation4]] %s790_s27 }
 0x1fe   :  { %v813_v26 = vpop.xlane.xlu0 %812  ;;  %v829_v31 = vpop.xlane.xlu1 %828 }
 0x1ff   :  { %v814_v47 = vrot.slane %v813_v26, 4  ;;  %v830_v56 = vrot.slane %v829_v31, 4 }
 0x201   :  { %v815_v4 = vadd.f32 %v814_v47, %v813_v26  ;;  %v831_v62 = vadd.f32 %v830_v56, %v829_v31 }
 0x203   :  { %v816_v12 = vrot.slane %v815_v4, 2  ;;  %v832_v2 = vrot.slane %v831_v62, 2 }
 0x205   :  { %v817_v27 = vadd.f32 %v816_v12, %v815_v4  ;;  %v833_v41 = vadd.f32 %v832_v2, %v831_v62 }
 0x207   :  { %v818_v13 = vrot.slane %v817_v27, 1  ;;  %v834_v37 = vrot.slane %v833_v41, 1 }
 0x209   :  { %v819_v38 = vadd.f32 %v818_v13, %v817_v27  ;;  %v835_v48 = vadd.f32 %v834_v37, %v833_v41 }
 0x20b   :  { %992 = vpush %v819_v38 }
 0x20c   :  { %994 = vpush %v835_v48 }
 0x23c   :  { %s993_s28 = spop %992 }
 0x23d   :  { %s995_s3 = spop %994 }
 0x23e   :  { %s837_s4 = sadd.f32 %s995_s3, %s993_s28 }
 0x240   :  { %s838_s5 = smul.f32 0.0078125, %s837_s4 }
 0x242   :  { %840 = sst [smem:[#allocation4 + $0x1]] %s838_s5 }
 0x243   :  { %1059 = shalt.err (!%p1056_p4)
}
 0x244   :  { %s1064_s7 = smov [#allocation4]  }
 0x245   :  { %850 = dma.smem_to_vmem %s1064_s7, 16, %s848_s2, [#allocation5]  }
 0x246   :  { %1060 = dma.done.wait [#allocation5], 16  }
 0x247   :  { %1061 = vsyncadd [#allocation5], 4294967280 }
 0x248   :  { %854 = sfence }
 0x249   :  { %855 = vsyncpa [#allocation5], 1 }

// kernel: inpainting_loss.10
= control target key start
LH: loop header
LB: loop body
LE: loop exit
PB: predicated region body
PF: predicated region fallthrough
CT: control target
= control target key end

     0   :  { %v246_v0 = vmov 0   ;;  %vm112_vm0 = vcmask 130048   ;;  %vm183_vm1 = vcmask 257024   ;;  %s315_s1 = inlined_call_operand.vmem [shape: bf16[144,128], index: 1, kind: input, shape index: {}]   ;;  %s316_s0 = inlined_call_operand.vmem [shape: bf16[24,144], index: 0, kind: input, shape index: {}]   ;;  %s317_s2 = inlined_call_operand.vmem [shape: f32[1,128], index: 2, kind: input, shape index: {}]   ;;  %s318_s3 = inlined_call_operand.vmem [shape: bf16[24,32], index: 3, kind: output, shape index: {}]  }
   0x1   :  { %119 = vmatprep.subr.bf16.mxu0 %v246_v0  ;;  %213 = vmatprep.subr.bf16.mxu1 %v246_v0  ;;  %v232_v1 = vld [vmem:[%s315_s1] sm:$0xff]   ;;  %v233_v2 = vld [vmem:[%s315_s1 + $0x8] sm:$0xff]   ;;  %v234_v3 = vld [vmem:[%s315_s1 + $0x10] sm:$0xff]  }
   0x2   :  { %120 = vmatpush1.bf16.msra.mxu0 %v232_v1  ;;  %222 = vmatpush1.bf16.msra.mxu1 %v232_v1  ;;  %v235_v4 = vld [vmem:[%s315_s1 + $0x18] sm:$0xff]   ;;  %v243_v5 = vld [vmem:[%s316_s0 + $0x4] ss:$8 sps:$4 sm:$0xff]   ;;  %v17_v6 = vld [vmem:[%s316_s0 + $0x10] sm:$0xff] }
   0x3   :  { %121 = vmatprep.subr.bf16.mxu0 %v246_v0  ;;  %214 = vmatprep.subr.bf16.mxu1 %v246_v0  ;;  %v195_v7 = vcombine.high %v17_v6, %v17_v6  ;;  %v236_v8 = vld [vmem:[%s315_s1 + $0x20] sm:$0xff]   ;;  %v237_v9 = vld [vmem:[%s315_s1 + $0x28] sm:$0xff]   ;;  %v238_v10 = vld [vmem:[%s315_s1 + $0x30] sm:$0xff]   ;;  %v194_v14 = vcombine.low %v17_v6, %v17_v6 }
   0x4   :  { %205 = vmatprep.mubr.msk.bf16.mxu0 %vm112_vm0, %v243_v5  ;;  %v239_v11 = vld [vmem:[%s315_s1 + $0x38] sm:$0xff]   ;;  %v240_v12 = vld [vmem:[%s315_s1 + $0x40] sm:$0xff]  }
   0x5   :  { %206 = vmatprep.mubr.msk.bf16.mxu1 %vm112_vm0, %v195_v7  ;;  %v241_v13 = vld [vmem:[%s316_s0] ss:$8 sps:$4 sm:$0xff]  }
   0x6   :  { %122 = vmatpush1.bf16.msra.mxu0 %v233_v2  ;;  %223 = vmatpush1.bf16.msra.mxu1 %v233_v2  ;;  %v191_v15 = vld [vmem:[%s317_s2] ss:$0 sm:$0xff] }
   0x7   :  { %123 = vmatprep.subr.bf16.mxu0 %v246_v0  ;;  %215 = vmatprep.subr.bf16.mxu1 %v246_v0 }
   0xa   :  { %124 = vmatpush1.bf16.msra.mxu0 %v234_v3  ;;  %224 = vmatpush1.bf16.msra.mxu1 %v234_v3 }
   0xb   :  { %125 = vmatprep.subr.bf16.mxu0 %v246_v0  ;;  %216 = vmatprep.subr.bf16.mxu1 %v246_v0 }
   0xe   :  { %126 = vmatpush1.bf16.msra.mxu0 %v235_v4  ;;  %225 = vmatpush1.bf16.msra.mxu1 %v235_v4 }
   0xf   :  { %127 = vmatprep.subr.bf16.mxu0 %v246_v0  ;;  %217 = vmatprep.subr.bf16.mxu1 %v246_v0 }
  0x12   :  { %128 = vmatpush1.bf16.msra.mxu0 %v236_v8  ;;  %226 = vmatpush1.bf16.msra.mxu1 %v236_v8 }
  0x13   :  { %129 = vmatprep.subr.bf16.mxu0 %v246_v0  ;;  %218 = vmatprep.subr.bf16.mxu1 %v246_v0 }
  0x16   :  { %130 = vmatpush1.bf16.msra.mxu0 %v237_v9  ;;  %227 = vmatpush1.bf16.msra.mxu1 %v237_v9 }
  0x17   :  { %131 = vmatprep.subr.bf16.mxu0 %v246_v0  ;;  %219 = vmatprep.subr.bf16.mxu1 %v246_v0 }
  0x1a   :  { %132 = vmatpush1.bf16.msra.mxu0 %v238_v10  ;;  %228 = vmatpush1.bf16.msra.mxu1 %v238_v10 }
  0x1b   :  { %133 = vmatprep.subr.bf16.mxu0 %v246_v0  ;;  %220 = vmatprep.subr.bf16.mxu1 %v246_v0 }
  0x1e   :  { %134 = vmatpush1.bf16.msra.mxu0 %v239_v11  ;;  %229 = vmatpush1.bf16.msra.mxu1 %v239_v11 }
  0x1f   :  { %135 = vmatprep.subr.bf16.mxu0 %v246_v0  ;;  %221 = vmatprep.subr.bf16.mxu1 %v246_v0 }
  0x22   :  { %136 = vmatpush1.bf16.msra.mxu0 %v240_v12  ;;  %230 = vmatpush1.bf16.msra.mxu1 %v240_v12 }
  0x25   :  { %152 = vmatmul.mubr.bf16.vlgmr.msra.gmra.mrb[0].mxu0 %v241_v13  ;;  %160 = vmatmul.mubr.bf16.vlgmr.msra.gmra.mrb[0].mxu1 %v194_v14 }
  0xf8   :  { %v153_v16 = vpop.f32.mrb[0].mxu0  ;;  %v161_v17 = vpop.f32.mrb[0].mxu1 }
  0xf9   :  { %v154_v18 = vadd.f32 %v191_v15, %v153_v16  ;;  %v162_v19 = vadd.f32 %v191_v15, %v161_v17  ;;  %v155_v20 = vpop.f32.mrb[1].mxu0  ;;  %v163_v21 = vpop.f32.mrb[1].mxu1 }
  0xfa   :  { %v156_v22 = vpop.f32.mrb[2].mxu0  ;;  %v164_v23 = vpop.f32.mrb[2].mxu1 }
  0xfb   :  { %v167_v24 = vmax.f32 %v154_v18, 0.0  ;;  %v169_v25 = vmax.f32 %v162_v19, 0.0  ;;  %v157_v26 = vadd.f32 %v191_v15, %v156_v22  ;;  %v158_v27 = vpop.f32.mrb[3].mxu0  ;;  %v165_v28 = vpop.f32.mrb[3].mxu1 }
  0xfd   :  { %v210_v29 = vpack.c.bf16 %v167_v24, %v167_v24  ;;  %v212_v30 = vpack.c.bf16 %v169_v25, %v169_v25  ;;  %v168_v31 = vmax.f32 %v157_v26, 0.0 }
  0xff   :  { %184 = vst.msk [vmem:[%s318_s3] sm:$0xf] %vm183_vm1, %v210_v29  ;;  %186 = vst.msk [vmem:[%s318_s3 + $0x8] sm:$0xf] %vm183_vm1, %v212_v30  ;;  %v211_v32 = vpack.c.bf16 %v168_v31, %v168_v31 }
 0x101   :  { %185 = vst.msk [vmem:[%s318_s3 + $0x4] sm:$0xf] %vm183_vm1, %v211_v32 }

// kernel: inpainting_loss.13
= control target key start
LH: loop header
LB: loop body
LE: loop exit
PB: predicated region body
PF: predicated region fallthrough
CT: control target
= control target key end

     0   :  { %vm138_vm0 = vcmask 1041408   ;;  %s1012_s0 = inlined_call_operand.vmem [shape: bf16[6,4,32], index: 0, kind: input, shape index: {}]   ;;  %s1013_s1 = inlined_call_operand.vmem [shape: f32[2], index: 1, kind: output, shape index: {}]  }
   0x1   :  { %v876_v0 = vld [vmem:[%s1012_s0] sm:$0x3]  ;;  %v881_v1 = vld [vmem:[%s1012_s0 + $0x4] sm:$0x3]  ;;  %v888_v2 = vld [vmem:[%s1012_s0 + $0x2] sm:$0x3] }
   0x2   :  { %115 = vxpose.xlu0.c.b16.start.end [1/1] (short) (narrow) %v876_v0, 32  ;;  %265 = vxpose.xlu1.c.b16.start.end [1/1] (short) (narrow) %v881_v1, 32  ;;  %v893_v3 = vld [vmem:[%s1012_s0 + $0x6] sm:$0x3]  ;;  %v140_v4 = vsel %vm138_vm0, %v876_v0, 0  ;;  %v214_v5 = vsel %vm138_vm0, %v888_v2, 0 }
   0x3   :  { %830 = vmatprep.subr.msk.bf16.mxu0 %vm138_vm0, %v876_v0  ;;  %831 = vmatprep.subr.msk.bf16.mxu1 %vm138_vm0, %v888_v2 }
   0x4   :  { %6 = vsyncpa [#allocation5], 0  ;;  %795 = vmatpush3.bf16.msra.mxu0 %v140_v4  ;;  %801 = vmatpush3.bf16.msra.mxu1 %v214_v5  ;;  %vm16_vm1 = vcmask 261120   ;;  %v861_v6 = vmov 0.0   ;;  %v45_v7 = vld [vmem:[%s1012_s0 + $0x8] sm:$0x3]  ;;  %v49_v25 = vunpack.c.l.bf16 %v881_v1  ;;  %v50_v26 = vunpack.c.l.bf16 %v893_v3 }
   0x5   :  { %832 = vmatprep.subr.msk.bf16.mxu0 %vm138_vm0, %v881_v1  ;;  %833 = vmatprep.subr.msk.bf16.mxu1 %vm138_vm0, %v893_v3  ;;  %19 = vst.msk [vmem:[#allocation3 + $0x10] sm:$0xff] %vm16_vm1, %v861_v6  ;;  %17 = vst.msk [vmem:[#allocation3] sm:$0xff] %vm16_vm1, %v861_v6  ;;  %v46_v8 = vld [vmem:[%s1012_s0 + $0xa] sm:$0x3]  ;;  %vm131_vm2 = vcmask 31744   ;;  %v288_v11 = vsel %vm138_vm0, %v881_v1, 0  ;;  %v51_v27 = vunpack.c.l.bf16 %v45_v7  ;;  %v47_v29 = vunpack.c.l.bf16 %v876_v0 }
   0x6   :  { %18 = vst.msk [vmem:[#allocation3 + $0x8] sm:$0xff] %vm16_vm1, %v861_v6  ;;  %20 = vst.msk [vmem:[#allocation3 + $0x18] sm:$0xff] %vm16_vm1, %v861_v6  ;;  %v362_v16 = vsel %vm138_vm0, %v893_v3, 0  ;;  %v436_v17 = vsel %vm138_vm0, %v45_v7, 0  ;;  %v510_v21 = vsel %vm138_vm0, %v46_v8, 0  ;;  %v52_v28 = vunpack.c.l.bf16 %v46_v8  ;;  %s755_s24 = sshll.u32 %s1013_s1, 4  ;;  %s756_s24 = int_to_ptr.vmem [resolvable:$true] %s755_s24 }
   0x7   :  { %21 = vst.msk [vmem:[#allocation3 + $0x20] sm:$0xff] %vm16_vm1, %v861_v6  ;;  %22 = vst.msk [vmem:[#allocation3 + $0x28] sm:$0xff] %vm16_vm1, %v861_v6  ;;  %191 = vxpose.xlu0.c.b16.start.end [1/1] (short) (narrow) %v888_v2, 32  ;;  %339 = vxpose.xlu1.c.b16.start.end [1/1] (short) (narrow) %v893_v3, 32  ;;  %v48_v30 = vunpack.c.l.bf16 %v888_v2  ;;  %v54_v31 = vsub.f32 %v49_v25, %v51_v27  ;;  %vm58_vm3 = vcmask 257024   ;;  %v71_v33 = vsub.f32 %v47_v29, %v51_v27  ;;  %s847_s28 = scalar_lea.vmem %s756_s24, 16  ;;  %p852_p1 = scmp.lt.s32.totalorder %s756_s24, %s756_s24 }
   0x8   :  { %23 = vst.msk [vmem:[#allocation3 + $0x30] sm:$0xff] %vm16_vm1, %v861_v6  ;;  %24 = vst.msk [vmem:[#allocation3 + $0x38] sm:$0xff] %vm16_vm1, %v861_v6  ;;  %v55_v32 = vsub.f32 %v50_v26, %v52_v28  ;;  %p848_p0 = scmp.ne.s32.totalorder %s756_s24, %s847_s28  ;;  %p853_p2 = scmp.lt.s32.totalorder %s847_s28, %s847_s28 }
   0x9   :  { %25 = vst.msk [vmem:[#allocation3 + $0x40] sm:$0xff] %vm16_vm1, %v861_v6  ;;  %26 = vst.msk [vmem:[#allocation3 + $0x48] sm:$0xff] %vm16_vm1, %v861_v6  ;;  %v72_v34 = vsub.f32 %v48_v30, %v52_v28  ;;  %v56_v35 = vand.u32 2147483647, %v54_v31  ;;  %v73_v37 = vand.u32 2147483647, %v71_v33 }
   0xa   :  { %27 = vst.msk [vmem:[#allocation3 + $0x50] sm:$0xff] %vm16_vm1, %v861_v6  ;;  %28 = vst.msk [vmem:[#allocation3 + $0x58] sm:$0xff] %vm16_vm1, %v861_v6  ;;  %v57_v36 = vand.u32 2147483647, %v55_v32  ;;  %p854_p3 = por %p853_p2, %p852_p1 }
   0xb   :  { %29 = vst.msk [vmem:[#allocation3 + $0x60] sm:$0xff] %vm16_vm1, %v861_v6  ;;  %30 = vst.msk [vmem:[#allocation3 + $0x68] sm:$0xff] %vm16_vm1, %v861_v6  ;;  %v74_v38 = vand.u32 2147483647, %v72_v34  ;;  %v59_v39 = vsel %vm58_vm3, %v56_v35, 0.0  ;;  %v75_v42 = vsel %vm58_vm3, %v73_v37, 0.0 }
   0xc   :  { %31 = vst.msk [vmem:[#allocation3 + $0x70] sm:$0xff] %vm16_vm1, %v861_v6  ;;  %32 = vst.msk [vmem:[#allocation3 + $0x78] sm:$0xff] %vm16_vm1, %v861_v6  ;;  %413 = vxpose.xlu0.c.b16.start.end [1/1] (short) (narrow) %v45_v7, 32  ;;  %487 = vxpose.xlu1.c.b16.start.end [1/1] (short) (narrow) %v46_v8, 32  ;;  %v60_v40 = vsel %vm58_vm3, %v57_v36, 0.0  ;;  %v93_v45 = vld [vmem:[#allocation3 + $0x10] sm:$0xff]  ;;  %p855_p4 = pnand %p854_p3, %p848_p0 }
   0xd   :  { %33 = vst.msk [vmem:[#allocation3 + $0x80] sm:$0xff] %vm16_vm1, %v861_v6  ;;  %34 = vst.msk [vmem:[#allocation3 + $0x88] sm:$0xff] %vm16_vm1, %v861_v6  ;;  %v61_v41 = vadd.f32 %v60_v40, %v59_v39  ;;  %v76_v43 = vsel %vm58_vm3, %v74_v38, 0.0  ;;  %v91_v46 = vld [vmem:[#allocation3] sm:$0xff]  ;;  %v94_v48 = vld [vmem:[#allocation3 + $0x18] sm:$0xff] }
   0xe   :  { %35 = vst.msk [vmem:[#allocation3 + $0x90] sm:$0xff] %vm16_vm1, %v861_v6  ;;  %36 = vst.msk [vmem:[#allocation3 + $0x98] sm:$0xff] %vm16_vm1, %v861_v6  ;;  %v77_v44 = vadd.f32 %v76_v43, %v75_v42  ;;  %v92_v51 = vld [vmem:[#allocation3 + $0x8] sm:$0xff]  ;;  %v95_v59 = vld [vmem:[#allocation3 + $0x20] sm:$0xff] }
   0xf   :  { %37 = vst.msk [vmem:[#allocation3 + $0xa0] sm:$0xff] %vm16_vm1, %v861_v6  ;;  %38 = vst.msk [vmem:[#allocation3 + $0xa8] sm:$0xff] %vm16_vm1, %v861_v6  ;;  %v97_v57 = vld [vmem:[#allocation3 + $0x30] sm:$0xff]  ;;  %v98_v63 = vld [vmem:[#allocation3 + $0x38] sm:$0xff] }
  0x10   :  { %39 = vst.msk [vmem:[#allocation3 + $0xb0] sm:$0xff] %vm16_vm1, %v861_v6  ;;  %40 = vst.msk [vmem:[#allocation3 + $0xb8] sm:$0xff] %vm16_vm1, %v861_v6  ;;  %v99_v60 = vld [vmem:[#allocation3 + $0x40] sm:$0xff]  ;;  %v96_v5 = vld [vmem:[#allocation3 + $0x28] sm:$0xff] }
  0x11   :  { %v101_v58 = vld [vmem:[#allocation3 + $0x50] sm:$0xff]  ;;  %v102_v0 = vld [vmem:[#allocation3 + $0x58] sm:$0xff]  ;;  %v100_v6 = vld [vmem:[#allocation3 + $0x48] sm:$0xff] }
  0x12   :  { %v104_v29 = vld [vmem:[#allocation3 + $0x68] sm:$0xff] }
  0x14   :  { %v108_v30 = vld [vmem:[#allocation3 + $0x88] sm:$0xff] }
  0x16   :  { %v111_v42 = vld [vmem:[#allocation3 + $0xa0] sm:$0xff] }
  0x1d   :  { %62 = vadd.xlane.f32.xlu0 %v61_v41  ;;  %78 = vadd.xlane.f32.xlu1 %v77_v44  ;;  %v113_v41 = vld [vmem:[#allocation3 + $0xb0] sm:$0xff] }
  0x68   :  { %v123_v9 = vpop.trf.xlu0  ;;  %v273_v10 = vpop.trf.xlu1 }
  0x69   :  { %796 = vmatprep.mubr.msk.bf16.mxu0 %vm131_vm2, %v123_v9 }
  0x6c   :  { %v124_v12 = vpop.trf.xlu0  ;;  %v274_v13 = vpop.trf.xlu1 }
  0x6d   :  { %797 = vmatmul.mubr.msk.bf16.vlgmr.msra.gmra.mrb[0].mxu0 %vm131_vm2, %v124_v12 }
  0x6e   :  { %807 = vmatpush3.bf16.msra.mxu0 %v288_v11  ;;  %808 = vmatprep.mubr.msk.bf16.mxu0 %vm131_vm2, %v273_v10 }
  0x6f   :  { %834 = vmatprep.subr.msk.bf16.mxu0 %vm138_vm0, %v45_v7 }
  0x70   :  { %v199_v14 = vpop.trf.xlu0  ;;  %v347_v15 = vpop.trf.xlu1 }
  0x71   :  { %802 = vmatprep.mubr.msk.bf16.mxu1 %vm131_vm2, %v199_v14 }
  0x74   :  { %v200_v18 = vpop.trf.xlu0  ;;  %v348_v19 = vpop.trf.xlu1 }
  0x75   :  { %803 = vmatmul.mubr.msk.bf16.vlgmr.msra.gmra.mrb[0].mxu1 %vm131_vm2, %v200_v18  ;;  %809 = vmatmul.mubr.msk.bf16.vlgmr.msra.gmra.mrb[4].mxu0 %vm131_vm2, %v274_v13  ;;  %v109_v18 = vld [vmem:[#allocation3 + $0x90] sm:$0xff] }
  0x76   :  { %813 = vmatpush3.bf16.msra.mxu1 %v362_v16  ;;  %819 = vmatpush3.bf16.msra.mxu0 %v436_v17  ;;  %v105_v17 = vld [vmem:[#allocation3 + $0x70] sm:$0xff] }
  0x77   :  { %814 = vmatprep.mubr.msk.bf16.mxu1 %vm131_vm2, %v347_v15  ;;  %835 = vmatprep.subr.msk.bf16.mxu1 %vm138_vm0, %v46_v8 }
  0x78   :  { %v421_v20 = vpop.trf.xlu0  ;;  %v495_v22 = vpop.trf.xlu1 }
  0x79   :  { %820 = vmatprep.mubr.msk.bf16.mxu0 %vm131_vm2, %v421_v20  ;;  %v107_v20 = vld [vmem:[#allocation3 + $0x80] sm:$0xff] }
  0x7c   :  { %v422_v23 = vpop.trf.xlu0  ;;  %v496_v24 = vpop.trf.xlu1 }
  0x7d   :  { %815 = vmatmul.mubr.msk.bf16.vlgmr.msra.gmra.mrb[4].mxu1 %vm131_vm2, %v348_v19  ;;  %821 = vmatmul.mubr.msk.bf16.vlgmr.msra.gmra.mrb[8].mxu0 %vm131_vm2, %v422_v23  ;;  %v103_v19 = vld [vmem:[#allocation3 + $0x60] sm:$0xff]  ;;  %v106_v23 = vld [vmem:[#allocation3 + $0x78] sm:$0xff] }
  0x7e   :  { %825 = vmatpush3.bf16.msra.mxu1 %v510_v21  ;;  %826 = vmatprep.mubr.msk.bf16.mxu1 %vm131_vm2, %v495_v22 }
  0x85   :  { %827 = vmatmul.mubr.msk.bf16.vlgmr.msra.gmra.mrb[8].mxu1 %vm131_vm2, %v496_v24  ;;  %v110_v24 = vld [vmem:[#allocation3 + $0x98] sm:$0xff] }
 0x140   :  { %v798_v47 = vpop.f32.mrb[0].mxu0 }
 0x141   :  { %v563_v49 = vadd.f32 %v798_v47, %v93_v45  ;;  %v176_v50 = vpop.f32.mrb[1].mxu0 }
 0x142   :  { %v561_v52 = vadd.f32 %v176_v50, %v91_v46  ;;  %v799_v53 = vpop.f32.mrb[2].mxu0 }
 0x143   :  { %588 = vst.msk [vmem:[#allocation3 + $0x10] sm:$0xff] %vm16_vm1, %v563_v49  ;;  %v564_v54 = vadd.f32 %v799_v53, %v94_v48  ;;  %v179_v55 = vpop.f32.mrb[3].mxu0  ;;  %v114_v48 = vld [vmem:[#allocation3 + $0xb8] sm:$0xff]  ;;  %v112_v53 = vld [vmem:[#allocation3 + $0xa8] sm:$0xff] }
 0x144   :  { %586 = vst.msk [vmem:[#allocation3] sm:$0xff] %vm16_vm1, %v561_v52  ;;  %v562_v56 = vadd.f32 %v179_v55, %v92_v51 }
 0x145   :  { %589 = vst.msk [vmem:[#allocation3 + $0x18] sm:$0xff] %vm16_vm1, %v564_v54 }
 0x146   :  { %587 = vst.msk [vmem:[#allocation3 + $0x8] sm:$0xff] %vm16_vm1, %v562_v56 }
 0x148   :  { %v804_v61 = vpop.f32.mrb[0].mxu1  ;;  %v810_v62 = vpop.f32.mrb[4].mxu0 }
 0x149   :  { %v567_v1 = vadd.f32 %v804_v61, %v97_v57  ;;  %v571_v2 = vadd.f32 %v810_v62, %v101_v58  ;;  %v250_v3 = vpop.f32.mrb[1].mxu1  ;;  %v324_v4 = vpop.f32.mrb[5].mxu0 }
 0x14a   :  { %v565_v7 = vadd.f32 %v250_v3, %v95_v59  ;;  %v569_v8 = vadd.f32 %v324_v4, %v99_v60  ;;  %v805_v9 = vpop.f32.mrb[2].mxu1  ;;  %v811_v10 = vpop.f32.mrb[6].mxu0  ;;  %v619_v43 = vld [vmem:[#allocation3 + $0x10] sm:$0xff] }
 0x14b   :  { %592 = vst.msk [vmem:[#allocation3 + $0x30] sm:$0xff] %vm16_vm1, %v567_v1  ;;  %596 = vst.msk [vmem:[#allocation3 + $0x50] sm:$0xff] %vm16_vm1, %v571_v2  ;;  %v568_v11 = vadd.f32 %v805_v9, %v98_v63  ;;  %v572_v12 = vadd.f32 %v811_v10, %v102_v0  ;;  %v253_v13 = vpop.f32.mrb[3].mxu1  ;;  %v327_v14 = vpop.f32.mrb[7].mxu0  ;;  %v617_v44 = vld [vmem:[#allocation3] sm:$0xff]  ;;  %v643_v56 = vmul.f32 0.0078125, %v619_v43 }
 0x14c   :  { %590 = vst.msk [vmem:[#allocation3 + $0x20] sm:$0xff] %vm16_vm1, %v565_v7  ;;  %594 = vst.msk [vmem:[#allocation3 + $0x40] sm:$0xff] %vm16_vm1, %v569_v8  ;;  %v566_v15 = vadd.f32 %v253_v13, %v96_v5  ;;  %v570_v16 = vadd.f32 %v327_v14, %v100_v6  ;;  %v620_v46 = vld [vmem:[#allocation3 + $0x18] sm:$0xff]  ;;  %v641_v61 = vmul.f32 0.0078125, %v617_v44 }
 0x14d   :  { %593 = vst.msk [vmem:[#allocation3 + $0x38] sm:$0xff] %vm16_vm1, %v568_v11  ;;  %597 = vst.msk [vmem:[#allocation3 + $0x58] sm:$0xff] %vm16_vm1, %v572_v12  ;;  %v618_v45 = vld [vmem:[#allocation3 + $0x8] sm:$0xff]  ;;  %v983_v63 = vmul.f32 0.0078125, %v620_v46 }
 0x14e   :  { %591 = vst.msk [vmem:[#allocation3 + $0x28] sm:$0xff] %vm16_vm1, %v566_v15  ;;  %595 = vst.msk [vmem:[#allocation3 + $0x48] sm:$0xff] %vm16_vm1, %v570_v16  ;;  %v642_v62 = vmul.f32 0.0078125, %v618_v45 }
 0x150   :  { %v816_v21 = vpop.f32.mrb[4].mxu1  ;;  %v822_v22 = vpop.f32.mrb[8].mxu0 }
 0x151   :  { %v575_v25 = vadd.f32 %v816_v21, %v105_v17  ;;  %v579_v26 = vadd.f32 %v822_v22, %v109_v18  ;;  %v398_v27 = vpop.f32.mrb[5].mxu1  ;;  %v472_v28 = vpop.f32.mrb[9].mxu0 }
 0x152   :  { %v573_v31 = vadd.f32 %v398_v27, %v103_v19  ;;  %v577_v32 = vadd.f32 %v472_v28, %v107_v20  ;;  %v817_v33 = vpop.f32.mrb[6].mxu1  ;;  %v823_v34 = vpop.f32.mrb[10].mxu0  ;;  %v627_v49 = vld [vmem:[#allocation3 + $0x50] sm:$0xff] }
 0x153   :  { %600 = vst.msk [vmem:[#allocation3 + $0x70] sm:$0xff] %vm16_vm1, %v575_v25  ;;  %604 = vst.msk [vmem:[#allocation3 + $0x90] sm:$0xff] %vm16_vm1, %v579_v26  ;;  %v576_v35 = vadd.f32 %v817_v33, %v106_v23  ;;  %v580_v36 = vadd.f32 %v823_v34, %v110_v24  ;;  %v401_v37 = vpop.f32.mrb[7].mxu1  ;;  %v475_v38 = vpop.f32.mrb[11].mxu0  ;;  %v623_v50 = vld [vmem:[#allocation3 + $0x30] sm:$0xff]  ;;  %v625_v54 = vld [vmem:[#allocation3 + $0x40] sm:$0xff] }
 0x154   :  { %598 = vst.msk [vmem:[#allocation3 + $0x60] sm:$0xff] %vm16_vm1, %v573_v31  ;;  %602 = vst.msk [vmem:[#allocation3 + $0x80] sm:$0xff] %vm16_vm1, %v577_v32  ;;  %v574_v39 = vadd.f32 %v401_v37, %v104_v29  ;;  %v578_v40 = vadd.f32 %v475_v38, %v108_v30  ;;  %v621_v55 = vld [vmem:[#allocation3 + $0x20] sm:$0xff]  ;;  %v628_v59 = vld [vmem:[#allocation3 + $0x58] sm:$0xff]  ;;  %v651_v4 = vmul.f32 0.0078125, %v627_v49  ;;  %v986_v6 = vmul.f32 0.0078125, %v623_v50 }
 0x155   :  { %601 = vst.msk [vmem:[#allocation3 + $0x78] sm:$0xff] %vm16_vm1, %v576_v35  ;;  %605 = vst.msk [vmem:[#allocation3 + $0x98] sm:$0xff] %vm16_vm1, %v580_v36  ;;  %v626_v2 = vld [vmem:[#allocation3 + $0x48] sm:$0xff]  ;;  %v649_v9 = vmul.f32 0.0078125, %v625_v54  ;;  %v624_v12 = vld [vmem:[#allocation3 + $0x38] sm:$0xff]  ;;  %v645_v13 = vmul.f32 0.0078125, %v621_v55 }
 0x156   :  { %599 = vst.msk [vmem:[#allocation3 + $0x68] sm:$0xff] %vm16_vm1, %v574_v39  ;;  %603 = vst.msk [vmem:[#allocation3 + $0x88] sm:$0xff] %vm16_vm1, %v578_v40  ;;  %v622_v11 = vld [vmem:[#allocation3 + $0x28] sm:$0xff]  ;;  %v652_v16 = vmul.f32 0.0078125, %v628_v59  ;;  %v650_v22 = vmul.f32 0.0078125, %v626_v2  ;;  %v648_v30 = vmul.f32 0.0078125, %v624_v12 }
 0x157   :  { %v646_v29 = vmul.f32 0.0078125, %v622_v11 }
 0x158   :  { %v828_v47 = vpop.f32.mrb[8].mxu1 }
 0x159   :  { %v583_v51 = vadd.f32 %v828_v47, %v113_v41  ;;  %v546_v52 = vpop.f32.mrb[9].mxu1 }
 0x15a   :  { %v581_v57 = vadd.f32 %v546_v52, %v111_v42  ;;  %v829_v58 = vpop.f32.mrb[10].mxu1  ;;  %v635_v60 = vld [vmem:[#allocation3 + $0x90] sm:$0xff] }
 0x15b   :  { %608 = vst.msk [vmem:[#allocation3 + $0xb0] sm:$0xff] %vm16_vm1, %v583_v51  ;;  %v584_v0 = vadd.f32 %v829_v58, %v114_v48  ;;  %v549_v1 = vpop.f32.mrb[11].mxu1  ;;  %v633_v3 = vld [vmem:[#allocation3 + $0x80] sm:$0xff]  ;;  %v659_v5 = vmul.f32 0.0078125, %v635_v60  ;;  %v631_v14 = vld [vmem:[#allocation3 + $0x70] sm:$0xff] }
 0x15c   :  { %606 = vst.msk [vmem:[#allocation3 + $0xa0] sm:$0xff] %vm16_vm1, %v581_v57  ;;  %v582_v7 = vadd.f32 %v549_v1, %v112_v53  ;;  %v636_v8 = vld [vmem:[#allocation3 + $0x98] sm:$0xff]  ;;  %v657_v10 = vmul.f32 0.0078125, %v633_v3  ;;  %v629_v20 = vld [vmem:[#allocation3 + $0x60] sm:$0xff]  ;;  %v655_v31 = vmul.f32 0.0078125, %v631_v14 }
 0x15d   :  { %609 = vst.msk [vmem:[#allocation3 + $0xb8] sm:$0xff] %vm16_vm1, %v584_v0  ;;  %v634_v15 = vld [vmem:[#allocation3 + $0x88] sm:$0xff]  ;;  %v660_v17 = vmul.f32 0.0078125, %v636_v8  ;;  %v667_v18 = vsub.f32 %v651_v4, %v659_v5  ;;  %v707_v19 = vsub.f32 %v643_v56, %v659_v5  ;;  %v632_v21 = vld [vmem:[#allocation3 + $0x78] sm:$0xff]  ;;  %v653_v35 = vmul.f32 0.0078125, %v629_v20 }
 0x15e   :  { %607 = vst.msk [vmem:[#allocation3 + $0xa8] sm:$0xff] %vm16_vm1, %v582_v7  ;;  %v658_v23 = vmul.f32 0.0078125, %v634_v15  ;;  %v665_v24 = vsub.f32 %v649_v9, %v657_v10  ;;  %v705_v25 = vsub.f32 %v641_v61, %v657_v10  ;;  %v630_v26 = vld [vmem:[#allocation3 + $0x68] sm:$0xff]  ;;  %v656_v36 = vmul.f32 0.0078125, %v632_v21 }
 0x15f   :  { %v668_v27 = vsub.f32 %v652_v16, %v660_v17  ;;  %v675_v28 = vand.u32 2147483647, %v667_v18  ;;  %v715_v38 = vand.u32 2147483647, %v707_v19  ;;  %v654_v40 = vmul.f32 0.0078125, %v630_v26 }
 0x160   :  { %v666_v32 = vsub.f32 %v650_v22, %v658_v23  ;;  %v673_v33 = vand.u32 2147483647, %v665_v24  ;;  %v706_v34 = vsub.f32 %v642_v62, %v658_v23  ;;  %v713_v37 = vand.u32 2147483647, %v705_v25 }
 0x161   :  { %v676_v45 = vand.u32 2147483647, %v668_v27  ;;  %v684_v46 = vsel %vm16_vm1, %v675_v28, 0.0  ;;  %v708_v47 = vsub.f32 %v983_v63, %v660_v17  ;;  %v724_v10 = vsel %vm16_vm1, %v715_v38, 0.0 }
 0x162   :  { %v639_v39 = vld [vmem:[#allocation3 + $0xb0] sm:$0xff]  ;;  %v674_v41 = vand.u32 2147483647, %v666_v32  ;;  %v714_v42 = vand.u32 2147483647, %v706_v34  ;;  %v681_v50 = vsel %vm16_vm1, %v673_v33, 0.0 }
 0x163   :  { %v637_v43 = vld [vmem:[#allocation3 + $0xa0] sm:$0xff]  ;;  %v663_v44 = vmul.f32 0.0078125, %v639_v39  ;;  %v721_v57 = vsel %vm16_vm1, %v713_v37, 0.0  ;;  %v686_v0 = vsel %vm16_vm1, %v676_v45, 0.0  ;;  %v716_v1 = vand.u32 2147483647, %v708_v47  ;;  %v79_v37 = vpop.xlane.xlu1 %78 }
 0x164   :  { %v640_v48 = vld [vmem:[#allocation3 + $0xb8] sm:$0xff]  ;;  %v661_v49 = vmul.f32 0.0078125, %v637_v43  ;;  %v682_v51 = vsel %vm16_vm1, %v674_v41, 0.0  ;;  %v722_v52 = vsel %vm16_vm1, %v714_v42, 0.0  ;;  %v80_v38 = vrot.slane %v79_v37, 4 }
 0x165   :  { %v638_v53 = vld [vmem:[#allocation3 + $0xa8] sm:$0xff]  ;;  %v664_v54 = vmul.f32 0.0078125, %v640_v48  ;;  %v671_v55 = vsub.f32 %v655_v31, %v663_v44  ;;  %v683_v56 = vadd.f32 %v682_v51, %v681_v50  ;;  %v723_v61 = vadd.f32 %v722_v52, %v721_v57 }
 0x166   :  { %v662_v58 = vmul.f32 0.0078125, %v638_v53  ;;  %v669_v59 = vsub.f32 %v653_v35, %v661_v49  ;;  %v709_v60 = vsub.f32 %v645_v13, %v661_v49  ;;  %v711_v9 = vsub.f32 %v986_v6, %v663_v44  ;;  %v63_v35 = vpop.xlane.xlu0 %62 }
 0x167   :  { %v672_v62 = vsub.f32 %v656_v36, %v664_v54  ;;  %v685_v63 = vadd.f32 %v684_v46, %v683_v56  ;;  %v679_v7 = vand.u32 2147483647, %v671_v55  ;;  %v725_v14 = vadd.f32 %v724_v10, %v723_v61 }
 0x168   :  { %v670_v2 = vsub.f32 %v654_v40, %v662_v58  ;;  %v677_v3 = vand.u32 2147483647, %v669_v59  ;;  %v710_v4 = vsub.f32 %v646_v29, %v662_v58  ;;  %v717_v5 = vand.u32 2147483647, %v709_v60 }
 0x169   :  { %v687_v8 = vadd.f32 %v686_v0, %v685_v63  ;;  %v712_v16 = vsub.f32 %v648_v30, %v664_v54  ;;  %v726_v17 = vsel %vm16_vm1, %v716_v1, 0.0  ;;  %v680_v19 = vand.u32 2147483647, %v672_v62 }
 0x16a   :  { %v678_v11 = vand.u32 2147483647, %v670_v2  ;;  %v688_v12 = vsel %vm16_vm1, %v677_v3, 0.0  ;;  %v718_v13 = vand.u32 2147483647, %v710_v4  ;;  %v728_v18 = vsel %vm16_vm1, %v717_v5, 0.0 }
 0x16b   :  { %v689_v15 = vadd.f32 %v688_v12, %v687_v8  ;;  %v727_v21 = vadd.f32 %v726_v17, %v725_v14  ;;  %v719_v23 = vand.u32 2147483647, %v711_v9  ;;  %v692_v24 = vsel %vm16_vm1, %v679_v7, 0.0 }
 0x16c   :  { %v690_v20 = vsel %vm16_vm1, %v678_v11, 0.0  ;;  %v730_v6 = vsel %vm16_vm1, %v718_v13, 0.0  ;;  %v720_v27 = vand.u32 2147483647, %v712_v16  ;;  %v694_v28 = vsel %vm16_vm1, %v680_v19, 0.0 }
 0x16d   :  { %v691_v22 = vadd.f32 %v690_v20, %v689_v15  ;;  %v729_v25 = vadd.f32 %v728_v18, %v727_v21  ;;  %v732_v31 = vsel %vm16_vm1, %v719_v23, 0.0  ;;  %v64_v36 = vrot.slane %v63_v35, 4 }
 0x16e   :  { %v734_v33 = vsel %vm16_vm1, %v720_v27, 0.0  ;;  %v81_v40 = vadd.f32 %v80_v38, %v79_v37 }
 0x16f   :  { %v693_v26 = vadd.f32 %v692_v24, %v691_v22  ;;  %v731_v29 = vadd.f32 %v730_v6, %v729_v25  ;;  %v65_v39 = vadd.f32 %v64_v36, %v63_v35 }
 0x170   :  { %v82_v42 = vrot.slane %v81_v40, 2 }
 0x171   :  { %v695_v30 = vadd.f32 %v694_v28, %v693_v26  ;;  %v733_v32 = vadd.f32 %v732_v31, %v731_v29  ;;  %v66_v41 = vrot.slane %v65_v39, 2 }
 0x172   :  { %v83_v44 = vadd.f32 %v82_v42, %v81_v40 }
 0x173   :  { %696 = vadd.xlane.f32.xlu0 %v695_v30  ;;  %v735_v34 = vadd.f32 %v734_v33, %v733_v32  ;;  %v67_v43 = vadd.f32 %v66_v41, %v65_v39 }
 0x174   :  { %v84_v46 = vrot.slane %v83_v44, 1 }
 0x175   :  { %736 = vadd.xlane.f32.xlu1 %v735_v34  ;;  %v68_v45 = vrot.slane %v67_v43, 1 }
 0x176   :  { %v85_v48 = vadd.f32 %v84_v46, %v83_v44 }
 0x177   :  { %v69_v47 = vadd.f32 %v68_v45, %v67_v43 }
 0x179   :  { %836 = vpush %v69_v47 }
 0x17a   :  { %838 = vpush %v85_v48 }
 0x1aa   :  { %s837_s0 = spop %836 }
 0x1ab   :  { %s839_s18 = spop %838 }
 0x1ac   :  { %s87_s19 = sadd.f32 %s839_s18, %s837_s0 }
 0x1ae   :  { %s614_s20 = smul.f32 0.00390625, %s87_s19 }
 0x1b0   :  { %616 = sst [smem:[#allocation4]] %s614_s20 }
 0x200   :  { %v697_v49 = vpop.xlane.xlu0 %696 }
 0x201   :  { %v698_v50 = vrot.slane %v697_v49, 4 }
 0x202   :  { %v737_v52 = vpop.xlane.xlu1 %736 }
 0x203   :  { %v699_v51 = vadd.f32 %v698_v50, %v697_v49  ;;  %v738_v53 = vrot.slane %v737_v52, 4 }
 0x205   :  { %v700_v54 = vrot.slane %v699_v51, 2  ;;  %v739_v55 = vadd.f32 %v738_v53, %v737_v52 }
 0x207   :  { %v701_v56 = vadd.f32 %v700_v54, %v699_v51  ;;  %v740_v57 = vrot.slane %v739_v55, 2 }
 0x209   :  { %v702_v58 = vrot.slane %v701_v56, 1  ;;  %v741_v59 = vadd.f32 %v740_v57, %v739_v55 }
 0x20b   :  { %v703_v60 = vadd.f32 %v702_v58, %v701_v56  ;;  %v742_v61 = vrot.slane %v741_v59, 1 }
 0x20d   :  { %840 = vpush %v703_v60  ;;  %v743_v62 = vadd.f32 %v742_v61, %v741_v59 }
 0x20f   :  { %842 = vpush %v743_v62 }
 0x23e   :  { %s841_s21 = spop %840 }
 0x240   :  { %s843_s25 = spop %842 }
 0x241   :  { %s745_s26 = sadd.f32 %s843_s25, %s841_s21 }
 0x243   :  { %s746_s27 = smul.f32 0.00048828125, %s745_s26 }
 0x245   :  { %748 = sst [smem:[#allocation4 + $0x1]] %s746_s27 }
 0x246   :  { %858 = shalt.err (!%p855_p4)
}
 0x247   :  { %s862_s29 = smov [#allocation4]  }
 0x248   :  { %758 = dma.smem_to_vmem %s862_s29, 16, %s756_s24, [#allocation5]  }
 0x249   :  { %859 = dma.done.wait [#allocation5], 16  }
 0x24a   :  { %860 = vsyncadd [#allocation5], 4294967280 }
 0x24b   :  { %762 = sfence }
 0x24c   :  { %763 = vsyncpa [#allocation5], 1 }

</bundles_post_ra>
